<compile_context>
chip_gen: v6e
topology: v6e:2x2x1
jax: 0.10.0
libtpu: 0.0.40
codegen_flags: <defaults>
</compile_context>

<pallas_src>
import functools

import jax
import jax.numpy as jnp
from jax.experimental import pallas as pl
from jax.experimental.pallas import tpu as pltpu  # noqa: F401  (kept for scaling variants)


# ----------------------------------------------------------------------------
# Packed-weight-slab layout (all offsets / row counts are multiples of 8)
# ----------------------------------------------------------------------------
def _round8(n):
    return ((n + 7) // 8) * 8


def _pack_layout(num_layers, input_size, hidden_size):
    """Row layout of the single packed (rows, 4H) weight slab.

    Per LSTM layer (encoder layers first, then decoder layers):
        wih (in_rows, 4H) | whh (H, 4H) | bias (1, 4H) stored in an 8-row block
    Then the FC weights, column-padded to 4H: fc_w (H, 4H) | fc_b (1, 4H).
    """
    H = hidden_size
    Ip = _round8(max(input_size, 1))
    layers = []
    off = 0
    for stack in range(2):                      # 0 = encoder, 1 = decoder
        for l in range(num_layers):
            in_rows = Ip if (stack == 0 and l == 0) else H
            e = {"wih": (off, in_rows)}
            off += _round8(in_rows)
            e["whh"] = (off, H)
            off += _round8(H)
            e["b"] = off
            off += 8
            layers.append(e)
    fc = {"w": (off, H)}
    off += _round8(H)
    fc["b"] = off
    off += 8
    return layers, fc, off, Ip


# ----------------------------------------------------------------------------
# Fused Pallas kernel: whole AE forward
# ----------------------------------------------------------------------------
def ae_kernel(num_layers, S, Bp, H, lay, fc, x_ref, w_ref, out_ref):
    """x_ref: (S*Bp, Ip) time-major flattened (row t*Bp + b), batch/feature padded.
    w_ref: (rows, 4H) packed weight slab, gate columns in i|f|o|g order.
    out_ref: (S*Bp, 4H) lane-dense FC output (first O columns are real)."""

    def wslab(off, rows):
        return w_ref[off:off + rows, :]          # aligned (mult-of-8, 4H) slice

    def bias(off):
        return w_ref[off:off + 1, :]

    def sig(x):
        # logistic via a single EUP tanh: sigmoid(x) = 0.5 * (1 + tanh(x/2))
        return 0.5 * (jnp.tanh(0.5 * x) + 1.0)

    def gates(p, c):
        # fused pre-activation slab p: (Bp, 4H), gate columns i | f | o | g
        sg = sig(p[:, 0:3 * H])                  # ONE transcendental for i, f, o
        g = jnp.tanh(p[:, 3 * H:4 * H])
        i, f, o = sg[:, 0:H], sg[:, H:2 * H], sg[:, 2 * H:3 * H]
        c_new = f * c + i * g
        return o * jnp.tanh(c_new), c_new

    def run_layer(px_fn, whh, h0, c0):
        """Serial recurrence; h/c carried in registers, sequence returned as a list."""
        h, c = h0, c0
        hs = []
        for t in range(S):                       # statically unrolled; S is small
            p = px_fn(t) + jnp.dot(h, whh, preferred_element_type=jnp.float32)
            h, c = gates(p, c)
            hs.append(h)
        return hs, h, c

    def input_proj(inp2d, wih, b):
        # one batched MXU matmul covering ALL timesteps of this layer
        return jnp.dot(inp2d, wih, preferred_element_type=jnp.float32) + b

    zeros = jnp.zeros((Bp, H), jnp.float32)

    # ------------------------------ encoder ------------------------------
    inp2d = x_ref[...]                           # (S*Bp, Ip)
    h_enc, c_enc = [], []
    for l in range(num_layers):
        e = lay[l]
        px = input_proj(inp2d, wslab(*e["wih"]), bias(e["b"]))      # (S*Bp, 4H)
        hs, hf, cf = run_layer(lambda t, px=px: px[t * Bp:(t + 1) * Bp, :],
                               wslab(*e["whh"]), zeros, zeros)
        h_enc.append(hf)
        c_enc.append(cf)
        if l + 1 < num_layers:                   # last encoder sequence is unused
            inp2d = jnp.concatenate(hs, axis=0)  # single per-layer materialization

    # ------------------------------ decoder ------------------------------
    # Layer 0 input is h_enc[-1] repeated over time -> its input projection is
    # time-invariant: compute it once, outside the recurrence.
    e = lay[num_layers]
    pz = (jnp.dot(h_enc[-1], wslab(*e["wih"]), preferred_element_type=jnp.float32)
          + bias(e["b"]))                        # (Bp, 4H), computed once
    hs, _, _ = run_layer(lambda t: pz, wslab(*e["whh"]), h_enc[0], c_enc[0])
    seq = jnp.concatenate(hs, axis=0)            # (S*Bp, H)

    for l in range(1, num_layers):
        e = lay[num_layers + l]
        px = input_proj(seq, wslab(*e["wih"]), bias(e["b"]))
        hs, _, _ = run_layer(lambda t, px=px: px[t * Bp:(t + 1) * Bp, :],
                             wslab(*e["whh"]), h_enc[l], c_enc[l])
        seq = jnp.concatenate(hs, axis=0)

    # --------------------------- FC epilogue -----------------------------
    # fc_w/fc_b are column-padded to 4H, so this store is a full lane-dense slab.
    out_ref[...] = (jnp.dot(seq, wslab(*fc["w"]), preferred_element_type=jnp.float32)
                    + bias(fc["b"]))


# ----------------------------------------------------------------------------
# Wrapper
# ----------------------------------------------------------------------------
def _perm_gates(w, H):
    """Gate column order i|f|g|o (PyTorch-style packing) -> kernel order i|f|o|g."""
    return jnp.concatenate([w[:, :2 * H], w[:, 3 * H:4 * H], w[:, 2 * H:3 * H]], axis=1)


def _pad_rows(a, rows):
    return jnp.pad(a.astype(jnp.float32), ((0, rows - a.shape[0]), (0, 0)))


def ae_forward(x, params, num_layers, hidden_size):
    """x: (B, S, input_size), batch-first like the PyTorch module. Returns (B, S, O)."""
    B, S, I = x.shape
    H = hidden_size
    O = params["fc_w"].shape[1]
    assert O <= 4 * H, "FC output wider than the packed 4H gate slab"

    Bp = _round8(B)                              # pad batch to the f32 sublane tile
    lay, fc, total_rows, Ip = _pack_layout(num_layers, I, H)

    # Time-major + batch/feature zero-padding: every per-step slab becomes a
    # full, aligned (8, lanes) tile; padded rows are dropped at the end.
    x_tm = jnp.transpose(x, (1, 0, 2)).astype(jnp.float32)        # (S, B, I)
    x_tm = jnp.pad(x_tm, ((0, 0), (0, Bp - B), (0, Ip - I)))
    x2d = x_tm.reshape(S * Bp, Ip)

    # Pack ALL weights into one (rows, 4H) slab -> a single coalesced DMA.
    blocks = []
    for idx, (wih, whh, b) in enumerate(list(params["enc"]) + list(params["dec"])):
        e = lay[idx]
        blocks.append(_pad_rows(_perm_gates(wih, H), _round8(e["wih"][1])))
        blocks.append(_pad_rows(_perm_gates(whh, H), _round8(e["whh"][1])))
        blocks.append(_pad_rows(_perm_gates(b, H), 8))
    blocks.append(_pad_rows(jnp.pad(params["fc_w"].astype(jnp.float32),
                                    ((0, 0), (0, 4 * H - O))), _round8(H)))
    blocks.append(_pad_rows(jnp.pad(params["fc_b"].astype(jnp.float32),
                                    ((0, 0), (0, 4 * H - O))), 8))
    w_all = jnp.concatenate(blocks, axis=0)
    assert w_all.shape == (total_rows, 4 * H)

    out2d = pl.pallas_call(
        functools.partial(ae_kernel, num_layers, S, Bp, H, lay, fc),
        out_shape=jax.ShapeDtypeStruct((S * Bp, 4 * H), jnp.float32),
    )(x2d, w_all)

    # Drop FC column padding and batch padding, back to batch-first.
    out = out2d[:, :O].reshape(S, Bp, O)[:, :B]
    return jnp.transpose(out, (1, 0, 2))


# ----------------------------------------------------------------------------
# Deterministic parameter init (PyTorch-style uniform(-1/sqrt(H), 1/sqrt(H)))
# Fused-gate layout: wih (in, 4H), whh (H, 4H), b = b_ih + b_hh (1, 4H);
# gate column order i | f | g | o (kernel-side permutation happens in ae_forward).
# ----------------------------------------------------------------------------
def init_lstm_stack(key, input_size, hidden_size, num_layers):
    k = 1.0 / float(hidden_size) ** 0.5
    layers = []
    for l in range(num_layers):
        isz = input_size if l == 0 else hidden_size
        key, k1, k2, k3, k4 = jax.random.split(key, 5)
        wih = jax.random.uniform(k1, (isz, 4 * hidden_size), jnp.float32, -k, k)
        whh = jax.random.uniform(k2, (hidden_size, 4 * hidden_size), jnp.float32, -k, k)
        bih = jax.random.uniform(k3, (1, 4 * hidden_size), jnp.float32, -k, k)
        bhh = jax.random.uniform(k4, (1, 4 * hidden_size), jnp.float32, -k, k)
        layers.append((wih, whh, bih + bhh))
    return layers, key


def init_params(key, input_size, hidden_size, num_layers, output_size):
    enc, key = init_lstm_stack(key, input_size, hidden_size, num_layers)
    dec, key = init_lstm_stack(key, hidden_size, hidden_size, num_layers)
    k = 1.0 / float(hidden_size) ** 0.5
    key, k1, k2 = jax.random.split(key, 3)
    fc_w = jax.random.uniform(k1, (hidden_size, output_size), jnp.float32, -k, k)
    fc_b = jax.random.uniform(k2, (1, output_size), jnp.float32, -k, k)
    return {"enc": enc, "dec": dec, "fc_w": fc_w, "fc_b": fc_b}


# ----------------------------------------------------------------------------
# Pure-JAX reference (correctness check; standard i|f|g|o gate order)
# ----------------------------------------------------------------------------
def _ref_lstm_layer(x_tm, h0, c0, wih, whh, b):
    H = h0.shape[-1]

    def step(carry, x_t):
        h, c = carry
        p = x_t @ wih + h @ whh + b
        i = jax.nn.sigmoid(p[:, 0:H])
        f = jax.nn.sigmoid(p[:, H:2 * H])
        g = jnp.tanh(p[:, 2 * H:3 * H])
        o = jax.nn.sigmoid(p[:, 3 * H:4 * H])
        c = f * c + i * g
        h = o * jnp.tanh(c)
        return (h, c), h

    (hf, cf), hseq = jax.lax.scan(step, (h0, c0), x_tm)
    return hseq, hf, cf


def _ref_forward(x, params, num_layers, hidden_size):
    B, S, _ = x.shape
    H = hidden_size
    inp = jnp.transpose(x, (1, 0, 2)).astype(jnp.float32)        # (S, B, I)
    z0 = jnp.zeros((B, H), jnp.float32)
    h_list, c_list = [], []
    for l in range(num_layers):
        wih, whh, b = params["enc"][l]
        inp, hf, cf = _ref_lstm_layer(inp, z0, z0, wih, whh, b)
        h_list.append(hf)
        c_list.append(cf)
    inp = jnp.broadcast_to(h_list[-1][None, :, :], (S, B, H))
    for l in range(num_layers):
        wih, whh, b = params["dec"][l]
        inp, _, _ = _ref_lstm_layer(inp, h_list[l], c_list[l], wih, whh, b)
    out = inp.reshape(S * B, H) @ params["fc_w"] + params["fc_b"]
    O = params["fc_w"].shape[1]
    return out.reshape(S, B, O).transpose(1, 0, 2)


# ----------------------------------------------------------------------------
if __name__ == "__main__":
    batch, seq, input_size = 2, 8, 4
    hidden_size, num_layers, output_size = 32, 2, 4

    key = jax.random.PRNGKey(0)
    key, xkey = jax.random.split(key)
    x = jax.random.normal(xkey, (batch, seq, input_size), jnp.float32)

    params = init_params(key, input_size, hidden_size, num_layers, output_size)

    fwd = jax.jit(ae_forward, static_argnums=(2, 3))
    out = fwd(x, params, num_layers, hidden_size)
    out = jax.block_until_ready(out)

    ref = _ref_forward(x, params, num_layers, hidden_size)
    assert out.shape == (batch, seq, output_size)
    assert jnp.allclose(out, ref, rtol=2e-3, atol=2e-3), "mismatch vs JAX reference"

    print("KERNEL_OK")
</pallas_src>

<mosaic_0001>
module attributes {stable_mosaic.version = 11 : i64} {
  func.func @ae_kernel(%arg0: memref<64x8xf32, #tpu.memory_space<vmem>>, %arg1: memref<304x128xf32, #tpu.memory_space<vmem>>, %arg2: memref<64x128xf32, #tpu.memory_space<vmem>>) attributes {dimension_semantics = [], scalar_prefetch = 0 : i64, scratch_operands = 0 : i64, tpu.core_type = #tpu.core_type<tc>} {
    %cst = arith.constant 0.000000e+00 : f32
    %0 = vector.broadcast %cst : f32 to vector<8x32xf32>
    %c0 = arith.constant 0 : index
    %c0_0 = arith.constant 0 : index
    %1 = vector.load %arg0[%c0, %c0_0] : memref<64x8xf32, #tpu.memory_space<vmem>>, vector<64x8xf32>
    %c0_1 = arith.constant 0 : index
    %c0_2 = arith.constant 0 : index
    %2 = vector.load %arg1[%c0_1, %c0_2] : memref<304x128xf32, #tpu.memory_space<vmem>>, vector<8x128xf32>
    %c40 = arith.constant 40 : index
    %c0_3 = arith.constant 0 : index
    %3 = vector.load %arg1[%c40, %c0_3] : memref<304x128xf32, #tpu.memory_space<vmem>>, vector<1x128xf32>
    %cst_4 = arith.constant dense<0.000000e+00> : vector<64x128xf32>
    %4 = tpu.matmul %1, %2, %cst_4 {dimension_numbers = #tpu.dot_dimension_numbers<[1], [0], [0], [1], [0, 0, 1, 1], [], []>} : vector<64x8xf32>, vector<8x128xf32>, vector<64x128xf32> -> vector<64x128xf32>
    %5 = vector.broadcast %3 : vector<1x128xf32> to vector<64x128xf32>
    %6 = arith.addf %4, %5 : vector<64x128xf32>
    %c8 = arith.constant 8 : index
    %c0_5 = arith.constant 0 : index
    %7 = vector.load %arg1[%c8, %c0_5] : memref<304x128xf32, #tpu.memory_space<vmem>>, vector<32x128xf32>
    %8 = vector.extract_strided_slice %6 {offsets = [0, 0], sizes = [8, 128], strides = [1, 1]} : vector<64x128xf32> to vector<8x128xf32>
    %cst_6 = arith.constant dense<0.000000e+00> : vector<8x128xf32>
    %9 = tpu.matmul %0, %7, %cst_6 {dimension_numbers = #tpu.dot_dimension_numbers<[1], [0], [0], [1], [0, 0, 1, 1], [], []>} : vector<8x32xf32>, vector<32x128xf32>, vector<8x128xf32> -> vector<8x128xf32>
    %10 = arith.addf %8, %9 : vector<8x128xf32>
    %11 = vector.extract_strided_slice %10 {offsets = [0, 0], sizes = [8, 96], strides = [1, 1]} : vector<8x128xf32> to vector<8x96xf32>
    %cst_7 = arith.constant 5.000000e-01 : f32
    %12 = vector.broadcast %cst_7 : f32 to vector<8x96xf32>
    %13 = arith.mulf %12, %11 : vector<8x96xf32>
    %14 = math.tanh %13 : vector<8x96xf32>
    %cst_8 = arith.constant 1.000000e+00 : f32
    %15 = vector.broadcast %cst_8 : f32 to vector<8x96xf32>
    %16 = arith.addf %14, %15 : vector<8x96xf32>
    %cst_9 = arith.constant 5.000000e-01 : f32
    %17 = vector.broadcast %cst_9 : f32 to vector<8x96xf32>
    %18 = arith.mulf %17, %16 : vector<8x96xf32>
    %19 = vector.extract_strided_slice %10 {offsets = [0, 96], sizes = [8, 32], strides = [1, 1]} : vector<8x128xf32> to vector<8x32xf32>
    %20 = math.tanh %19 : vector<8x32xf32>
    %21 = vector.extract_strided_slice %18 {offsets = [0, 0], sizes = [8, 32], strides = [1, 1]} : vector<8x96xf32> to vector<8x32xf32>
    %22 = vector.extract_strided_slice %18 {offsets = [0, 32], sizes = [8, 32], strides = [1, 1]} : vector<8x96xf32> to vector<8x32xf32>
    %23 = vector.extract_strided_slice %18 {offsets = [0, 64], sizes = [8, 32], strides = [1, 1]} : vector<8x96xf32> to vector<8x32xf32>
    %24 = arith.mulf %22, %0 : vector<8x32xf32>
    %25 = arith.mulf %21, %20 : vector<8x32xf32>
    %26 = arith.addf %24, %25 : vector<8x32xf32>
    %27 = math.tanh %26 : vector<8x32xf32>
    %28 = arith.mulf %23, %27 : vector<8x32xf32>
    %29 = vector.extract_strided_slice %6 {offsets = [8, 0], sizes = [8, 128], strides = [1, 1]} : vector<64x128xf32> to vector<8x128xf32>
    %cst_10 = arith.constant dense<0.000000e+00> : vector<8x128xf32>
    %30 = tpu.matmul %28, %7, %cst_10 {dimension_numbers = #tpu.dot_dimension_numbers<[1], [0], [0], [1], [0, 0, 1, 1], [], []>} : vector<8x32xf32>, vector<32x128xf32>, vector<8x128xf32> -> vector<8x128xf32>
    %31 = arith.addf %29, %30 : vector<8x128xf32>
    %32 = vector.extract_strided_slice %31 {offsets = [0, 0], sizes = [8, 96], strides = [1, 1]} : vector<8x128xf32> to vector<8x96xf32>
    %cst_11 = arith.constant 5.000000e-01 : f32
    %33 = vector.broadcast %cst_11 : f32 to vector<8x96xf32>
    %34 = arith.mulf %33, %32 : vector<8x96xf32>
    %35 = math.tanh %34 : vector<8x96xf32>
    %cst_12 = arith.constant 1.000000e+00 : f32
    %36 = vector.broadcast %cst_12 : f32 to vector<8x96xf32>
    %37 = arith.addf %35, %36 : vector<8x96xf32>
    %cst_13 = arith.constant 5.000000e-01 : f32
    %38 = vector.broadcast %cst_13 : f32 to vector<8x96xf32>
    %39 = arith.mulf %38, %37 : vector<8x96xf32>
    %40 = vector.extract_strided_slice %31 {offsets = [0, 96], sizes = [8, 32], strides = [1, 1]} : vector<8x128xf32> to vector<8x32xf32>
    %41 = math.tanh %40 : vector<8x32xf32>
    %42 = vector.extract_strided_slice %39 {offsets = [0, 0], sizes = [8, 32], strides = [1, 1]} : vector<8x96xf32> to vector<8x32xf32>
    %43 = vector.extract_strided_slice %39 {offsets = [0, 32], sizes = [8, 32], strides = [1, 1]} : vector<8x96xf32> to vector<8x32xf32>
    %44 = vector.extract_strided_slice %39 {offsets = [0, 64], sizes = [8, 32], strides = [1, 1]} : vector<8x96xf32> to vector<8x32xf32>
    %45 = arith.mulf %43, %26 : vector<8x32xf32>
    %46 = arith.mulf %42, %41 : vector<8x32xf32>
    %47 = arith.addf %45, %46 : vector<8x32xf32>
    %48 = math.tanh %47 : vector<8x32xf32>
    %49 = arith.mulf %44, %48 : vector<8x32xf32>
    %50 = vector.extract_strided_slice %6 {offsets = [16, 0], sizes = [8, 128], strides = [1, 1]} : vector<64x128xf32> to vector<8x128xf32>
    %cst_14 = arith.constant dense<0.000000e+00> : vector<8x128xf32>
    %51 = tpu.matmul %49, %7, %cst_14 {dimension_numbers = #tpu.dot_dimension_numbers<[1], [0], [0], [1], [0, 0, 1, 1], [], []>} : vector<8x32xf32>, vector<32x128xf32>, vector<8x128xf32> -> vector<8x128xf32>
    %52 = arith.addf %50, %51 : vector<8x128xf32>
    %53 = vector.extract_strided_slice %52 {offsets = [0, 0], sizes = [8, 96], strides = [1, 1]} : vector<8x128xf32> to vector<8x96xf32>
    %cst_15 = arith.constant 5.000000e-01 : f32
    %54 = vector.broadcast %cst_15 : f32 to vector<8x96xf32>
    %55 = arith.mulf %54, %53 : vector<8x96xf32>
    %56 = math.tanh %55 : vector<8x96xf32>
    %cst_16 = arith.constant 1.000000e+00 : f32
    %57 = vector.broadcast %cst_16 : f32 to vector<8x96xf32>
    %58 = arith.addf %56, %57 : vector<8x96xf32>
    %cst_17 = arith.constant 5.000000e-01 : f32
    %59 = vector.broadcast %cst_17 : f32 to vector<8x96xf32>
    %60 = arith.mulf %59, %58 : vector<8x96xf32>
    %61 = vector.extract_strided_slice %52 {offsets = [0, 96], sizes = [8, 32], strides = [1, 1]} : vector<8x128xf32> to vector<8x32xf32>
    %62 = math.tanh %61 : vector<8x32xf32>
    %63 = vector.extract_strided_slice %60 {offsets = [0, 0], sizes = [8, 32], strides = [1, 1]} : vector<8x96xf32> to vector<8x32xf32>
    %64 = vector.extract_strided_slice %60 {offsets = [0, 32], sizes = [8, 32], strides = [1, 1]} : vector<8x96xf32> to vector<8x32xf32>
    %65 = vector.extract_strided_slice %60 {offsets = [0, 64], sizes = [8, 32], strides = [1, 1]} : vector<8x96xf32> to vector<8x32xf32>
    %66 = arith.mulf %64, %47 : vector<8x32xf32>
    %67 = arith.mulf %63, %62 : vector<8x32xf32>
    %68 = arith.addf %66, %67 : vector<8x32xf32>
    %69 = math.tanh %68 : vector<8x32xf32>
    %70 = arith.mulf %65, %69 : vector<8x32xf32>
    %71 = vector.extract_strided_slice %6 {offsets = [24, 0], sizes = [8, 128], strides = [1, 1]} : vector<64x128xf32> to vector<8x128xf32>
    %cst_18 = arith.constant dense<0.000000e+00> : vector<8x128xf32>
    %72 = tpu.matmul %70, %7, %cst_18 {dimension_numbers = #tpu.dot_dimension_numbers<[1], [0], [0], [1], [0, 0, 1, 1], [], []>} : vector<8x32xf32>, vector<32x128xf32>, vector<8x128xf32> -> vector<8x128xf32>
    %73 = arith.addf %71, %72 : vector<8x128xf32>
    %74 = vector.extract_strided_slice %73 {offsets = [0, 0], sizes = [8, 96], strides = [1, 1]} : vector<8x128xf32> to vector<8x96xf32>
    %cst_19 = arith.constant 5.000000e-01 : f32
    %75 = vector.broadcast %cst_19 : f32 to vector<8x96xf32>
    %76 = arith.mulf %75, %74 : vector<8x96xf32>
    %77 = math.tanh %76 : vector<8x96xf32>
    %cst_20 = arith.constant 1.000000e+00 : f32
    %78 = vector.broadcast %cst_20 : f32 to vector<8x96xf32>
    %79 = arith.addf %77, %78 : vector<8x96xf32>
    %cst_21 = arith.constant 5.000000e-01 : f32
    %80 = vector.broadcast %cst_21 : f32 to vector<8x96xf32>
    %81 = arith.mulf %80, %79 : vector<8x96xf32>
    %82 = vector.extract_strided_slice %73 {offsets = [0, 96], sizes = [8, 32], strides = [1, 1]} : vector<8x128xf32> to vector<8x32xf32>
    %83 = math.tanh %82 : vector<8x32xf32>
    %84 = vector.extract_strided_slice %81 {offsets = [0, 0], sizes = [8, 32], strides = [1, 1]} : vector<8x96xf32> to vector<8x32xf32>
    %85 = vector.extract_strided_slice %81 {offsets = [0, 32], sizes = [8, 32], strides = [1, 1]} : vector<8x96xf32> to vector<8x32xf32>
    %86 = vector.extract_strided_slice %81 {offsets = [0, 64], sizes = [8, 32], strides = [1, 1]} : vector<8x96xf32> to vector<8x32xf32>
    %87 = arith.mulf %85, %68 : vector<8x32xf32>
    %88 = arith.mulf %84, %83 : vector<8x32xf32>
    %89 = arith.addf %87, %88 : vector<8x32xf32>
    %90 = math.tanh %89 : vector<8x32xf32>
    %91 = arith.mulf %86, %90 : vector<8x32xf32>
    %92 = vector.extract_strided_slice %6 {offsets = [32, 0], sizes = [8, 128], strides = [1, 1]} : vector<64x128xf32> to vector<8x128xf32>
    %cst_22 = arith.constant dense<0.000000e+00> : vector<8x128xf32>
    %93 = tpu.matmul %91, %7, %cst_22 {dimension_numbers = #tpu.dot_dimension_numbers<[1], [0], [0], [1], [0, 0, 1, 1], [], []>} : vector<8x32xf32>, vector<32x128xf32>, vector<8x128xf32> -> vector<8x128xf32>
    %94 = arith.addf %92, %93 : vector<8x128xf32>
    %95 = vector.extract_strided_slice %94 {offsets = [0, 0], sizes = [8, 96], strides = [1, 1]} : vector<8x128xf32> to vector<8x96xf32>
    %cst_23 = arith.constant 5.000000e-01 : f32
    %96 = vector.broadcast %cst_23 : f32 to vector<8x96xf32>
    %97 = arith.mulf %96, %95 : vector<8x96xf32>
    %98 = math.tanh %97 : vector<8x96xf32>
    %cst_24 = arith.constant 1.000000e+00 : f32
    %99 = vector.broadcast %cst_24 : f32 to vector<8x96xf32>
    %100 = arith.addf %98, %99 : vector<8x96xf32>
    %cst_25 = arith.constant 5.000000e-01 : f32
    %101 = vector.broadcast %cst_25 : f32 to vector<8x96xf32>
    %102 = arith.mulf %101, %100 : vector<8x96xf32>
    %103 = vector.extract_strided_slice %94 {offsets = [0, 96], sizes = [8, 32], strides = [1, 1]} : vector<8x128xf32> to vector<8x32xf32>
    %104 = math.tanh %103 : vector<8x32xf32>
    %105 = vector.extract_strided_slice %102 {offsets = [0, 0], sizes = [8, 32], strides = [1, 1]} : vector<8x96xf32> to vector<8x32xf32>
    %106 = vector.extract_strided_slice %102 {offsets = [0, 32], sizes = [8, 32], strides = [1, 1]} : vector<8x96xf32> to vector<8x32xf32>
    %107 = vector.extract_strided_slice %102 {offsets = [0, 64], sizes = [8, 32], strides = [1, 1]} : vector<8x96xf32> to vector<8x32xf32>
    %108 = arith.mulf %106, %89 : vector<8x32xf32>
    %109 = arith.mulf %105, %104 : vector<8x32xf32>
    %110 = arith.addf %108, %109 : vector<8x32xf32>
    %111 = math.tanh %110 : vector<8x32xf32>
    %112 = arith.mulf %107, %111 : vector<8x32xf32>
    %113 = vector.extract_strided_slice %6 {offsets = [40, 0], sizes = [8, 128], strides = [1, 1]} : vector<64x128xf32> to vector<8x128xf32>
    %cst_26 = arith.constant dense<0.000000e+00> : vector<8x128xf32>
    %114 = tpu.matmul %112, %7, %cst_26 {dimension_numbers = #tpu.dot_dimension_numbers<[1], [0], [0], [1], [0, 0, 1, 1], [], []>} : vector<8x32xf32>, vector<32x128xf32>, vector<8x128xf32> -> vector<8x128xf32>
    %115 = arith.addf %113, %114 : vector<8x128xf32>
    %116 = vector.extract_strided_slice %115 {offsets = [0, 0], sizes = [8, 96], strides = [1, 1]} : vector<8x128xf32> to vector<8x96xf32>
    %cst_27 = arith.constant 5.000000e-01 : f32
    %117 = vector.broadcast %cst_27 : f32 to vector<8x96xf32>
    %118 = arith.mulf %117, %116 : vector<8x96xf32>
    %119 = math.tanh %118 : vector<8x96xf32>
    %cst_28 = arith.constant 1.000000e+00 : f32
    %120 = vector.broadcast %cst_28 : f32 to vector<8x96xf32>
    %121 = arith.addf %119, %120 : vector<8x96xf32>
    %cst_29 = arith.constant 5.000000e-01 : f32
    %122 = vector.broadcast %cst_29 : f32 to vector<8x96xf32>
    %123 = arith.mulf %122, %121 : vector<8x96xf32>
    %124 = vector.extract_strided_slice %115 {offsets = [0, 96], sizes = [8, 32], strides = [1, 1]} : vector<8x128xf32> to vector<8x32xf32>
    %125 = math.tanh %124 : vector<8x32xf32>
    %126 = vector.extract_strided_slice %123 {offsets = [0, 0], sizes = [8, 32], strides = [1, 1]} : vector<8x96xf32> to vector<8x32xf32>
    %127 = vector.extract_strided_slice %123 {offsets = [0, 32], sizes = [8, 32], strides = [1, 1]} : vector<8x96xf32> to vector<8x32xf32>
    %128 = vector.extract_strided_slice %123 {offsets = [0, 64], sizes = [8, 32], strides = [1, 1]} : vector<8x96xf32> to vector<8x32xf32>
    %129 = arith.mulf %127, %110 : vector<8x32xf32>
    %130 = arith.mulf %126, %125 : vector<8x32xf32>
    %131 = arith.addf %129, %130 : vector<8x32xf32>
    %132 = math.tanh %131 : vector<8x32xf32>
    %133 = arith.mulf %128, %132 : vector<8x32xf32>
    %134 = vector.extract_strided_slice %6 {offsets = [48, 0], sizes = [8, 128], strides = [1, 1]} : vector<64x128xf32> to vector<8x128xf32>
    %cst_30 = arith.constant dense<0.000000e+00> : vector<8x128xf32>
    %135 = tpu.matmul %133, %7, %cst_30 {dimension_numbers = #tpu.dot_dimension_numbers<[1], [0], [0], [1], [0, 0, 1, 1], [], []>} : vector<8x32xf32>, vector<32x128xf32>, vector<8x128xf32> -> vector<8x128xf32>
    %136 = arith.addf %134, %135 : vector<8x128xf32>
    %137 = vector.extract_strided_slice %136 {offsets = [0, 0], sizes = [8, 96], strides = [1, 1]} : vector<8x128xf32> to vector<8x96xf32>
    %cst_31 = arith.constant 5.000000e-01 : f32
    %138 = vector.broadcast %cst_31 : f32 to vector<8x96xf32>
    %139 = arith.mulf %138, %137 : vector<8x96xf32>
    %140 = math.tanh %139 : vector<8x96xf32>
    %cst_32 = arith.constant 1.000000e+00 : f32
    %141 = vector.broadcast %cst_32 : f32 to vector<8x96xf32>
    %142 = arith.addf %140, %141 : vector<8x96xf32>
    %cst_33 = arith.constant 5.000000e-01 : f32
    %143 = vector.broadcast %cst_33 : f32 to vector<8x96xf32>
    %144 = arith.mulf %143, %142 : vector<8x96xf32>
    %145 = vector.extract_strided_slice %136 {offsets = [0, 96], sizes = [8, 32], strides = [1, 1]} : vector<8x128xf32> to vector<8x32xf32>
    %146 = math.tanh %145 : vector<8x32xf32>
    %147 = vector.extract_strided_slice %144 {offsets = [0, 0], sizes = [8, 32], strides = [1, 1]} : vector<8x96xf32> to vector<8x32xf32>
    %148 = vector.extract_strided_slice %144 {offsets = [0, 32], sizes = [8, 32], strides = [1, 1]} : vector<8x96xf32> to vector<8x32xf32>
    %149 = vector.extract_strided_slice %144 {offsets = [0, 64], sizes = [8, 32], strides = [1, 1]} : vector<8x96xf32> to vector<8x32xf32>
    %150 = arith.mulf %148, %131 : vector<8x32xf32>
    %151 = arith.mulf %147, %146 : vector<8x32xf32>
    %152 = arith.addf %150, %151 : vector<8x32xf32>
    %153 = math.tanh %152 : vector<8x32xf32>
    %154 = arith.mulf %149, %153 : vector<8x32xf32>
    %155 = vector.extract_strided_slice %6 {offsets = [56, 0], sizes = [8, 128], strides = [1, 1]} : vector<64x128xf32> to vector<8x128xf32>
    %cst_34 = arith.constant dense<0.000000e+00> : vector<8x128xf32>
    %156 = tpu.matmul %154, %7, %cst_34 {dimension_numbers = #tpu.dot_dimension_numbers<[1], [0], [0], [1], [0, 0, 1, 1], [], []>} : vector<8x32xf32>, vector<32x128xf32>, vector<8x128xf32> -> vector<8x128xf32>
    %157 = arith.addf %155, %156 : vector<8x128xf32>
    %158 = vector.extract_strided_slice %157 {offsets = [0, 0], sizes = [8, 96], strides = [1, 1]} : vector<8x128xf32> to vector<8x96xf32>
    %cst_35 = arith.constant 5.000000e-01 : f32
    %159 = vector.broadcast %cst_35 : f32 to vector<8x96xf32>
    %160 = arith.mulf %159, %158 : vector<8x96xf32>
    %161 = math.tanh %160 : vector<8x96xf32>
    %cst_36 = arith.constant 1.000000e+00 : f32
    %162 = vector.broadcast %cst_36 : f32 to vector<8x96xf32>
    %163 = arith.addf %161, %162 : vector<8x96xf32>
    %cst_37 = arith.constant 5.000000e-01 : f32
    %164 = vector.broadcast %cst_37 : f32 to vector<8x96xf32>
    %165 = arith.mulf %164, %163 : vector<8x96xf32>
    %166 = vector.extract_strided_slice %157 {offsets = [0, 96], sizes = [8, 32], strides = [1, 1]} : vector<8x128xf32> to vector<8x32xf32>
    %167 = math.tanh %166 : vector<8x32xf32>
    %168 = vector.extract_strided_slice %165 {offsets = [0, 0], sizes = [8, 32], strides = [1, 1]} : vector<8x96xf32> to vector<8x32xf32>
    %169 = vector.extract_strided_slice %165 {offsets = [0, 32], sizes = [8, 32], strides = [1, 1]} : vector<8x96xf32> to vector<8x32xf32>
    %170 = vector.extract_strided_slice %165 {offsets = [0, 64], sizes = [8, 32], strides = [1, 1]} : vector<8x96xf32> to vector<8x32xf32>
    %171 = arith.mulf %169, %152 : vector<8x32xf32>
    %172 = arith.mulf %168, %167 : vector<8x32xf32>
    %173 = arith.addf %171, %172 : vector<8x32xf32>
    %174 = math.tanh %173 : vector<8x32xf32>
    %175 = arith.mulf %170, %174 : vector<8x32xf32>
    %176 = tpu.concatenate %28, %49, %70, %91, %112, %133, %154, %175 in 0 : vector<8x32xf32>, vector<8x32xf32>, vector<8x32xf32>, vector<8x32xf32>, vector<8x32xf32>, vector<8x32xf32>, vector<8x32xf32>, vector<8x32xf32> -> vector<64x32xf32>
    %c48 = arith.constant 48 : index
    %c0_38 = arith.constant 0 : index
    %177 = vector.load %arg1[%c48, %c0_38] : memref<304x128xf32, #tpu.memory_space<vmem>>, vector<32x128xf32>
    %c112 = arith.constant 112 : index
    %c0_39 = arith.constant 0 : index
    %178 = vector.load %arg1[%c112, %c0_39] : memref<304x128xf32, #tpu.memory_space<vmem>>, vector<1x128xf32>
    %cst_40 = arith.constant dense<0.000000e+00> : vector<64x128xf32>
    %179 = tpu.matmul %176, %177, %cst_40 {dimension_numbers = #tpu.dot_dimension_numbers<[1], [0], [0], [1], [0, 0, 1, 1], [], []>} : vector<64x32xf32>, vector<32x128xf32>, vector<64x128xf32> -> vector<64x128xf32>
    %180 = vector.broadcast %178 : vector<1x128xf32> to vector<64x128xf32>
    %181 = arith.addf %179, %180 : vector<64x128xf32>
    %c80 = arith.constant 80 : index
    %c0_41 = arith.constant 0 : index
    %182 = vector.load %arg1[%c80, %c0_41] : memref<304x128xf32, #tpu.memory_space<vmem>>, vector<32x128xf32>
    %183 = vector.extract_strided_slice %181 {offsets = [0, 0], sizes = [8, 128], strides = [1, 1]} : vector<64x128xf32> to vector<8x128xf32>
    %cst_42 = arith.constant dense<0.000000e+00> : vector<8x128xf32>
    %184 = tpu.matmul %0, %182, %cst_42 {dimension_numbers = #tpu.dot_dimension_numbers<[1], [0], [0], [1], [0, 0, 1, 1], [], []>} : vector<8x32xf32>, vector<32x128xf32>, vector<8x128xf32> -> vector<8x128xf32>
    %185 = arith.addf %183, %184 : vector<8x128xf32>
    %186 = vector.extract_strided_slice %185 {offsets = [0, 0], sizes = [8, 96], strides = [1, 1]} : vector<8x128xf32> to vector<8x96xf32>
    %cst_43 = arith.constant 5.000000e-01 : f32
    %187 = vector.broadcast %cst_43 : f32 to vector<8x96xf32>
    %188 = arith.mulf %187, %186 : vector<8x96xf32>
    %189 = math.tanh %188 : vector<8x96xf32>
    %cst_44 = arith.constant 1.000000e+00 : f32
    %190 = vector.broadcast %cst_44 : f32 to vector<8x96xf32>
    %191 = arith.addf %189, %190 : vector<8x96xf32>
    %cst_45 = arith.constant 5.000000e-01 : f32
    %192 = vector.broadcast %cst_45 : f32 to vector<8x96xf32>
    %193 = arith.mulf %192, %191 : vector<8x96xf32>
    %194 = vector.extract_strided_slice %185 {offsets = [0, 96], sizes = [8, 32], strides = [1, 1]} : vector<8x128xf32> to vector<8x32xf32>
    %195 = math.tanh %194 : vector<8x32xf32>
    %196 = vector.extract_strided_slice %193 {offsets = [0, 0], sizes = [8, 32], strides = [1, 1]} : vector<8x96xf32> to vector<8x32xf32>
    %197 = vector.extract_strided_slice %193 {offsets = [0, 32], sizes = [8, 32], strides = [1, 1]} : vector<8x96xf32> to vector<8x32xf32>
    %198 = vector.extract_strided_slice %193 {offsets = [0, 64], sizes = [8, 32], strides = [1, 1]} : vector<8x96xf32> to vector<8x32xf32>
    %199 = arith.mulf %197, %0 : vector<8x32xf32>
    %200 = arith.mulf %196, %195 : vector<8x32xf32>
    %201 = arith.addf %199, %200 : vector<8x32xf32>
    %202 = math.tanh %201 : vector<8x32xf32>
    %203 = arith.mulf %198, %202 : vector<8x32xf32>
    %204 = vector.extract_strided_slice %181 {offsets = [8, 0], sizes = [8, 128], strides = [1, 1]} : vector<64x128xf32> to vector<8x128xf32>
    %cst_46 = arith.constant dense<0.000000e+00> : vector<8x128xf32>
    %205 = tpu.matmul %203, %182, %cst_46 {dimension_numbers = #tpu.dot_dimension_numbers<[1], [0], [0], [1], [0, 0, 1, 1], [], []>} : vector<8x32xf32>, vector<32x128xf32>, vector<8x128xf32> -> vector<8x128xf32>
    %206 = arith.addf %204, %205 : vector<8x128xf32>
    %207 = vector.extract_strided_slice %206 {offsets = [0, 0], sizes = [8, 96], strides = [1, 1]} : vector<8x128xf32> to vector<8x96xf32>
    %cst_47 = arith.constant 5.000000e-01 : f32
    %208 = vector.broadcast %cst_47 : f32 to vector<8x96xf32>
    %209 = arith.mulf %208, %207 : vector<8x96xf32>
    %210 = math.tanh %209 : vector<8x96xf32>
    %cst_48 = arith.constant 1.000000e+00 : f32
    %211 = vector.broadcast %cst_48 : f32 to vector<8x96xf32>
    %212 = arith.addf %210, %211 : vector<8x96xf32>
    %cst_49 = arith.constant 5.000000e-01 : f32
    %213 = vector.broadcast %cst_49 : f32 to vector<8x96xf32>
    %214 = arith.mulf %213, %212 : vector<8x96xf32>
    %215 = vector.extract_strided_slice %206 {offsets = [0, 96], sizes = [8, 32], strides = [1, 1]} : vector<8x128xf32> to vector<8x32xf32>
    %216 = math.tanh %215 : vector<8x32xf32>
    %217 = vector.extract_strided_slice %214 {offsets = [0, 0], sizes = [8, 32], strides = [1, 1]} : vector<8x96xf32> to vector<8x32xf32>
    %218 = vector.extract_strided_slice %214 {offsets = [0, 32], sizes = [8, 32], strides = [1, 1]} : vector<8x96xf32> to vector<8x32xf32>
    %219 = vector.extract_strided_slice %214 {offsets = [0, 64], sizes = [8, 32], strides = [1, 1]} : vector<8x96xf32> to vector<8x32xf32>
    %220 = arith.mulf %218, %201 : vector<8x32xf32>
    %221 = arith.mulf %217, %216 : vector<8x32xf32>
    %222 = arith.addf %220, %221 : vector<8x32xf32>
    %223 = math.tanh %222 : vector<8x32xf32>
    %224 = arith.mulf %219, %223 : vector<8x32xf32>
    %225 = vector.extract_strided_slice %181 {offsets = [16, 0], sizes = [8, 128], strides = [1, 1]} : vector<64x128xf32> to vector<8x128xf32>
    %cst_50 = arith.constant dense<0.000000e+00> : vector<8x128xf32>
    %226 = tpu.matmul %224, %182, %cst_50 {dimension_numbers = #tpu.dot_dimension_numbers<[1], [0], [0], [1], [0, 0, 1, 1], [], []>} : vector<8x32xf32>, vector<32x128xf32>, vector<8x128xf32> -> vector<8x128xf32>
    %227 = arith.addf %225, %226 : vector<8x128xf32>
    %228 = vector.extract_strided_slice %227 {offsets = [0, 0], sizes = [8, 96], strides = [1, 1]} : vector<8x128xf32> to vector<8x96xf32>
    %cst_51 = arith.constant 5.000000e-01 : f32
    %229 = vector.broadcast %cst_51 : f32 to vector<8x96xf32>
    %230 = arith.mulf %229, %228 : vector<8x96xf32>
    %231 = math.tanh %230 : vector<8x96xf32>
    %cst_52 = arith.constant 1.000000e+00 : f32
    %232 = vector.broadcast %cst_52 : f32 to vector<8x96xf32>
    %233 = arith.addf %231, %232 : vector<8x96xf32>
    %cst_53 = arith.constant 5.000000e-01 : f32
    %234 = vector.broadcast %cst_53 : f32 to vector<8x96xf32>
    %235 = arith.mulf %234, %233 : vector<8x96xf32>
    %236 = vector.extract_strided_slice %227 {offsets = [0, 96], sizes = [8, 32], strides = [1, 1]} : vector<8x128xf32> to vector<8x32xf32>
    %237 = math.tanh %236 : vector<8x32xf32>
    %238 = vector.extract_strided_slice %235 {offsets = [0, 0], sizes = [8, 32], strides = [1, 1]} : vector<8x96xf32> to vector<8x32xf32>
    %239 = vector.extract_strided_slice %235 {offsets = [0, 32], sizes = [8, 32], strides = [1, 1]} : vector<8x96xf32> to vector<8x32xf32>
    %240 = vector.extract_strided_slice %235 {offsets = [0, 64], sizes = [8, 32], strides = [1, 1]} : vector<8x96xf32> to vector<8x32xf32>
    %241 = arith.mulf %239, %222 : vector<8x32xf32>
    %242 = arith.mulf %238, %237 : vector<8x32xf32>
    %243 = arith.addf %241, %242 : vector<8x32xf32>
    %244 = math.tanh %243 : vector<8x32xf32>
    %245 = arith.mulf %240, %244 : vector<8x32xf32>
    %246 = vector.extract_strided_slice %181 {offsets = [24, 0], sizes = [8, 128], strides = [1, 1]} : vector<64x128xf32> to vector<8x128xf32>
    %cst_54 = arith.constant dense<0.000000e+00> : vector<8x128xf32>
    %247 = tpu.matmul %245, %182, %cst_54 {dimension_numbers = #tpu.dot_dimension_numbers<[1], [0], [0], [1], [0, 0, 1, 1], [], []>} : vector<8x32xf32>, vector<32x128xf32>, vector<8x128xf32> -> vector<8x128xf32>
    %248 = arith.addf %246, %247 : vector<8x128xf32>
    %249 = vector.extract_strided_slice %248 {offsets = [0, 0], sizes = [8, 96], strides = [1, 1]} : vector<8x128xf32> to vector<8x96xf32>
    %cst_55 = arith.constant 5.000000e-01 : f32
    %250 = vector.broadcast %cst_55 : f32 to vector<8x96xf32>
    %251 = arith.mulf %250, %249 : vector<8x96xf32>
    %252 = math.tanh %251 : vector<8x96xf32>
    %cst_56 = arith.constant 1.000000e+00 : f32
    %253 = vector.broadcast %cst_56 : f32 to vector<8x96xf32>
    %254 = arith.addf %252, %253 : vector<8x96xf32>
    %cst_57 = arith.constant 5.000000e-01 : f32
    %255 = vector.broadcast %cst_57 : f32 to vector<8x96xf32>
    %256 = arith.mulf %255, %254 : vector<8x96xf32>
    %257 = vector.extract_strided_slice %248 {offsets = [0, 96], sizes = [8, 32], strides = [1, 1]} : vector<8x128xf32> to vector<8x32xf32>
    %258 = math.tanh %257 : vector<8x32xf32>
    %259 = vector.extract_strided_slice %256 {offsets = [0, 0], sizes = [8, 32], strides = [1, 1]} : vector<8x96xf32> to vector<8x32xf32>
    %260 = vector.extract_strided_slice %256 {offsets = [0, 32], sizes = [8, 32], strides = [1, 1]} : vector<8x96xf32> to vector<8x32xf32>
    %261 = vector.extract_strided_slice %256 {offsets = [0, 64], sizes = [8, 32], strides = [1, 1]} : vector<8x96xf32> to vector<8x32xf32>
    %262 = arith.mulf %260, %243 : vector<8x32xf32>
    %263 = arith.mulf %259, %258 : vector<8x32xf32>
    %264 = arith.addf %262, %263 : vector<8x32xf32>
    %265 = math.tanh %264 : vector<8x32xf32>
    %266 = arith.mulf %261, %265 : vector<8x32xf32>
    %267 = vector.extract_strided_slice %181 {offsets = [32, 0], sizes = [8, 128], strides = [1, 1]} : vector<64x128xf32> to vector<8x128xf32>
    %cst_58 = arith.constant dense<0.000000e+00> : vector<8x128xf32>
    %268 = tpu.matmul %266, %182, %cst_58 {dimension_numbers = #tpu.dot_dimension_numbers<[1], [0], [0], [1], [0, 0, 1, 1], [], []>} : vector<8x32xf32>, vector<32x128xf32>, vector<8x128xf32> -> vector<8x128xf32>
    %269 = arith.addf %267, %268 : vector<8x128xf32>
    %270 = vector.extract_strided_slice %269 {offsets = [0, 0], sizes = [8, 96], strides = [1, 1]} : vector<8x128xf32> to vector<8x96xf32>
    %cst_59 = arith.constant 5.000000e-01 : f32
    %271 = vector.broadcast %cst_59 : f32 to vector<8x96xf32>
    %272 = arith.mulf %271, %270 : vector<8x96xf32>
    %273 = math.tanh %272 : vector<8x96xf32>
    %cst_60 = arith.constant 1.000000e+00 : f32
    %274 = vector.broadcast %cst_60 : f32 to vector<8x96xf32>
    %275 = arith.addf %273, %274 : vector<8x96xf32>
    %cst_61 = arith.constant 5.000000e-01 : f32
    %276 = vector.broadcast %cst_61 : f32 to vector<8x96xf32>
    %277 = arith.mulf %276, %275 : vector<8x96xf32>
    %278 = vector.extract_strided_slice %269 {offsets = [0, 96], sizes = [8, 32], strides = [1, 1]} : vector<8x128xf32> to vector<8x32xf32>
    %279 = math.tanh %278 : vector<8x32xf32>
    %280 = vector.extract_strided_slice %277 {offsets = [0, 0], sizes = [8, 32], strides = [1, 1]} : vector<8x96xf32> to vector<8x32xf32>
    %281 = vector.extract_strided_slice %277 {offsets = [0, 32], sizes = [8, 32], strides = [1, 1]} : vector<8x96xf32> to vector<8x32xf32>
    %282 = vector.extract_strided_slice %277 {offsets = [0, 64], sizes = [8, 32], strides = [1, 1]} : vector<8x96xf32> to vector<8x32xf32>
    %283 = arith.mulf %281, %264 : vector<8x32xf32>
    %284 = arith.mulf %280, %279 : vector<8x32xf32>
    %285 = arith.addf %283, %284 : vector<8x32xf32>
    %286 = math.tanh %285 : vector<8x32xf32>
    %287 = arith.mulf %282, %286 : vector<8x32xf32>
    %288 = vector.extract_strided_slice %181 {offsets = [40, 0], sizes = [8, 128], strides = [1, 1]} : vector<64x128xf32> to vector<8x128xf32>
    %cst_62 = arith.constant dense<0.000000e+00> : vector<8x128xf32>
    %289 = tpu.matmul %287, %182, %cst_62 {dimension_numbers = #tpu.dot_dimension_numbers<[1], [0], [0], [1], [0, 0, 1, 1], [], []>} : vector<8x32xf32>, vector<32x128xf32>, vector<8x128xf32> -> vector<8x128xf32>
    %290 = arith.addf %288, %289 : vector<8x128xf32>
    %291 = vector.extract_strided_slice %290 {offsets = [0, 0], sizes = [8, 96], strides = [1, 1]} : vector<8x128xf32> to vector<8x96xf32>
    %cst_63 = arith.constant 5.000000e-01 : f32
    %292 = vector.broadcast %cst_63 : f32 to vector<8x96xf32>
    %293 = arith.mulf %292, %291 : vector<8x96xf32>
    %294 = math.tanh %293 : vector<8x96xf32>
    %cst_64 = arith.constant 1.000000e+00 : f32
    %295 = vector.broadcast %cst_64 : f32 to vector<8x96xf32>
    %296 = arith.addf %294, %295 : vector<8x96xf32>
    %cst_65 = arith.constant 5.000000e-01 : f32
    %297 = vector.broadcast %cst_65 : f32 to vector<8x96xf32>
    %298 = arith.mulf %297, %296 : vector<8x96xf32>
    %299 = vector.extract_strided_slice %290 {offsets = [0, 96], sizes = [8, 32], strides = [1, 1]} : vector<8x128xf32> to vector<8x32xf32>
    %300 = math.tanh %299 : vector<8x32xf32>
    %301 = vector.extract_strided_slice %298 {offsets = [0, 0], sizes = [8, 32], strides = [1, 1]} : vector<8x96xf32> to vector<8x32xf32>
    %302 = vector.extract_strided_slice %298 {offsets = [0, 32], sizes = [8, 32], strides = [1, 1]} : vector<8x96xf32> to vector<8x32xf32>
    %303 = vector.extract_strided_slice %298 {offsets = [0, 64], sizes = [8, 32], strides = [1, 1]} : vector<8x96xf32> to vector<8x32xf32>
    %304 = arith.mulf %302, %285 : vector<8x32xf32>
    %305 = arith.mulf %301, %300 : vector<8x32xf32>
    %306 = arith.addf %304, %305 : vector<8x32xf32>
    %307 = math.tanh %306 : vector<8x32xf32>
    %308 = arith.mulf %303, %307 : vector<8x32xf32>
    %309 = vector.extract_strided_slice %181 {offsets = [48, 0], sizes = [8, 128], strides = [1, 1]} : vector<64x128xf32> to vector<8x128xf32>
    %cst_66 = arith.constant dense<0.000000e+00> : vector<8x128xf32>
    %310 = tpu.matmul %308, %182, %cst_66 {dimension_numbers = #tpu.dot_dimension_numbers<[1], [0], [0], [1], [0, 0, 1, 1], [], []>} : vector<8x32xf32>, vector<32x128xf32>, vector<8x128xf32> -> vector<8x128xf32>
    %311 = arith.addf %309, %310 : vector<8x128xf32>
    %312 = vector.extract_strided_slice %311 {offsets = [0, 0], sizes = [8, 96], strides = [1, 1]} : vector<8x128xf32> to vector<8x96xf32>
    %cst_67 = arith.constant 5.000000e-01 : f32
    %313 = vector.broadcast %cst_67 : f32 to vector<8x96xf32>
    %314 = arith.mulf %313, %312 : vector<8x96xf32>
    %315 = math.tanh %314 : vector<8x96xf32>
    %cst_68 = arith.constant 1.000000e+00 : f32
    %316 = vector.broadcast %cst_68 : f32 to vector<8x96xf32>
    %317 = arith.addf %315, %316 : vector<8x96xf32>
    %cst_69 = arith.constant 5.000000e-01 : f32
    %318 = vector.broadcast %cst_69 : f32 to vector<8x96xf32>
    %319 = arith.mulf %318, %317 : vector<8x96xf32>
    %320 = vector.extract_strided_slice %311 {offsets = [0, 96], sizes = [8, 32], strides = [1, 1]} : vector<8x128xf32> to vector<8x32xf32>
    %321 = math.tanh %320 : vector<8x32xf32>
    %322 = vector.extract_strided_slice %319 {offsets = [0, 0], sizes = [8, 32], strides = [1, 1]} : vector<8x96xf32> to vector<8x32xf32>
    %323 = vector.extract_strided_slice %319 {offsets = [0, 32], sizes = [8, 32], strides = [1, 1]} : vector<8x96xf32> to vector<8x32xf32>
    %324 = vector.extract_strided_slice %319 {offsets = [0, 64], sizes = [8, 32], strides = [1, 1]} : vector<8x96xf32> to vector<8x32xf32>
    %325 = arith.mulf %323, %306 : vector<8x32xf32>
    %326 = arith.mulf %322, %321 : vector<8x32xf32>
    %327 = arith.addf %325, %326 : vector<8x32xf32>
    %328 = math.tanh %327 : vector<8x32xf32>
    %329 = arith.mulf %324, %328 : vector<8x32xf32>
    %330 = vector.extract_strided_slice %181 {offsets = [56, 0], sizes = [8, 128], strides = [1, 1]} : vector<64x128xf32> to vector<8x128xf32>
    %cst_70 = arith.constant dense<0.000000e+00> : vector<8x128xf32>
    %331 = tpu.matmul %329, %182, %cst_70 {dimension_numbers = #tpu.dot_dimension_numbers<[1], [0], [0], [1], [0, 0, 1, 1], [], []>} : vector<8x32xf32>, vector<32x128xf32>, vector<8x128xf32> -> vector<8x128xf32>
    %332 = arith.addf %330, %331 : vector<8x128xf32>
    %333 = vector.extract_strided_slice %332 {offsets = [0, 0], sizes = [8, 96], strides = [1, 1]} : vector<8x128xf32> to vector<8x96xf32>
    %cst_71 = arith.constant 5.000000e-01 : f32
    %334 = vector.broadcast %cst_71 : f32 to vector<8x96xf32>
    %335 = arith.mulf %334, %333 : vector<8x96xf32>
    %336 = math.tanh %335 : vector<8x96xf32>
    %cst_72 = arith.constant 1.000000e+00 : f32
    %337 = vector.broadcast %cst_72 : f32 to vector<8x96xf32>
    %338 = arith.addf %336, %337 : vector<8x96xf32>
    %cst_73 = arith.constant 5.000000e-01 : f32
    %339 = vector.broadcast %cst_73 : f32 to vector<8x96xf32>
    %340 = arith.mulf %339, %338 : vector<8x96xf32>
    %341 = vector.extract_strided_slice %332 {offsets = [0, 96], sizes = [8, 32], strides = [1, 1]} : vector<8x128xf32> to vector<8x32xf32>
    %342 = math.tanh %341 : vector<8x32xf32>
    %343 = vector.extract_strided_slice %340 {offsets = [0, 0], sizes = [8, 32], strides = [1, 1]} : vector<8x96xf32> to vector<8x32xf32>
    %344 = vector.extract_strided_slice %340 {offsets = [0, 32], sizes = [8, 32], strides = [1, 1]} : vector<8x96xf32> to vector<8x32xf32>
    %345 = vector.extract_strided_slice %340 {offsets = [0, 64], sizes = [8, 32], strides = [1, 1]} : vector<8x96xf32> to vector<8x32xf32>
    %346 = arith.mulf %344, %327 : vector<8x32xf32>
    %347 = arith.mulf %343, %342 : vector<8x32xf32>
    %348 = arith.addf %346, %347 : vector<8x32xf32>
    %349 = math.tanh %348 : vector<8x32xf32>
    %350 = arith.mulf %345, %349 : vector<8x32xf32>
    %c120 = arith.constant 120 : index
    %c0_74 = arith.constant 0 : index
    %351 = vector.load %arg1[%c120, %c0_74] : memref<304x128xf32, #tpu.memory_space<vmem>>, vector<32x128xf32>
    %cst_75 = arith.constant dense<0.000000e+00> : vector<8x128xf32>
    %352 = tpu.matmul %350, %351, %cst_75 {dimension_numbers = #tpu.dot_dimension_numbers<[1], [0], [0], [1], [0, 0, 1, 1], [], []>} : vector<8x32xf32>, vector<32x128xf32>, vector<8x128xf32> -> vector<8x128xf32>
    %c184 = arith.constant 184 : index
    %c0_76 = arith.constant 0 : index
    %353 = vector.load %arg1[%c184, %c0_76] : memref<304x128xf32, #tpu.memory_space<vmem>>, vector<1x128xf32>
    %354 = vector.broadcast %353 : vector<1x128xf32> to vector<8x128xf32>
    %355 = arith.addf %352, %354 : vector<8x128xf32>
    %c152 = arith.constant 152 : index
    %c0_77 = arith.constant 0 : index
    %356 = vector.load %arg1[%c152, %c0_77] : memref<304x128xf32, #tpu.memory_space<vmem>>, vector<32x128xf32>
    %cst_78 = arith.constant dense<0.000000e+00> : vector<8x128xf32>
    %357 = tpu.matmul %175, %356, %cst_78 {dimension_numbers = #tpu.dot_dimension_numbers<[1], [0], [0], [1], [0, 0, 1, 1], [], []>} : vector<8x32xf32>, vector<32x128xf32>, vector<8x128xf32> -> vector<8x128xf32>
    %358 = arith.addf %355, %357 : vector<8x128xf32>
    %359 = vector.extract_strided_slice %358 {offsets = [0, 0], sizes = [8, 96], strides = [1, 1]} : vector<8x128xf32> to vector<8x96xf32>
    %cst_79 = arith.constant 5.000000e-01 : f32
    %360 = vector.broadcast %cst_79 : f32 to vector<8x96xf32>
    %361 = arith.mulf %360, %359 : vector<8x96xf32>
    %362 = math.tanh %361 : vector<8x96xf32>
    %cst_80 = arith.constant 1.000000e+00 : f32
    %363 = vector.broadcast %cst_80 : f32 to vector<8x96xf32>
    %364 = arith.addf %362, %363 : vector<8x96xf32>
    %cst_81 = arith.constant 5.000000e-01 : f32
    %365 = vector.broadcast %cst_81 : f32 to vector<8x96xf32>
    %366 = arith.mulf %365, %364 : vector<8x96xf32>
    %367 = vector.extract_strided_slice %358 {offsets = [0, 96], sizes = [8, 32], strides = [1, 1]} : vector<8x128xf32> to vector<8x32xf32>
    %368 = math.tanh %367 : vector<8x32xf32>
    %369 = vector.extract_strided_slice %366 {offsets = [0, 0], sizes = [8, 32], strides = [1, 1]} : vector<8x96xf32> to vector<8x32xf32>
    %370 = vector.extract_strided_slice %366 {offsets = [0, 32], sizes = [8, 32], strides = [1, 1]} : vector<8x96xf32> to vector<8x32xf32>
    %371 = vector.extract_strided_slice %366 {offsets = [0, 64], sizes = [8, 32], strides = [1, 1]} : vector<8x96xf32> to vector<8x32xf32>
    %372 = arith.mulf %370, %173 : vector<8x32xf32>
    %373 = arith.mulf %369, %368 : vector<8x32xf32>
    %374 = arith.addf %372, %373 : vector<8x32xf32>
    %375 = math.tanh %374 : vector<8x32xf32>
    %376 = arith.mulf %371, %375 : vector<8x32xf32>
    %cst_82 = arith.constant dense<0.000000e+00> : vector<8x128xf32>
    %377 = tpu.matmul %376, %356, %cst_82 {dimension_numbers = #tpu.dot_dimension_numbers<[1], [0], [0], [1], [0, 0, 1, 1], [], []>} : vector<8x32xf32>, vector<32x128xf32>, vector<8x128xf32> -> vector<8x128xf32>
    %378 = arith.addf %355, %377 : vector<8x128xf32>
    %379 = vector.extract_strided_slice %378 {offsets = [0, 0], sizes = [8, 96], strides = [1, 1]} : vector<8x128xf32> to vector<8x96xf32>
    %cst_83 = arith.constant 5.000000e-01 : f32
    %380 = vector.broadcast %cst_83 : f32 to vector<8x96xf32>
    %381 = arith.mulf %380, %379 : vector<8x96xf32>
    %382 = math.tanh %381 : vector<8x96xf32>
    %cst_84 = arith.constant 1.000000e+00 : f32
    %383 = vector.broadcast %cst_84 : f32 to vector<8x96xf32>
    %384 = arith.addf %382, %383 : vector<8x96xf32>
    %cst_85 = arith.constant 5.000000e-01 : f32
    %385 = vector.broadcast %cst_85 : f32 to vector<8x96xf32>
    %386 = arith.mulf %385, %384 : vector<8x96xf32>
    %387 = vector.extract_strided_slice %378 {offsets = [0, 96], sizes = [8, 32], strides = [1, 1]} : vector<8x128xf32> to vector<8x32xf32>
    %388 = math.tanh %387 : vector<8x32xf32>
    %389 = vector.extract_strided_slice %386 {offsets = [0, 0], sizes = [8, 32], strides = [1, 1]} : vector<8x96xf32> to vector<8x32xf32>
    %390 = vector.extract_strided_slice %386 {offsets = [0, 32], sizes = [8, 32], strides = [1, 1]} : vector<8x96xf32> to vector<8x32xf32>
    %391 = vector.extract_strided_slice %386 {offsets = [0, 64], sizes = [8, 32], strides = [1, 1]} : vector<8x96xf32> to vector<8x32xf32>
    %392 = arith.mulf %390, %374 : vector<8x32xf32>
    %393 = arith.mulf %389, %388 : vector<8x32xf32>
    %394 = arith.addf %392, %393 : vector<8x32xf32>
    %395 = math.tanh %394 : vector<8x32xf32>
    %396 = arith.mulf %391, %395 : vector<8x32xf32>
    %cst_86 = arith.constant dense<0.000000e+00> : vector<8x128xf32>
    %397 = tpu.matmul %396, %356, %cst_86 {dimension_numbers = #tpu.dot_dimension_numbers<[1], [0], [0], [1], [0, 0, 1, 1], [], []>} : vector<8x32xf32>, vector<32x128xf32>, vector<8x128xf32> -> vector<8x128xf32>
    %398 = arith.addf %355, %397 : vector<8x128xf32>
    %399 = vector.extract_strided_slice %398 {offsets = [0, 0], sizes = [8, 96], strides = [1, 1]} : vector<8x128xf32> to vector<8x96xf32>
    %cst_87 = arith.constant 5.000000e-01 : f32
    %400 = vector.broadcast %cst_87 : f32 to vector<8x96xf32>
    %401 = arith.mulf %400, %399 : vector<8x96xf32>
    %402 = math.tanh %401 : vector<8x96xf32>
    %cst_88 = arith.constant 1.000000e+00 : f32
    %403 = vector.broadcast %cst_88 : f32 to vector<8x96xf32>
    %404 = arith.addf %402, %403 : vector<8x96xf32>
    %cst_89 = arith.constant 5.000000e-01 : f32
    %405 = vector.broadcast %cst_89 : f32 to vector<8x96xf32>
    %406 = arith.mulf %405, %404 : vector<8x96xf32>
    %407 = vector.extract_strided_slice %398 {offsets = [0, 96], sizes = [8, 32], strides = [1, 1]} : vector<8x128xf32> to vector<8x32xf32>
    %408 = math.tanh %407 : vector<8x32xf32>
    %409 = vector.extract_strided_slice %406 {offsets = [0, 0], sizes = [8, 32], strides = [1, 1]} : vector<8x96xf32> to vector<8x32xf32>
    %410 = vector.extract_strided_slice %406 {offsets = [0, 32], sizes = [8, 32], strides = [1, 1]} : vector<8x96xf32> to vector<8x32xf32>
    %411 = vector.extract_strided_slice %406 {offsets = [0, 64], sizes = [8, 32], strides = [1, 1]} : vector<8x96xf32> to vector<8x32xf32>
    %412 = arith.mulf %410, %394 : vector<8x32xf32>
    %413 = arith.mulf %409, %408 : vector<8x32xf32>
    %414 = arith.addf %412, %413 : vector<8x32xf32>
    %415 = math.tanh %414 : vector<8x32xf32>
    %416 = arith.mulf %411, %415 : vector<8x32xf32>
    %cst_90 = arith.constant dense<0.000000e+00> : vector<8x128xf32>
    %417 = tpu.matmul %416, %356, %cst_90 {dimension_numbers = #tpu.dot_dimension_numbers<[1], [0], [0], [1], [0, 0, 1, 1], [], []>} : vector<8x32xf32>, vector<32x128xf32>, vector<8x128xf32> -> vector<8x128xf32>
    %418 = arith.addf %355, %417 : vector<8x128xf32>
    %419 = vector.extract_strided_slice %418 {offsets = [0, 0], sizes = [8, 96], strides = [1, 1]} : vector<8x128xf32> to vector<8x96xf32>
    %cst_91 = arith.constant 5.000000e-01 : f32
    %420 = vector.broadcast %cst_91 : f32 to vector<8x96xf32>
    %421 = arith.mulf %420, %419 : vector<8x96xf32>
    %422 = math.tanh %421 : vector<8x96xf32>
    %cst_92 = arith.constant 1.000000e+00 : f32
    %423 = vector.broadcast %cst_92 : f32 to vector<8x96xf32>
    %424 = arith.addf %422, %423 : vector<8x96xf32>
    %cst_93 = arith.constant 5.000000e-01 : f32
    %425 = vector.broadcast %cst_93 : f32 to vector<8x96xf32>
    %426 = arith.mulf %425, %424 : vector<8x96xf32>
    %427 = vector.extract_strided_slice %418 {offsets = [0, 96], sizes = [8, 32], strides = [1, 1]} : vector<8x128xf32> to vector<8x32xf32>
    %428 = math.tanh %427 : vector<8x32xf32>
    %429 = vector.extract_strided_slice %426 {offsets = [0, 0], sizes = [8, 32], strides = [1, 1]} : vector<8x96xf32> to vector<8x32xf32>
    %430 = vector.extract_strided_slice %426 {offsets = [0, 32], sizes = [8, 32], strides = [1, 1]} : vector<8x96xf32> to vector<8x32xf32>
    %431 = vector.extract_strided_slice %426 {offsets = [0, 64], sizes = [8, 32], strides = [1, 1]} : vector<8x96xf32> to vector<8x32xf32>
    %432 = arith.mulf %430, %414 : vector<8x32xf32>
    %433 = arith.mulf %429, %428 : vector<8x32xf32>
    %434 = arith.addf %432, %433 : vector<8x32xf32>
    %435 = math.tanh %434 : vector<8x32xf32>
    %436 = arith.mulf %431, %435 : vector<8x32xf32>
    %cst_94 = arith.constant dense<0.000000e+00> : vector<8x128xf32>
    %437 = tpu.matmul %436, %356, %cst_94 {dimension_numbers = #tpu.dot_dimension_numbers<[1], [0], [0], [1], [0, 0, 1, 1], [], []>} : vector<8x32xf32>, vector<32x128xf32>, vector<8x128xf32> -> vector<8x128xf32>
    %438 = arith.addf %355, %437 : vector<8x128xf32>
    %439 = vector.extract_strided_slice %438 {offsets = [0, 0], sizes = [8, 96], strides = [1, 1]} : vector<8x128xf32> to vector<8x96xf32>
    %cst_95 = arith.constant 5.000000e-01 : f32
    %440 = vector.broadcast %cst_95 : f32 to vector<8x96xf32>
    %441 = arith.mulf %440, %439 : vector<8x96xf32>
    %442 = math.tanh %441 : vector<8x96xf32>
    %cst_96 = arith.constant 1.000000e+00 : f32
    %443 = vector.broadcast %cst_96 : f32 to vector<8x96xf32>
    %444 = arith.addf %442, %443 : vector<8x96xf32>
    %cst_97 = arith.constant 5.000000e-01 : f32
    %445 = vector.broadcast %cst_97 : f32 to vector<8x96xf32>
    %446 = arith.mulf %445, %444 : vector<8x96xf32>
    %447 = vector.extract_strided_slice %438 {offsets = [0, 96], sizes = [8, 32], strides = [1, 1]} : vector<8x128xf32> to vector<8x32xf32>
    %448 = math.tanh %447 : vector<8x32xf32>
    %449 = vector.extract_strided_slice %446 {offsets = [0, 0], sizes = [8, 32], strides = [1, 1]} : vector<8x96xf32> to vector<8x32xf32>
    %450 = vector.extract_strided_slice %446 {offsets = [0, 32], sizes = [8, 32], strides = [1, 1]} : vector<8x96xf32> to vector<8x32xf32>
    %451 = vector.extract_strided_slice %446 {offsets = [0, 64], sizes = [8, 32], strides = [1, 1]} : vector<8x96xf32> to vector<8x32xf32>
    %452 = arith.mulf %450, %434 : vector<8x32xf32>
    %453 = arith.mulf %449, %448 : vector<8x32xf32>
    %454 = arith.addf %452, %453 : vector<8x32xf32>
    %455 = math.tanh %454 : vector<8x32xf32>
    %456 = arith.mulf %451, %455 : vector<8x32xf32>
    %cst_98 = arith.constant dense<0.000000e+00> : vector<8x128xf32>
    %457 = tpu.matmul %456, %356, %cst_98 {dimension_numbers = #tpu.dot_dimension_numbers<[1], [0], [0], [1], [0, 0, 1, 1], [], []>} : vector<8x32xf32>, vector<32x128xf32>, vector<8x128xf32> -> vector<8x128xf32>
    %458 = arith.addf %355, %457 : vector<8x128xf32>
    %459 = vector.extract_strided_slice %458 {offsets = [0, 0], sizes = [8, 96], strides = [1, 1]} : vector<8x128xf32> to vector<8x96xf32>
    %cst_99 = arith.constant 5.000000e-01 : f32
    %460 = vector.broadcast %cst_99 : f32 to vector<8x96xf32>
    %461 = arith.mulf %460, %459 : vector<8x96xf32>
    %462 = math.tanh %461 : vector<8x96xf32>
    %cst_100 = arith.constant 1.000000e+00 : f32
    %463 = vector.broadcast %cst_100 : f32 to vector<8x96xf32>
    %464 = arith.addf %462, %463 : vector<8x96xf32>
    %cst_101 = arith.constant 5.000000e-01 : f32
    %465 = vector.broadcast %cst_101 : f32 to vector<8x96xf32>
    %466 = arith.mulf %465, %464 : vector<8x96xf32>
    %467 = vector.extract_strided_slice %458 {offsets = [0, 96], sizes = [8, 32], strides = [1, 1]} : vector<8x128xf32> to vector<8x32xf32>
    %468 = math.tanh %467 : vector<8x32xf32>
    %469 = vector.extract_strided_slice %466 {offsets = [0, 0], sizes = [8, 32], strides = [1, 1]} : vector<8x96xf32> to vector<8x32xf32>
    %470 = vector.extract_strided_slice %466 {offsets = [0, 32], sizes = [8, 32], strides = [1, 1]} : vector<8x96xf32> to vector<8x32xf32>
    %471 = vector.extract_strided_slice %466 {offsets = [0, 64], sizes = [8, 32], strides = [1, 1]} : vector<8x96xf32> to vector<8x32xf32>
    %472 = arith.mulf %470, %454 : vector<8x32xf32>
    %473 = arith.mulf %469, %468 : vector<8x32xf32>
    %474 = arith.addf %472, %473 : vector<8x32xf32>
    %475 = math.tanh %474 : vector<8x32xf32>
    %476 = arith.mulf %471, %475 : vector<8x32xf32>
    %cst_102 = arith.constant dense<0.000000e+00> : vector<8x128xf32>
    %477 = tpu.matmul %476, %356, %cst_102 {dimension_numbers = #tpu.dot_dimension_numbers<[1], [0], [0], [1], [0, 0, 1, 1], [], []>} : vector<8x32xf32>, vector<32x128xf32>, vector<8x128xf32> -> vector<8x128xf32>
    %478 = arith.addf %355, %477 : vector<8x128xf32>
    %479 = vector.extract_strided_slice %478 {offsets = [0, 0], sizes = [8, 96], strides = [1, 1]} : vector<8x128xf32> to vector<8x96xf32>
    %cst_103 = arith.constant 5.000000e-01 : f32
    %480 = vector.broadcast %cst_103 : f32 to vector<8x96xf32>
    %481 = arith.mulf %480, %479 : vector<8x96xf32>
    %482 = math.tanh %481 : vector<8x96xf32>
    %cst_104 = arith.constant 1.000000e+00 : f32
    %483 = vector.broadcast %cst_104 : f32 to vector<8x96xf32>
    %484 = arith.addf %482, %483 : vector<8x96xf32>
    %cst_105 = arith.constant 5.000000e-01 : f32
    %485 = vector.broadcast %cst_105 : f32 to vector<8x96xf32>
    %486 = arith.mulf %485, %484 : vector<8x96xf32>
    %487 = vector.extract_strided_slice %478 {offsets = [0, 96], sizes = [8, 32], strides = [1, 1]} : vector<8x128xf32> to vector<8x32xf32>
    %488 = math.tanh %487 : vector<8x32xf32>
    %489 = vector.extract_strided_slice %486 {offsets = [0, 0], sizes = [8, 32], strides = [1, 1]} : vector<8x96xf32> to vector<8x32xf32>
    %490 = vector.extract_strided_slice %486 {offsets = [0, 32], sizes = [8, 32], strides = [1, 1]} : vector<8x96xf32> to vector<8x32xf32>
    %491 = vector.extract_strided_slice %486 {offsets = [0, 64], sizes = [8, 32], strides = [1, 1]} : vector<8x96xf32> to vector<8x32xf32>
    %492 = arith.mulf %490, %474 : vector<8x32xf32>
    %493 = arith.mulf %489, %488 : vector<8x32xf32>
    %494 = arith.addf %492, %493 : vector<8x32xf32>
    %495 = math.tanh %494 : vector<8x32xf32>
    %496 = arith.mulf %491, %495 : vector<8x32xf32>
    %cst_106 = arith.constant dense<0.000000e+00> : vector<8x128xf32>
    %497 = tpu.matmul %496, %356, %cst_106 {dimension_numbers = #tpu.dot_dimension_numbers<[1], [0], [0], [1], [0, 0, 1, 1], [], []>} : vector<8x32xf32>, vector<32x128xf32>, vector<8x128xf32> -> vector<8x128xf32>
    %498 = arith.addf %355, %497 : vector<8x128xf32>
    %499 = vector.extract_strided_slice %498 {offsets = [0, 0], sizes = [8, 96], strides = [1, 1]} : vector<8x128xf32> to vector<8x96xf32>
    %cst_107 = arith.constant 5.000000e-01 : f32
    %500 = vector.broadcast %cst_107 : f32 to vector<8x96xf32>
    %501 = arith.mulf %500, %499 : vector<8x96xf32>
    %502 = math.tanh %501 : vector<8x96xf32>
    %cst_108 = arith.constant 1.000000e+00 : f32
    %503 = vector.broadcast %cst_108 : f32 to vector<8x96xf32>
    %504 = arith.addf %502, %503 : vector<8x96xf32>
    %cst_109 = arith.constant 5.000000e-01 : f32
    %505 = vector.broadcast %cst_109 : f32 to vector<8x96xf32>
    %506 = arith.mulf %505, %504 : vector<8x96xf32>
    %507 = vector.extract_strided_slice %498 {offsets = [0, 96], sizes = [8, 32], strides = [1, 1]} : vector<8x128xf32> to vector<8x32xf32>
    %508 = math.tanh %507 : vector<8x32xf32>
    %509 = vector.extract_strided_slice %506 {offsets = [0, 0], sizes = [8, 32], strides = [1, 1]} : vector<8x96xf32> to vector<8x32xf32>
    %510 = vector.extract_strided_slice %506 {offsets = [0, 32], sizes = [8, 32], strides = [1, 1]} : vector<8x96xf32> to vector<8x32xf32>
    %511 = vector.extract_strided_slice %506 {offsets = [0, 64], sizes = [8, 32], strides = [1, 1]} : vector<8x96xf32> to vector<8x32xf32>
    %512 = arith.mulf %510, %494 : vector<8x32xf32>
    %513 = arith.mulf %509, %508 : vector<8x32xf32>
    %514 = arith.addf %512, %513 : vector<8x32xf32>
    %515 = math.tanh %514 : vector<8x32xf32>
    %516 = arith.mulf %511, %515 : vector<8x32xf32>
    %517 = tpu.concatenate %376, %396, %416, %436, %456, %476, %496, %516 in 0 : vector<8x32xf32>, vector<8x32xf32>, vector<8x32xf32>, vector<8x32xf32>, vector<8x32xf32>, vector<8x32xf32>, vector<8x32xf32>, vector<8x32xf32> -> vector<64x32xf32>
    %c192 = arith.constant 192 : index
    %c0_110 = arith.constant 0 : index
    %518 = vector.load %arg1[%c192, %c0_110] : memref<304x128xf32, #tpu.memory_space<vmem>>, vector<32x128xf32>
    %c256 = arith.constant 256 : index
    %c0_111 = arith.constant 0 : index
    %519 = vector.load %arg1[%c256, %c0_111] : memref<304x128xf32, #tpu.memory_space<vmem>>, vector<1x128xf32>
    %cst_112 = arith.constant dense<0.000000e+00> : vector<64x128xf32>
    %520 = tpu.matmul %517, %518, %cst_112 {dimension_numbers = #tpu.dot_dimension_numbers<[1], [0], [0], [1], [0, 0, 1, 1], [], []>} : vector<64x32xf32>, vector<32x128xf32>, vector<64x128xf32> -> vector<64x128xf32>
    %521 = vector.broadcast %519 : vector<1x128xf32> to vector<64x128xf32>
    %522 = arith.addf %520, %521 : vector<64x128xf32>
    %c224 = arith.constant 224 : index
    %c0_113 = arith.constant 0 : index
    %523 = vector.load %arg1[%c224, %c0_113] : memref<304x128xf32, #tpu.memory_space<vmem>>, vector<32x128xf32>
    %524 = vector.extract_strided_slice %522 {offsets = [0, 0], sizes = [8, 128], strides = [1, 1]} : vector<64x128xf32> to vector<8x128xf32>
    %cst_114 = arith.constant dense<0.000000e+00> : vector<8x128xf32>
    %525 = tpu.matmul %350, %523, %cst_114 {dimension_numbers = #tpu.dot_dimension_numbers<[1], [0], [0], [1], [0, 0, 1, 1], [], []>} : vector<8x32xf32>, vector<32x128xf32>, vector<8x128xf32> -> vector<8x128xf32>
    %526 = arith.addf %524, %525 : vector<8x128xf32>
    %527 = vector.extract_strided_slice %526 {offsets = [0, 0], sizes = [8, 96], strides = [1, 1]} : vector<8x128xf32> to vector<8x96xf32>
    %cst_115 = arith.constant 5.000000e-01 : f32
    %528 = vector.broadcast %cst_115 : f32 to vector<8x96xf32>
    %529 = arith.mulf %528, %527 : vector<8x96xf32>
    %530 = math.tanh %529 : vector<8x96xf32>
    %cst_116 = arith.constant 1.000000e+00 : f32
    %531 = vector.broadcast %cst_116 : f32 to vector<8x96xf32>
    %532 = arith.addf %530, %531 : vector<8x96xf32>
    %cst_117 = arith.constant 5.000000e-01 : f32
    %533 = vector.broadcast %cst_117 : f32 to vector<8x96xf32>
    %534 = arith.mulf %533, %532 : vector<8x96xf32>
    %535 = vector.extract_strided_slice %526 {offsets = [0, 96], sizes = [8, 32], strides = [1, 1]} : vector<8x128xf32> to vector<8x32xf32>
    %536 = math.tanh %535 : vector<8x32xf32>
    %537 = vector.extract_strided_slice %534 {offsets = [0, 0], sizes = [8, 32], strides = [1, 1]} : vector<8x96xf32> to vector<8x32xf32>
    %538 = vector.extract_strided_slice %534 {offsets = [0, 32], sizes = [8, 32], strides = [1, 1]} : vector<8x96xf32> to vector<8x32xf32>
    %539 = vector.extract_strided_slice %534 {offsets = [0, 64], sizes = [8, 32], strides = [1, 1]} : vector<8x96xf32> to vector<8x32xf32>
    %540 = arith.mulf %538, %348 : vector<8x32xf32>
    %541 = arith.mulf %537, %536 : vector<8x32xf32>
    %542 = arith.addf %540, %541 : vector<8x32xf32>
    %543 = math.tanh %542 : vector<8x32xf32>
    %544 = arith.mulf %539, %543 : vector<8x32xf32>
    %545 = vector.extract_strided_slice %522 {offsets = [8, 0], sizes = [8, 128], strides = [1, 1]} : vector<64x128xf32> to vector<8x128xf32>
    %cst_118 = arith.constant dense<0.000000e+00> : vector<8x128xf32>
    %546 = tpu.matmul %544, %523, %cst_118 {dimension_numbers = #tpu.dot_dimension_numbers<[1], [0], [0], [1], [0, 0, 1, 1], [], []>} : vector<8x32xf32>, vector<32x128xf32>, vector<8x128xf32> -> vector<8x128xf32>
    %547 = arith.addf %545, %546 : vector<8x128xf32>
    %548 = vector.extract_strided_slice %547 {offsets = [0, 0], sizes = [8, 96], strides = [1, 1]} : vector<8x128xf32> to vector<8x96xf32>
    %cst_119 = arith.constant 5.000000e-01 : f32
    %549 = vector.broadcast %cst_119 : f32 to vector<8x96xf32>
    %550 = arith.mulf %549, %548 : vector<8x96xf32>
    %551 = math.tanh %550 : vector<8x96xf32>
    %cst_120 = arith.constant 1.000000e+00 : f32
    %552 = vector.broadcast %cst_120 : f32 to vector<8x96xf32>
    %553 = arith.addf %551, %552 : vector<8x96xf32>
    %cst_121 = arith.constant 5.000000e-01 : f32
    %554 = vector.broadcast %cst_121 : f32 to vector<8x96xf32>
    %555 = arith.mulf %554, %553 : vector<8x96xf32>
    %556 = vector.extract_strided_slice %547 {offsets = [0, 96], sizes = [8, 32], strides = [1, 1]} : vector<8x128xf32> to vector<8x32xf32>
    %557 = math.tanh %556 : vector<8x32xf32>
    %558 = vector.extract_strided_slice %555 {offsets = [0, 0], sizes = [8, 32], strides = [1, 1]} : vector<8x96xf32> to vector<8x32xf32>
    %559 = vector.extract_strided_slice %555 {offsets = [0, 32], sizes = [8, 32], strides = [1, 1]} : vector<8x96xf32> to vector<8x32xf32>
    %560 = vector.extract_strided_slice %555 {offsets = [0, 64], sizes = [8, 32], strides = [1, 1]} : vector<8x96xf32> to vector<8x32xf32>
    %561 = arith.mulf %559, %542 : vector<8x32xf32>
    %562 = arith.mulf %558, %557 : vector<8x32xf32>
    %563 = arith.addf %561, %562 : vector<8x32xf32>
    %564 = math.tanh %563 : vector<8x32xf32>
    %565 = arith.mulf %560, %564 : vector<8x32xf32>
    %566 = vector.extract_strided_slice %522 {offsets = [16, 0], sizes = [8, 128], strides = [1, 1]} : vector<64x128xf32> to vector<8x128xf32>
    %cst_122 = arith.constant dense<0.000000e+00> : vector<8x128xf32>
    %567 = tpu.matmul %565, %523, %cst_122 {dimension_numbers = #tpu.dot_dimension_numbers<[1], [0], [0], [1], [0, 0, 1, 1], [], []>} : vector<8x32xf32>, vector<32x128xf32>, vector<8x128xf32> -> vector<8x128xf32>
    %568 = arith.addf %566, %567 : vector<8x128xf32>
    %569 = vector.extract_strided_slice %568 {offsets = [0, 0], sizes = [8, 96], strides = [1, 1]} : vector<8x128xf32> to vector<8x96xf32>
    %cst_123 = arith.constant 5.000000e-01 : f32
    %570 = vector.broadcast %cst_123 : f32 to vector<8x96xf32>
    %571 = arith.mulf %570, %569 : vector<8x96xf32>
    %572 = math.tanh %571 : vector<8x96xf32>
    %cst_124 = arith.constant 1.000000e+00 : f32
    %573 = vector.broadcast %cst_124 : f32 to vector<8x96xf32>
    %574 = arith.addf %572, %573 : vector<8x96xf32>
    %cst_125 = arith.constant 5.000000e-01 : f32
    %575 = vector.broadcast %cst_125 : f32 to vector<8x96xf32>
    %576 = arith.mulf %575, %574 : vector<8x96xf32>
    %577 = vector.extract_strided_slice %568 {offsets = [0, 96], sizes = [8, 32], strides = [1, 1]} : vector<8x128xf32> to vector<8x32xf32>
    %578 = math.tanh %577 : vector<8x32xf32>
    %579 = vector.extract_strided_slice %576 {offsets = [0, 0], sizes = [8, 32], strides = [1, 1]} : vector<8x96xf32> to vector<8x32xf32>
    %580 = vector.extract_strided_slice %576 {offsets = [0, 32], sizes = [8, 32], strides = [1, 1]} : vector<8x96xf32> to vector<8x32xf32>
    %581 = vector.extract_strided_slice %576 {offsets = [0, 64], sizes = [8, 32], strides = [1, 1]} : vector<8x96xf32> to vector<8x32xf32>
    %582 = arith.mulf %580, %563 : vector<8x32xf32>
    %583 = arith.mulf %579, %578 : vector<8x32xf32>
    %584 = arith.addf %582, %583 : vector<8x32xf32>
    %585 = math.tanh %584 : vector<8x32xf32>
    %586 = arith.mulf %581, %585 : vector<8x32xf32>
    %587 = vector.extract_strided_slice %522 {offsets = [24, 0], sizes = [8, 128], strides = [1, 1]} : vector<64x128xf32> to vector<8x128xf32>
    %cst_126 = arith.constant dense<0.000000e+00> : vector<8x128xf32>
    %588 = tpu.matmul %586, %523, %cst_126 {dimension_numbers = #tpu.dot_dimension_numbers<[1], [0], [0], [1], [0, 0, 1, 1], [], []>} : vector<8x32xf32>, vector<32x128xf32>, vector<8x128xf32> -> vector<8x128xf32>
    %589 = arith.addf %587, %588 : vector<8x128xf32>
    %590 = vector.extract_strided_slice %589 {offsets = [0, 0], sizes = [8, 96], strides = [1, 1]} : vector<8x128xf32> to vector<8x96xf32>
    %cst_127 = arith.constant 5.000000e-01 : f32
    %591 = vector.broadcast %cst_127 : f32 to vector<8x96xf32>
    %592 = arith.mulf %591, %590 : vector<8x96xf32>
    %593 = math.tanh %592 : vector<8x96xf32>
    %cst_128 = arith.constant 1.000000e+00 : f32
    %594 = vector.broadcast %cst_128 : f32 to vector<8x96xf32>
    %595 = arith.addf %593, %594 : vector<8x96xf32>
    %cst_129 = arith.constant 5.000000e-01 : f32
    %596 = vector.broadcast %cst_129 : f32 to vector<8x96xf32>
    %597 = arith.mulf %596, %595 : vector<8x96xf32>
    %598 = vector.extract_strided_slice %589 {offsets = [0, 96], sizes = [8, 32], strides = [1, 1]} : vector<8x128xf32> to vector<8x32xf32>
    %599 = math.tanh %598 : vector<8x32xf32>
    %600 = vector.extract_strided_slice %597 {offsets = [0, 0], sizes = [8, 32], strides = [1, 1]} : vector<8x96xf32> to vector<8x32xf32>
    %601 = vector.extract_strided_slice %597 {offsets = [0, 32], sizes = [8, 32], strides = [1, 1]} : vector<8x96xf32> to vector<8x32xf32>
    %602 = vector.extract_strided_slice %597 {offsets = [0, 64], sizes = [8, 32], strides = [1, 1]} : vector<8x96xf32> to vector<8x32xf32>
    %603 = arith.mulf %601, %584 : vector<8x32xf32>
    %604 = arith.mulf %600, %599 : vector<8x32xf32>
    %605 = arith.addf %603, %604 : vector<8x32xf32>
    %606 = math.tanh %605 : vector<8x32xf32>
    %607 = arith.mulf %602, %606 : vector<8x32xf32>
    %608 = vector.extract_strided_slice %522 {offsets = [32, 0], sizes = [8, 128], strides = [1, 1]} : vector<64x128xf32> to vector<8x128xf32>
    %cst_130 = arith.constant dense<0.000000e+00> : vector<8x128xf32>
    %609 = tpu.matmul %607, %523, %cst_130 {dimension_numbers = #tpu.dot_dimension_numbers<[1], [0], [0], [1], [0, 0, 1, 1], [], []>} : vector<8x32xf32>, vector<32x128xf32>, vector<8x128xf32> -> vector<8x128xf32>
    %610 = arith.addf %608, %609 : vector<8x128xf32>
    %611 = vector.extract_strided_slice %610 {offsets = [0, 0], sizes = [8, 96], strides = [1, 1]} : vector<8x128xf32> to vector<8x96xf32>
    %cst_131 = arith.constant 5.000000e-01 : f32
    %612 = vector.broadcast %cst_131 : f32 to vector<8x96xf32>
    %613 = arith.mulf %612, %611 : vector<8x96xf32>
    %614 = math.tanh %613 : vector<8x96xf32>
    %cst_132 = arith.constant 1.000000e+00 : f32
    %615 = vector.broadcast %cst_132 : f32 to vector<8x96xf32>
    %616 = arith.addf %614, %615 : vector<8x96xf32>
    %cst_133 = arith.constant 5.000000e-01 : f32
    %617 = vector.broadcast %cst_133 : f32 to vector<8x96xf32>
    %618 = arith.mulf %617, %616 : vector<8x96xf32>
    %619 = vector.extract_strided_slice %610 {offsets = [0, 96], sizes = [8, 32], strides = [1, 1]} : vector<8x128xf32> to vector<8x32xf32>
    %620 = math.tanh %619 : vector<8x32xf32>
    %621 = vector.extract_strided_slice %618 {offsets = [0, 0], sizes = [8, 32], strides = [1, 1]} : vector<8x96xf32> to vector<8x32xf32>
    %622 = vector.extract_strided_slice %618 {offsets = [0, 32], sizes = [8, 32], strides = [1, 1]} : vector<8x96xf32> to vector<8x32xf32>
    %623 = vector.extract_strided_slice %618 {offsets = [0, 64], sizes = [8, 32], strides = [1, 1]} : vector<8x96xf32> to vector<8x32xf32>
    %624 = arith.mulf %622, %605 : vector<8x32xf32>
    %625 = arith.mulf %621, %620 : vector<8x32xf32>
    %626 = arith.addf %624, %625 : vector<8x32xf32>
    %627 = math.tanh %626 : vector<8x32xf32>
    %628 = arith.mulf %623, %627 : vector<8x32xf32>
    %629 = vector.extract_strided_slice %522 {offsets = [40, 0], sizes = [8, 128], strides = [1, 1]} : vector<64x128xf32> to vector<8x128xf32>
    %cst_134 = arith.constant dense<0.000000e+00> : vector<8x128xf32>
    %630 = tpu.matmul %628, %523, %cst_134 {dimension_numbers = #tpu.dot_dimension_numbers<[1], [0], [0], [1], [0, 0, 1, 1], [], []>} : vector<8x32xf32>, vector<32x128xf32>, vector<8x128xf32> -> vector<8x128xf32>
    %631 = arith.addf %629, %630 : vector<8x128xf32>
    %632 = vector.extract_strided_slice %631 {offsets = [0, 0], sizes = [8, 96], strides = [1, 1]} : vector<8x128xf32> to vector<8x96xf32>
    %cst_135 = arith.constant 5.000000e-01 : f32
    %633 = vector.broadcast %cst_135 : f32 to vector<8x96xf32>
    %634 = arith.mulf %633, %632 : vector<8x96xf32>
    %635 = math.tanh %634 : vector<8x96xf32>
    %cst_136 = arith.constant 1.000000e+00 : f32
    %636 = vector.broadcast %cst_136 : f32 to vector<8x96xf32>
    %637 = arith.addf %635, %636 : vector<8x96xf32>
    %cst_137 = arith.constant 5.000000e-01 : f32
    %638 = vector.broadcast %cst_137 : f32 to vector<8x96xf32>
    %639 = arith.mulf %638, %637 : vector<8x96xf32>
    %640 = vector.extract_strided_slice %631 {offsets = [0, 96], sizes = [8, 32], strides = [1, 1]} : vector<8x128xf32> to vector<8x32xf32>
    %641 = math.tanh %640 : vector<8x32xf32>
    %642 = vector.extract_strided_slice %639 {offsets = [0, 0], sizes = [8, 32], strides = [1, 1]} : vector<8x96xf32> to vector<8x32xf32>
    %643 = vector.extract_strided_slice %639 {offsets = [0, 32], sizes = [8, 32], strides = [1, 1]} : vector<8x96xf32> to vector<8x32xf32>
    %644 = vector.extract_strided_slice %639 {offsets = [0, 64], sizes = [8, 32], strides = [1, 1]} : vector<8x96xf32> to vector<8x32xf32>
    %645 = arith.mulf %643, %626 : vector<8x32xf32>
    %646 = arith.mulf %642, %641 : vector<8x32xf32>
    %647 = arith.addf %645, %646 : vector<8x32xf32>
    %648 = math.tanh %647 : vector<8x32xf32>
    %649 = arith.mulf %644, %648 : vector<8x32xf32>
    %650 = vector.extract_strided_slice %522 {offsets = [48, 0], sizes = [8, 128], strides = [1, 1]} : vector<64x128xf32> to vector<8x128xf32>
    %cst_138 = arith.constant dense<0.000000e+00> : vector<8x128xf32>
    %651 = tpu.matmul %649, %523, %cst_138 {dimension_numbers = #tpu.dot_dimension_numbers<[1], [0], [0], [1], [0, 0, 1, 1], [], []>} : vector<8x32xf32>, vector<32x128xf32>, vector<8x128xf32> -> vector<8x128xf32>
    %652 = arith.addf %650, %651 : vector<8x128xf32>
    %653 = vector.extract_strided_slice %652 {offsets = [0, 0], sizes = [8, 96], strides = [1, 1]} : vector<8x128xf32> to vector<8x96xf32>
    %cst_139 = arith.constant 5.000000e-01 : f32
    %654 = vector.broadcast %cst_139 : f32 to vector<8x96xf32>
    %655 = arith.mulf %654, %653 : vector<8x96xf32>
    %656 = math.tanh %655 : vector<8x96xf32>
    %cst_140 = arith.constant 1.000000e+00 : f32
    %657 = vector.broadcast %cst_140 : f32 to vector<8x96xf32>
    %658 = arith.addf %656, %657 : vector<8x96xf32>
    %cst_141 = arith.constant 5.000000e-01 : f32
    %659 = vector.broadcast %cst_141 : f32 to vector<8x96xf32>
    %660 = arith.mulf %659, %658 : vector<8x96xf32>
    %661 = vector.extract_strided_slice %652 {offsets = [0, 96], sizes = [8, 32], strides = [1, 1]} : vector<8x128xf32> to vector<8x32xf32>
    %662 = math.tanh %661 : vector<8x32xf32>
    %663 = vector.extract_strided_slice %660 {offsets = [0, 0], sizes = [8, 32], strides = [1, 1]} : vector<8x96xf32> to vector<8x32xf32>
    %664 = vector.extract_strided_slice %660 {offsets = [0, 32], sizes = [8, 32], strides = [1, 1]} : vector<8x96xf32> to vector<8x32xf32>
    %665 = vector.extract_strided_slice %660 {offsets = [0, 64], sizes = [8, 32], strides = [1, 1]} : vector<8x96xf32> to vector<8x32xf32>
    %666 = arith.mulf %664, %647 : vector<8x32xf32>
    %667 = arith.mulf %663, %662 : vector<8x32xf32>
    %668 = arith.addf %666, %667 : vector<8x32xf32>
    %669 = math.tanh %668 : vector<8x32xf32>
    %670 = arith.mulf %665, %669 : vector<8x32xf32>
    %671 = vector.extract_strided_slice %522 {offsets = [56, 0], sizes = [8, 128], strides = [1, 1]} : vector<64x128xf32> to vector<8x128xf32>
    %cst_142 = arith.constant dense<0.000000e+00> : vector<8x128xf32>
    %672 = tpu.matmul %670, %523, %cst_142 {dimension_numbers = #tpu.dot_dimension_numbers<[1], [0], [0], [1], [0, 0, 1, 1], [], []>} : vector<8x32xf32>, vector<32x128xf32>, vector<8x128xf32> -> vector<8x128xf32>
    %673 = arith.addf %671, %672 : vector<8x128xf32>
    %674 = vector.extract_strided_slice %673 {offsets = [0, 0], sizes = [8, 96], strides = [1, 1]} : vector<8x128xf32> to vector<8x96xf32>
    %cst_143 = arith.constant 5.000000e-01 : f32
    %675 = vector.broadcast %cst_143 : f32 to vector<8x96xf32>
    %676 = arith.mulf %675, %674 : vector<8x96xf32>
    %677 = math.tanh %676 : vector<8x96xf32>
    %cst_144 = arith.constant 1.000000e+00 : f32
    %678 = vector.broadcast %cst_144 : f32 to vector<8x96xf32>
    %679 = arith.addf %677, %678 : vector<8x96xf32>
    %cst_145 = arith.constant 5.000000e-01 : f32
    %680 = vector.broadcast %cst_145 : f32 to vector<8x96xf32>
    %681 = arith.mulf %680, %679 : vector<8x96xf32>
    %682 = vector.extract_strided_slice %673 {offsets = [0, 96], sizes = [8, 32], strides = [1, 1]} : vector<8x128xf32> to vector<8x32xf32>
    %683 = math.tanh %682 : vector<8x32xf32>
    %684 = vector.extract_strided_slice %681 {offsets = [0, 0], sizes = [8, 32], strides = [1, 1]} : vector<8x96xf32> to vector<8x32xf32>
    %685 = vector.extract_strided_slice %681 {offsets = [0, 32], sizes = [8, 32], strides = [1, 1]} : vector<8x96xf32> to vector<8x32xf32>
    %686 = vector.extract_strided_slice %681 {offsets = [0, 64], sizes = [8, 32], strides = [1, 1]} : vector<8x96xf32> to vector<8x32xf32>
    %687 = arith.mulf %685, %668 : vector<8x32xf32>
    %688 = arith.mulf %684, %683 : vector<8x32xf32>
    %689 = arith.addf %687, %688 : vector<8x32xf32>
    %690 = math.tanh %689 : vector<8x32xf32>
    %691 = arith.mulf %686, %690 : vector<8x32xf32>
    %692 = tpu.concatenate %544, %565, %586, %607, %628, %649, %670, %691 in 0 : vector<8x32xf32>, vector<8x32xf32>, vector<8x32xf32>, vector<8x32xf32>, vector<8x32xf32>, vector<8x32xf32>, vector<8x32xf32>, vector<8x32xf32> -> vector<64x32xf32>
    %c264 = arith.constant 264 : index
    %c0_146 = arith.constant 0 : index
    %693 = vector.load %arg1[%c264, %c0_146] : memref<304x128xf32, #tpu.memory_space<vmem>>, vector<32x128xf32>
    %cst_147 = arith.constant dense<0.000000e+00> : vector<64x128xf32>
    %694 = tpu.matmul %692, %693, %cst_147 {dimension_numbers = #tpu.dot_dimension_numbers<[1], [0], [0], [1], [0, 0, 1, 1], [], []>} : vector<64x32xf32>, vector<32x128xf32>, vector<64x128xf32> -> vector<64x128xf32>
    %c296 = arith.constant 296 : index
    %c0_148 = arith.constant 0 : index
    %695 = vector.load %arg1[%c296, %c0_148] : memref<304x128xf32, #tpu.memory_space<vmem>>, vector<1x128xf32>
    %696 = vector.broadcast %695 : vector<1x128xf32> to vector<64x128xf32>
    %697 = arith.addf %694, %696 : vector<64x128xf32>
    %c0_149 = arith.constant 0 : index
    %c0_150 = arith.constant 0 : index
    %698 = vector.load %arg2[%c0_149, %c0_150] : memref<64x128xf32, #tpu.memory_space<vmem>>, vector<64x128xf32>
    tpu.vector_store %arg2[%c0_149, %c0_150], %697 {strides = array<i32>} : memref<64x128xf32, #tpu.memory_space<vmem>>, vector<64x128xf32>,
    return
  }
}

</mosaic_0001>

<bundles_post_ra>
// kernel: ae_forward.1
= control target key start
LH: loop header
LB: loop body
LE: loop exit
PB: predicated region body
PF: predicated region fallthrough
CT: control target
= control target key end

     0   :  { %vm25_vm0 = vcmask 64512   ;;  %v4655_v3 = vmov 0.0   ;;  %vm4656_vm1 = vmmov 0   ;;  %s4657_s8 = smov 32   ;;  %s4658_s9 = smov 64   ;;  %vm159_vm2 = vcmask 261120   ;;  %s5541_s1 = inlined_call_operand.vmem [shape: f32[304,128], index: 1, kind: input, shape index: {}]   ;;  %s5542_s0 = inlined_call_operand.vmem [shape: f32[64,8], index: 0, kind: input, shape index: {}]   ;;  %s5543_s2 = inlined_call_operand.vmem [shape: f32[64,128], index: 2, kind: output, shape index: {}]  }
   0x1   :  { %v19_v0 = vld [vmem:[%s5541_s1] sm:$0xff]  ;;  %v12_v2 = vld [vmem:[%s5542_s0 + $0x8] sm:$0xff]  ;;  %4047 = vmatprep.subr.mxu1 %v4655_v3  ;;  %4055 = vmatprep.mubr.msk.f32.mxu1 %vm4656_vm1, %v4655_v3  ;;  %v13_v5 = vld [vmem:[%s5542_s0 + $0x10] sm:$0xff] }
   0x2   :  { %v11_v1 = vld [vmem:[%s5542_s0] sm:$0xff]  ;;  %4022 = vmatprep.subr.mxu0 %v19_v0  ;;  %v4701_v6 = vld [vmem:[%s5541_s1 + $0x18] sm:$0xff]  ;;  %v4715_v9 = vld [vmem:[%s5541_s1 + $0x10] sm:$0xff] }
   0x3   :  { %4024 = vmatprep.mubr.msk.f32.mxu0 %vm25_vm0, %v11_v1  ;;  %v4690_v4 = vld [vmem:[%s5541_s1 + $0x20] sm:$0xff]  ;;  %4023 = vmatpush3.msra.mxu0 %v19_v0  ;;  %v14_v7 = vld [vmem:[%s5542_s0 + $0x18] sm:$0xff]  ;;  %v4725_v10 = vld [vmem:[%s5541_s1 + $0x8] sm:$0xff] }
   0x4   :  { %4048 = vmatpush3.msra.mxu1 %v4690_v4  ;;  %4025 = vmatmul.mubr.msk.f32.vlgmr.msra.gmra.mxu0 %vm25_vm0, %v12_v2  ;;  %v15_v8 = vld [vmem:[%s5542_s0 + $0x20] sm:$0xff]  ;;  %v16_v11 = vld [vmem:[%s5542_s0 + $0x28] sm:$0xff]  ;;  %v17_v12 = vld [vmem:[%s5542_s0 + $0x30] sm:$0xff] }
   0x5   :  { %4036 = vmatprep.subr.mxu0 %v4655_v3  ;;  %4027 = vmatprep.mubr.msk.f32.mxu0 %vm25_vm0, %v13_v5  ;;  %v18_v13 = vld [vmem:[%s5542_s0 + $0x38] sm:$0xff]  ;;  %v3744_v14 = vld [vmem:[%s5541_s1 + $0x28] ss:$0 sm:$0xff] }
   0x6   :  { %4037 = vmatpush3.msra.mxu0 %v4690_v4  ;;  %4049 = vmatprep.subr.mxu1 %v4655_v3 }
   0x7   :  { %4038 = vmatprep.subr.mxu0 %v4655_v3  ;;  %4050 = vmatpush3.msra.mxu1 %v4701_v6 }
   0x8   :  { %4039 = vmatpush3.msra.mxu0 %v4701_v6  ;;  %4051 = vmatprep.subr.mxu1 %v4655_v3 }
   0x9   :  { %4028 = vmatmul.mubr.msk.f32.gmra.mxu0 %vm25_vm0, %v14_v7  ;;  %4040 = vmatprep.subr.mxu0 %v4655_v3 }
   0xa   :  { %4030 = vmatprep.mubr.msk.f32.mxu0 %vm25_vm0, %v15_v8  ;;  %4041 = vmatpush3.msra.mxu0 %v4715_v9 }
   0xb   :  { %4042 = vmatprep.subr.mxu0 %v4655_v3  ;;  %4052 = vmatpush3.msra.mxu1 %v4715_v9 }
   0xc   :  { %4043 = vmatpush3.msra.mxu0 %v4725_v10  ;;  %4053 = vmatprep.subr.mxu1 %v4655_v3 }
   0xd   :  { %4031 = vmatmul.mubr.msk.f32.gmra.mxu0 %vm25_vm0, %v16_v11  ;;  %4054 = vmatpush3.msra.mxu1 %v4725_v10 }
   0xe   :  { %4033 = vmatprep.mubr.msk.f32.mxu0 %vm25_vm0, %v17_v12  ;;  %4058 = vmatprep.subr.mxu0 %v4655_v3 }
   0xf   :  { %4069 = vmatprep.subr.mxu1 %v4655_v3 }
  0x11   :  { %4034 = vmatmul.mubr.msk.f32.gmra.mxu0 %vm25_vm0, %v18_v13 }
  0x12   :  { %4044 = vmatprep.mubr.msk.f32.mxu0 %vm4656_vm1, %v4655_v3 }
  0x15   :  { %4045 = vmatmul.mubr.f32.vlgmr.msra.gmra.mxu0 %v4655_v3 }
  0x16   :  { %4059 = vmatpush3.msra.mxu0 %v4690_v4  ;;  %4066 = vmatprep.mubr.msk.f32.mxu0 %vm4656_vm1, %v4655_v3 }
  0x17   :  { %4060 = vmatprep.subr.mxu0 %v4655_v3 }
  0x18   :  { %4061 = vmatpush3.msra.mxu0 %v4701_v6 }
  0x19   :  { %4062 = vmatprep.subr.mxu0 %v4655_v3 }
  0x1a   :  { %4063 = vmatpush3.msra.mxu0 %v4715_v9 }
  0x1b   :  { %4064 = vmatprep.subr.mxu0 %v4655_v3 }
  0x1c   :  { %4065 = vmatpush3.msra.mxu0 %v4725_v10 }
  0x1d   :  { %4080 = vmatprep.subr.mxu0 %v4655_v3 }
  0xc4   :  { %v4026_v15 = vpop.f32.mrf.mxu0 }
  0xc5   :  { %v122_v16 = vadd.f32 %v4026_v15, %v3744_v14 }
  0xc6   :  { %v116_v17 = vpop.f32.mrf.mxu0 }
  0xc7   :  { %v117_v29 = vadd.f32 %v3744_v14, %v116_v17 }
  0xc9   :  { %v4029_v18 = vpop.f32.mrf.mxu0 }
  0xca   :  { %v4765_v19 = vadd.f32 %v4029_v18, %v3744_v14 }
  0xcb   :  { %v126_v20 = vpop.f32.mrf.mxu0 }
  0xcc   :  { %v4767_v21 = vadd.f32 %v3744_v14, %v126_v20 }
  0xcd   :  { %v4032_v22 = vpop.f32.mrf.mxu0 }
  0xce   :  { %v4769_v23 = vadd.f32 %v4032_v22, %v3744_v14 }
  0xcf   :  { %v136_v24 = vpop.f32.mrf.mxu0 }
  0xd0   :  { %v4771_v25 = vadd.f32 %v3744_v14, %v136_v24 }
  0xd1   :  { %v4035_v26 = vpop.f32.mrf.mxu0 }
  0xd2   :  { %v4773_v27 = vadd.f32 %v4035_v26, %v3744_v14 }
  0xd3   :  { %v146_v28 = vpop.f32.mrf.mxu0 }
  0xd4   :  { %v4775_v30 = vadd.f32 %v3744_v14, %v146_v28 }
  0xd5   :  { %v229_v31 = vpop.f32.mrf.mxu0 }
  0xd6   :  { %v233_v32 = vadd.f32 %v229_v31, %v117_v29 }
  0xd7   :  { %v4046_v33 = vpop.f32.mrf.mxu0 }
  0xd8   :  { %4463 = vtanh.f32 %v233_v32  ;;  %v234_v35 = vmul.f32 0.5, %v233_v32 }
  0xda   :  { %4465 = vtanh.f32 %v234_v35 }
  0xe5   :  { %v4464_v34 = vpop.eup %4463 }
  0xe6   :  { %241 = vrot.lane.b32.xlu0 %v4464_v34, %s4657_s8 }
  0xe7   :  { %v4466_v36 = vpop.eup %4465 }
  0xe8   :  { %v236_v37 = vadd.f32 1.0, %v4466_v36 }
  0xea   :  { %v237_v38 = vmul.f32 0.5, %v236_v37 }
  0xec   :  { %v239_v41 = vmul.f32 0.0, %v237_v38 }
 0x158   :  { %v242_v39 = vpop.permute.xlu0 %241 }
 0x159   :  { %v244_v40 = vmul.f32 %v242_v39, %v237_v38 }
 0x15b   :  { %246 = vrot.lane.b32.xlu0 %v244_v40, %s4657_s8 }
 0x1cd   :  { %v247_v42 = vpop.permute.xlu0 %246 }
 0x1ce   :  { %v249_v43 = vadd.f32 %v247_v42, %v239_v41 }
 0x1d0   :  { %4467 = vtanh.f32 %v249_v43 }
 0x1dd   :  { %v4468_v44 = vpop.eup %4467 }
 0x1de   :  { %252 = vrot.lane.b32.xlu1 %v4468_v44, %s4657_s8 }
 0x250   :  { %v253_v45 = vpop.permute.xlu1 %252 }
 0x251   :  { %v255_v46 = vmul.f32 %v253_v45, %v237_v38 }
 0x253   :  { %257 = vrot.lane.b32.xlu1 %v255_v46, %s4658_s9 }
 0x2c5   :  { %v4781_v47 = vpop.permute.xlu1 %257 }
 0x2c6   :  { %4056 = vmatmul.mubr.msk.f32.vlgmr.msra.gmra.mxu1 %vm159_vm2, %v4781_v47 }
 0x2c7   :  { %4070 = vmatpush3.msra.mxu1 %v4690_v4  ;;  %4077 = vmatprep.mubr.msk.f32.mxu1 %vm4656_vm1, %v4655_v3 }
 0x2c8   :  { %4071 = vmatprep.subr.mxu1 %v4655_v3 }
 0x2c9   :  { %4072 = vmatpush3.msra.mxu1 %v4701_v6 }
 0x2ca   :  { %4073 = vmatprep.subr.mxu1 %v4655_v3 }
 0x2cb   :  { %4074 = vmatpush3.msra.mxu1 %v4715_v9 }
 0x2cc   :  { %4075 = vmatprep.subr.mxu1 %v4655_v3 }
 0x2cd   :  { %4076 = vmatpush3.msra.mxu1 %v4725_v10 }
 0x2ce   :  { %4091 = vmatprep.subr.mxu1 %v4655_v3 }
 0x386   :  { %v327_v48 = vpop.f32.mrf.mxu1 }
 0x387   :  { %v331_v49 = vadd.f32 %v327_v48, %v122_v16 }
 0x388   :  { %v4057_v50 = vpop.f32.mrf.mxu1 }
 0x389   :  { %4469 = vtanh.f32 %v331_v49  ;;  %v332_v52 = vmul.f32 0.5, %v331_v49 }
 0x38b   :  { %4471 = vtanh.f32 %v332_v52 }
 0x396   :  { %v4470_v51 = vpop.eup %4469 }
 0x397   :  { %339 = vrot.lane.b32.xlu0 %v4470_v51, %s4657_s8 }
 0x398   :  { %v4472_v53 = vpop.eup %4471 }
 0x399   :  { %v334_v54 = vadd.f32 1.0, %v4472_v53 }
 0x39b   :  { %v335_v55 = vmul.f32 0.5, %v334_v54 }
 0x39d   :  { %v337_v58 = vmul.f32 %v335_v55, %v249_v43 }
 0x409   :  { %v340_v56 = vpop.permute.xlu0 %339 }
 0x40a   :  { %v342_v57 = vmul.f32 %v340_v56, %v335_v55 }
 0x40c   :  { %344 = vrot.lane.b32.xlu1 %v342_v57, %s4657_s8 }
 0x47e   :  { %v345_v59 = vpop.permute.xlu1 %344 }
 0x47f   :  { %v347_v60 = vadd.f32 %v345_v59, %v337_v58 }
 0x481   :  { %4473 = vtanh.f32 %v347_v60 }
 0x48e   :  { %v4474_v61 = vpop.eup %4473 }
 0x48f   :  { %350 = vrot.lane.b32.xlu0 %v4474_v61, %s4657_s8 }
 0x501   :  { %v351_v62 = vpop.permute.xlu0 %350 }
 0x502   :  { %v353_v63 = vmul.f32 %v351_v62, %v335_v55 }
 0x504   :  { %355 = vrot.lane.b32.xlu1 %v353_v63, %s4658_s9 }
 0x576   :  { %v4799_v0 = vpop.permute.xlu1 %355 }
 0x577   :  { %4067 = vmatmul.mubr.msk.f32.vlgmr.msra.gmra.mxu0 %vm159_vm2, %v4799_v0 }
 0x578   :  { %4081 = vmatpush3.msra.mxu0 %v4690_v4  ;;  %4088 = vmatprep.mubr.msk.f32.mxu0 %vm4656_vm1, %v4655_v3 }
 0x579   :  { %4082 = vmatprep.subr.mxu0 %v4655_v3 }
 0x57a   :  { %4083 = vmatpush3.msra.mxu0 %v4701_v6 }
 0x57b   :  { %4084 = vmatprep.subr.mxu0 %v4655_v3 }
 0x57c   :  { %4085 = vmatpush3.msra.mxu0 %v4715_v9 }
 0x57d   :  { %4086 = vmatprep.subr.mxu0 %v4655_v3 }
 0x57e   :  { %4087 = vmatpush3.msra.mxu0 %v4725_v10 }
 0x57f   :  { %4102 = vmatprep.subr.mxu0 %v4655_v3 }
 0x637   :  { %v425_v1 = vpop.f32.mrf.mxu0 }
 0x638   :  { %v429_v2 = vadd.f32 %v425_v1, %v4767_v21 }
 0x639   :  { %v4068_v5 = vpop.f32.mrf.mxu0 }
 0x63a   :  { %4475 = vtanh.f32 %v429_v2  ;;  %v430_v8 = vmul.f32 0.5, %v429_v2 }
 0x63c   :  { %4477 = vtanh.f32 %v430_v8 }
 0x647   :  { %v4476_v7 = vpop.eup %4475 }
 0x648   :  { %437 = vrot.lane.b32.xlu0 %v4476_v7, %s4657_s8 }
 0x649   :  { %v4478_v11 = vpop.eup %4477 }
 0x64a   :  { %v432_v12 = vadd.f32 1.0, %v4478_v11 }
 0x64c   :  { %v433_v13 = vmul.f32 0.5, %v432_v12 }
 0x64e   :  { %v435_v16 = vmul.f32 %v433_v13, %v347_v60 }
 0x6ba   :  { %v438_v14 = vpop.permute.xlu0 %437 }
 0x6bb   :  { %v440_v15 = vmul.f32 %v438_v14, %v433_v13 }
 0x6bd   :  { %442 = vrot.lane.b32.xlu1 %v440_v15, %s4657_s8 }
 0x72f   :  { %v443_v17 = vpop.permute.xlu1 %442 }
 0x730   :  { %v445_v18 = vadd.f32 %v443_v17, %v435_v16  ;;  %v944_v16 = vld [vmem:[%s5541_s1 + $0x40] sm:$0xff]  ;;  %v943_v17 = vld [vmem:[%s5541_s1 + $0x38] sm:$0xff] }
 0x732   :  { %4479 = vtanh.f32 %v445_v18 }
 0x73f   :  { %v4480_v20 = vpop.eup %4479 }
 0x740   :  { %448 = vrot.lane.b32.xlu0 %v4480_v20, %s4657_s8 }
 0x7b2   :  { %v449_v21 = vpop.permute.xlu0 %448 }
 0x7b3   :  { %v451_v22 = vmul.f32 %v449_v21, %v433_v13 }
 0x7b5   :  { %453 = vrot.lane.b32.xlu1 %v451_v22, %s4658_s9 }
 0x827   :  { %v4818_v24 = vpop.permute.xlu1 %453 }
 0x828   :  { %4078 = vmatmul.mubr.msk.f32.vlgmr.msra.gmra.mxu1 %vm159_vm2, %v4818_v24 }
 0x829   :  { %4092 = vmatpush3.msra.mxu1 %v4690_v4  ;;  %4099 = vmatprep.mubr.msk.f32.mxu1 %vm4656_vm1, %v4655_v3 }
 0x82a   :  { %4093 = vmatprep.subr.mxu1 %v4655_v3 }
 0x82b   :  { %4094 = vmatpush3.msra.mxu1 %v4701_v6 }
 0x82c   :  { %4095 = vmatprep.subr.mxu1 %v4655_v3 }
 0x82d   :  { %4096 = vmatpush3.msra.mxu1 %v4715_v9 }
 0x82e   :  { %4097 = vmatprep.subr.mxu1 %v4655_v3 }
 0x82f   :  { %4098 = vmatpush3.msra.mxu1 %v4725_v10 }
 0x830   :  { %4113 = vmatprep.subr.mxu1 %v4655_v3 }
 0x8e8   :  { %v523_v26 = vpop.f32.mrf.mxu1 }
 0x8e9   :  { %v527_v28 = vadd.f32 %v523_v26, %v4765_v19 }
 0x8ea   :  { %v4079_v29 = vpop.f32.mrf.mxu1 }
 0x8eb   :  { %4481 = vtanh.f32 %v527_v28  ;;  %v528_v32 = vmul.f32 0.5, %v527_v28 }
 0x8ed   :  { %4483 = vtanh.f32 %v528_v32 }
 0x8f8   :  { %v4482_v31 = vpop.eup %4481 }
 0x8f9   :  { %535 = vrot.lane.b32.xlu0 %v4482_v31, %s4657_s8 }
 0x8fa   :  { %v4484_v33 = vpop.eup %4483 }
 0x8fb   :  { %v530_v34 = vadd.f32 1.0, %v4484_v33 }
 0x8fd   :  { %v531_v35 = vmul.f32 0.5, %v530_v34 }
 0x8ff   :  { %v533_v38 = vmul.f32 %v531_v35, %v445_v18  ;;  %v942_v18 = vld [vmem:[%s5541_s1 + $0x30] sm:$0xff] }
 0x96b   :  { %v536_v36 = vpop.permute.xlu0 %535 }
 0x96c   :  { %v538_v37 = vmul.f32 %v536_v36, %v531_v35  ;;  %v4911_v36 = vld [vmem:[%s5541_s1 + $0x60] sm:$0xff] }
 0x96e   :  { %540 = vrot.lane.b32.xlu1 %v538_v37, %s4657_s8  ;;  %v4918_v37 = vld [vmem:[%s5541_s1 + $0x58] sm:$0xff] }
 0x9e0   :  { %v541_v39 = vpop.permute.xlu1 %540 }
 0x9e1   :  { %v543_v40 = vadd.f32 %v541_v39, %v533_v38  ;;  %v4925_v38 = vld [vmem:[%s5541_s1 + $0x50] sm:$0xff] }
 0x9e3   :  { %4485 = vtanh.f32 %v543_v40 }
 0x9f0   :  { %v4486_v41 = vpop.eup %4485 }
 0x9f1   :  { %546 = vrot.lane.b32.xlu0 %v4486_v41, %s4657_s8 }
 0xa63   :  { %v547_v19 = vpop.permute.xlu0 %546 }
 0xa64   :  { %v549_v42 = vmul.f32 %v547_v19, %v531_v35  ;;  %v4905_v35 = vld [vmem:[%s5541_s1 + $0x68] sm:$0xff] }
 0xa66   :  { %551 = vrot.lane.b32.xlu1 %v549_v42, %s4658_s9 }
 0xad8   :  { %v4837_v43 = vpop.permute.xlu1 %551 }
 0xad9   :  { %4089 = vmatmul.mubr.msk.f32.vlgmr.msra.gmra.mxu0 %vm159_vm2, %v4837_v43 }
 0xada   :  { %4103 = vmatpush3.msra.mxu0 %v4690_v4  ;;  %4110 = vmatprep.mubr.msk.f32.mxu0 %vm4656_vm1, %v4655_v3 }
 0xadb   :  { %4104 = vmatprep.subr.mxu0 %v4655_v3 }
 0xadc   :  { %4105 = vmatpush3.msra.mxu0 %v4701_v6 }
 0xadd   :  { %4106 = vmatprep.subr.mxu0 %v4655_v3 }
 0xade   :  { %4107 = vmatpush3.msra.mxu0 %v4715_v9 }
 0xadf   :  { %4108 = vmatprep.subr.mxu0 %v4655_v3 }
 0xae0   :  { %4109 = vmatpush3.msra.mxu0 %v4725_v10 }
 0xb99   :  { %v621_v44 = vpop.f32.mrf.mxu0 }
 0xb9a   :  { %v625_v45 = vadd.f32 %v621_v44, %v4771_v25 }
 0xb9b   :  { %v4090_v46 = vpop.f32.mrf.mxu0 }
 0xb9c   :  { %4487 = vtanh.f32 %v625_v45  ;;  %v626_v49 = vmul.f32 0.5, %v625_v45  ;;  %v4958_v46 = vld [vmem:[%s5541_s1 + $0x70] ss:$0 sm:$0xff] }
 0xb9e   :  { %4489 = vtanh.f32 %v626_v49 }
 0xba9   :  { %v4488_v48 = vpop.eup %4487 }
 0xbaa   :  { %633 = vrot.lane.b32.xlu0 %v4488_v48, %s4657_s8 }
 0xbab   :  { %v4490_v50 = vpop.eup %4489 }
 0xbac   :  { %v628_v51 = vadd.f32 1.0, %v4490_v50 }
 0xbae   :  { %v629_v52 = vmul.f32 0.5, %v628_v51 }
 0xbb0   :  { %v631_v55 = vmul.f32 %v629_v52, %v543_v40 }
 0xc1c   :  { %v634_v53 = vpop.permute.xlu0 %633 }
 0xc1d   :  { %v636_v54 = vmul.f32 %v634_v53, %v629_v52 }
 0xc1f   :  { %638 = vrot.lane.b32.xlu1 %v636_v54, %s4657_s8 }
 0xc91   :  { %v639_v56 = vpop.permute.xlu1 %638 }
 0xc92   :  { %v641_v57 = vadd.f32 %v639_v56, %v631_v55 }
 0xc94   :  { %4491 = vtanh.f32 %v641_v57 }
 0xca1   :  { %v4492_v58 = vpop.eup %4491 }
 0xca2   :  { %644 = vrot.lane.b32.xlu0 %v4492_v58, %s4657_s8 }
 0xd14   :  { %v645_v25 = vpop.permute.xlu0 %644 }
 0xd15   :  { %v647_v59 = vmul.f32 %v645_v25, %v629_v52 }
 0xd17   :  { %649 = vrot.lane.b32.xlu1 %v647_v59, %s4658_s9 }
 0xd89   :  { %v650_v60 = vpop.permute.xlu1 %649 }
 0xd8a   :  { %4100 = vmatmul.mubr.msk.f32.vlgmr.msra.gmra.mxu1 %vm159_vm2, %v650_v60 }
 0xd8b   :  { %4114 = vmatpush3.msra.mxu1 %v4690_v4  ;;  %4121 = vmatprep.mubr.msk.f32.mxu1 %vm4656_vm1, %v4655_v3 }
 0xd8c   :  { %4115 = vmatprep.subr.mxu1 %v4655_v3 }
 0xd8d   :  { %4116 = vmatpush3.msra.mxu1 %v4701_v6 }
 0xd8e   :  { %4117 = vmatprep.subr.mxu1 %v4655_v3 }
 0xd8f   :  { %4118 = vmatpush3.msra.mxu1 %v4715_v9 }
 0xd90   :  { %4119 = vmatprep.subr.mxu1 %v4655_v3 }
 0xd91   :  { %4120 = vmatpush3.msra.mxu1 %v4725_v10 }
 0xd92   :  { %4144 = vmatprep.subr.mxu1 %v4655_v3 }
 0xe4a   :  { %v719_v61 = vpop.f32.mrf.mxu1 }
 0xe4b   :  { %v723_v4 = vadd.f32 %v719_v61, %v4769_v23  ;;  %v945_v23 = vld [vmem:[%s5541_s1 + $0x48] sm:$0xff] }
 0xe4c   :  { %v4101_v62 = vpop.f32.mrf.mxu1  ;;  %4124 = vmatprep.subr.mxu0 %v945_v23 }
 0xe4d   :  { %4493 = vtanh.f32 %v723_v4  ;;  %v724_v1 = vmul.f32 0.5, %v723_v4 }
 0xe4f   :  { %4495 = vtanh.f32 %v724_v1 }
 0xe5a   :  { %v4494_v63 = vpop.eup %4493 }
 0xe5b   :  { %731 = vrot.lane.b32.xlu0 %v4494_v63, %s4657_s8 }
 0xe5c   :  { %v4496_v6 = vpop.eup %4495 }
 0xe5d   :  { %v726_v2 = vadd.f32 1.0, %v4496_v6 }
 0xe5f   :  { %v727_v5 = vmul.f32 0.5, %v726_v2 }
 0xe61   :  { %v729_v10 = vmul.f32 %v727_v5, %v641_v57 }
 0xecd   :  { %v732_v9 = vpop.permute.xlu0 %731 }
 0xece   :  { %v734_v7 = vmul.f32 %v732_v9, %v727_v5 }
 0xed0   :  { %736 = vrot.lane.b32.xlu1 %v734_v7, %s4657_s8 }
 0xf42   :  { %v737_v8 = vpop.permute.xlu1 %736 }
 0xf43   :  { %v739_v11 = vadd.f32 %v737_v8, %v729_v10 }
 0xf45   :  { %4497 = vtanh.f32 %v739_v11 }
 0xf52   :  { %v4498_v12 = vpop.eup %4497 }
 0xf53   :  { %742 = vrot.lane.b32.xlu0 %v4498_v12, %s4657_s8 }
 0xfc5   :  { %v743_v13 = vpop.permute.xlu0 %742 }
 0xfc6   :  { %v745_v14 = vmul.f32 %v743_v13, %v727_v5 }
 0xfc8   :  { %747 = vrot.lane.b32.xlu1 %v745_v14, %s4658_s9 }
0x103a   :  { %v748_v15 = vpop.permute.xlu1 %747 }
0x103b   :  { %4111 = vmatmul.mubr.msk.f32.vlgmr.msra.gmra.mxu0 %vm159_vm2, %v748_v15 }
0x103c   :  { %4125 = vmatpush3.msra.mxu0 %v945_v23  ;;  %4132 = vmatprep.mubr.msk.f32.mxu0 %vm159_vm2, %v4781_v47 }
0x103d   :  { %4126 = vmatprep.subr.mxu0 %v944_v16 }
0x103e   :  { %4127 = vmatpush3.msra.mxu0 %v944_v16 }
0x103f   :  { %4128 = vmatprep.subr.mxu0 %v943_v17 }
0x1040   :  { %4129 = vmatpush3.msra.mxu0 %v943_v17 }
0x1041   :  { %4130 = vmatprep.subr.mxu0 %v942_v18 }
0x1042   :  { %4131 = vmatpush3.msra.mxu0 %v942_v18 }
0x1043   :  { %4133 = vmatmul.mubr.msk.f32.vlgmr.msra.gmra.mxu0 %vm159_vm2, %v4799_v0  ;;  %4166 = vmatprep.subr.mxu0 %v4655_v3 }
0x1044   :  { %4135 = vmatprep.mubr.msk.f32.mxu0 %vm159_vm2, %v4818_v24  ;;  %4167 = vmatpush3.msra.mxu0 %v4905_v35 }
0x1045   :  { %4168 = vmatprep.subr.mxu0 %v4655_v3 }
0x1046   :  { %4169 = vmatpush3.msra.mxu0 %v4911_v36 }
0x1047   :  { %4136 = vmatmul.mubr.msk.f32.gmra.mxu0 %vm159_vm2, %v4837_v43  ;;  %4170 = vmatprep.subr.mxu0 %v4655_v3 }
0x1048   :  { %4138 = vmatprep.mubr.msk.f32.mxu0 %vm159_vm2, %v650_v60  ;;  %4171 = vmatpush3.msra.mxu0 %v4918_v37 }
0x1049   :  { %4172 = vmatprep.subr.mxu0 %v4655_v3 }
0x104a   :  { %4173 = vmatpush3.msra.mxu0 %v4925_v38 }
0x104b   :  { %4139 = vmatmul.mubr.msk.f32.gmra.mxu0 %vm159_vm2, %v748_v15  ;;  %4188 = vmatprep.subr.mxu0 %v4655_v3 }
0x10fb   :  { %v817_v47 = vpop.f32.mrf.mxu0 }
0x10fc   :  { %v821_v20 = vadd.f32 %v817_v47, %v4775_v30 }
0x10fd   :  { %v4112_v21 = vpop.f32.mrf.mxu0 }
0x10fe   :  { %4499 = vtanh.f32 %v821_v20  ;;  %v822_v0 = vmul.f32 0.5, %v821_v20 }
0x1100   :  { %4501 = vtanh.f32 %v822_v0 }
0x1103   :  { %v4134_v19 = vpop.f32.mrf.mxu0 }
0x1104   :  { %v1028_v14 = vadd.f32 %v4134_v19, %v4958_v46 }
0x1105   :  { %v1022_v45 = vpop.f32.mrf.mxu0 }
0x1106   :  { %v1023_v48 = vadd.f32 %v4958_v46, %v1022_v45 }
0x110b   :  { %v4500_v22 = vpop.eup %4499 }
0x110c   :  { %829 = vrot.lane.b32.xlu0 %v4500_v22, %s4657_s8 }
0x110d   :  { %v4502_v26 = vpop.eup %4501 }
0x110e   :  { %v824_v28 = vadd.f32 1.0, %v4502_v26 }
0x1110   :  { %v825_v24 = vmul.f32 0.5, %v824_v28 }
0x1112   :  { %v827_v32 = vmul.f32 %v825_v24, %v739_v11 }
0x117e   :  { %v830_v29 = vpop.permute.xlu0 %829 }
0x117f   :  { %v832_v31 = vmul.f32 %v830_v29, %v825_v24 }
0x1181   :  { %834 = vrot.lane.b32.xlu1 %v832_v31, %s4657_s8 }
0x11f3   :  { %v835_v33 = vpop.permute.xlu1 %834 }
0x11f4   :  { %v4898_v34 = vadd.f32 %v835_v33, %v827_v32 }
0x11f6   :  { %4503 = vtanh.f32 %v4898_v34 }
0x1203   :  { %v4504_v30 = vpop.eup %4503 }
0x1204   :  { %840 = vrot.lane.b32.xlu0 %v4504_v30, %s4657_s8 }
0x1276   :  { %v841_v39 = vpop.permute.xlu0 %840 }
0x1277   :  { %v843_v40 = vmul.f32 %v841_v39, %v825_v24  ;;  %v4137_v39 = vpop.f32.mrf.mxu0 }
0x1279   :  { %845 = vrot.lane.b32.xlu1 %v843_v40, %s4658_s9  ;;  %v1032_v40 = vpop.f32.mrf.mxu0 }
0x12eb   :  { %v846_v41 = vpop.permute.xlu1 %845 }
0x12ec   :  { %4122 = vmatmul.mubr.msk.f32.vlgmr.msra.gmra.mxu1 %vm159_vm2, %v846_v41  ;;  %4141 = vmatprep.mubr.msk.f32.mxu0 %vm159_vm2, %v846_v41  ;;  %v5006_v41 = vpop.f32.mrf.mxu0 }
0x12ed   :  { %4145 = vmatpush3.msra.mxu1 %v4905_v35  ;;  %4152 = vmatprep.mubr.msk.f32.mxu1 %vm4656_vm1, %v4655_v3 }
0x12ee   :  { %4146 = vmatprep.subr.mxu1 %v4655_v3  ;;  %v5008_v19 = vpop.f32.mrf.mxu0 }
0x12ef   :  { %4147 = vmatpush3.msra.mxu1 %v4911_v36 }
0x12f0   :  { %4148 = vmatprep.subr.mxu1 %v4655_v3 }
0x12f1   :  { %4149 = vmatpush3.msra.mxu1 %v4918_v37 }
0x12f2   :  { %4150 = vmatprep.subr.mxu1 %v4655_v3 }
0x12f3   :  { %4151 = vmatpush3.msra.mxu1 %v4925_v38 }
0x12f4   :  { %4153 = vmatmul.mubr.f32.vlgmr.msra.gmra.mxu1 %v4655_v3  ;;  %4155 = vmatprep.subr.mxu1 %v4655_v3 }
0x12f5   :  { %4156 = vmatpush3.msra.mxu1 %v4905_v35  ;;  %4163 = vmatprep.mubr.msk.f32.mxu1 %vm4656_vm1, %v4655_v3 }
0x12f6   :  { %4157 = vmatprep.subr.mxu1 %v4655_v3 }
0x12f7   :  { %4158 = vmatpush3.msra.mxu1 %v4911_v36 }
0x12f8   :  { %4159 = vmatprep.subr.mxu1 %v4655_v3 }
0x12f9   :  { %4160 = vmatpush3.msra.mxu1 %v4918_v37 }
0x12fa   :  { %4161 = vmatprep.subr.mxu1 %v4655_v3 }
0x12fb   :  { %4162 = vmatpush3.msra.mxu1 %v4925_v38 }
0x12fc   :  { %4177 = vmatprep.subr.mxu1 %v4655_v3 }
0x13ac   :  { %v915_v42 = vpop.f32.mrf.mxu1 }
0x13ad   :  { %v919_v43 = vadd.f32 %v915_v42, %v4773_v27 }
0x13ae   :  { %v4123_v44 = vpop.f32.mrf.mxu1 }
0x13af   :  { %v920_v4 = vmul.f32 0.5, %v919_v43  ;;  %v1033_v44 = vadd.f32 %v4958_v46, %v1032_v40 }
0x13b4   :  { %v1131_v49 = vpop.f32.mrf.mxu1 }
0x13b5   :  { %v1135_v50 = vadd.f32 %v1131_v49, %v1023_v48 }
0x13b6   :  { %v4154_v51 = vpop.f32.mrf.mxu1 }
0x13b7   :  { %4505 = vtanh.f32 %v1135_v50  ;;  %v1136_v53 = vmul.f32 0.5, %v1135_v50 }
0x13b9   :  { %4507 = vtanh.f32 %v1136_v53 }
0x13c4   :  { %v4506_v52 = vpop.eup %4505 }
0x13c5   :  { %1143 = vrot.lane.b32.xlu0 %v4506_v52, %s4657_s8 }
0x13c6   :  { %v4508_v54 = vpop.eup %4507 }
0x13c7   :  { %v1138_v27 = vadd.f32 1.0, %v4508_v54 }
0x13c9   :  { %v1139_v55 = vmul.f32 0.5, %v1138_v27 }
0x13cb   :  { %v1141_v58 = vmul.f32 0.0, %v1139_v55 }
0x1437   :  { %v1144_v56 = vpop.permute.xlu0 %1143 }
0x1438   :  { %v1146_v57 = vmul.f32 %v1144_v56, %v1139_v55 }
0x143a   :  { %1148 = vrot.lane.b32.xlu1 %v1146_v57, %s4657_s8 }
0x14ac   :  { %v1149_v25 = vpop.permute.xlu1 %1148 }
0x14ad   :  { %v1151_v59 = vadd.f32 %v1149_v25, %v1141_v58 }
0x14af   :  { %4509 = vtanh.f32 %v1151_v59 }
0x14b0   :  { %4511 = vtanh.f32 %v919_v43 }
0x14b1   :  { %4513 = vtanh.f32 %v920_v4  ;;  %v1038_v4 = vadd.f32 %v4137_v39, %v4958_v46 }
0x14bc   :  { %v4510_v60 = vpop.eup %4509 }
0x14bd   :  { %1154 = vrot.lane.b32.xlu0 %v4510_v60, %s4657_s8  ;;  %v4512_v61 = vpop.eup %4511 }
0x14be   :  { %v4514_v62 = vpop.eup %4513 }
0x14bf   :  { %v922_v63 = vadd.f32 1.0, %v4514_v62 }
0x14c1   :  { %927 = vrot.lane.b32.xlu0 %v4512_v61, %s4657_s8  ;;  %v923_v2 = vmul.f32 0.5, %v922_v63 }
0x14c3   :  { %v925_v10 = vmul.f32 %v923_v2, %v4898_v34 }
0x152f   :  { %v1155_v1 = vpop.permute.xlu0 %1154 }
0x1530   :  { %v1157_v6 = vmul.f32 %v1155_v1, %v1139_v55 }
0x1532   :  { %1159 = vrot.lane.b32.xlu1 %v1157_v6, %s4658_s9 }
0x1533   :  { %v928_v5 = vpop.permute.xlu0 %927 }
0x1534   :  { %v930_v9 = vmul.f32 %v928_v5, %v923_v2 }
0x1536   :  { %932 = vrot.lane.b32.xlu0 %v930_v9, %s4657_s8 }
0x15a4   :  { %v1160_v7 = vpop.permute.xlu1 %1159 }
0x15a5   :  { %4164 = vmatmul.mubr.msk.f32.vlgmr.msra.gmra.mxu1 %vm159_vm2, %v1160_v7 }
0x15a6   :  { %4178 = vmatpush3.msra.mxu1 %v4905_v35  ;;  %4185 = vmatprep.mubr.msk.f32.mxu1 %vm4656_vm1, %v4655_v3 }
0x15a7   :  { %4179 = vmatprep.subr.mxu1 %v4655_v3 }
0x15a8   :  { %v933_v8 = vpop.permute.xlu0 %932  ;;  %4180 = vmatpush3.msra.mxu1 %v4911_v36 }
0x15a9   :  { %v4974_v11 = vadd.f32 %v933_v8, %v925_v10  ;;  %4181 = vmatprep.subr.mxu1 %v4655_v3 }
0x15aa   :  { %4182 = vmatpush3.msra.mxu1 %v4918_v37 }
0x15ab   :  { %4515 = vtanh.f32 %v4974_v11  ;;  %4183 = vmatprep.subr.mxu1 %v4655_v3 }
0x15ac   :  { %4184 = vmatpush3.msra.mxu1 %v4925_v38 }
0x15ad   :  { %4199 = vmatprep.subr.mxu1 %v4655_v3 }
0x15b8   :  { %v4516_v23 = vpop.eup %4515 }
0x15b9   :  { %938 = vrot.lane.b32.xlu0 %v4516_v23, %s4657_s8 }
0x162b   :  { %v939_v12 = vpop.permute.xlu0 %938 }
0x162c   :  { %v941_v13 = vmul.f32 %v939_v12, %v923_v2 }
0x162e   :  { %952 = vrot.lane.b32.xlu0 %v941_v13, %s4658_s9 }
0x1665   :  { %v1229_v15 = vpop.f32.mrf.mxu1 }
0x1666   :  { %v1233_v16 = vadd.f32 %v1229_v15, %v1028_v14 }
0x1667   :  { %v4165_v17 = vpop.f32.mrf.mxu1 }
0x1668   :  { %4517 = vtanh.f32 %v1233_v16  ;;  %v1234_v20 = vmul.f32 0.5, %v1233_v16 }
0x166a   :  { %4519 = vtanh.f32 %v1234_v20 }
0x1675   :  { %v4518_v18 = vpop.eup %4517 }
0x1676   :  { %1241 = vrot.lane.b32.xlu1 %v4518_v18, %s4657_s8  ;;  %v1043_v18 = vadd.f32 %v4958_v46, %v5008_v19 }
0x1677   :  { %v4520_v21 = vpop.eup %4519 }
0x1678   :  { %v1236_v22 = vadd.f32 1.0, %v4520_v21 }
0x167a   :  { %v1237_v0 = vmul.f32 0.5, %v1236_v22 }
0x167c   :  { %v1239_v24 = vmul.f32 %v1237_v0, %v1151_v59 }
0x16a0   :  { %v4986_v47 = vpop.permute.xlu0 %952 }
0x16a1   :  { %4142 = vmatmul.mubr.msk.f32.gmra.mxu0 %vm159_vm2, %v4986_v47 }
0x16a2   :  { %4174 = vmatprep.mubr.msk.f32.mxu0 %vm4656_vm1, %v4655_v3 }
0x16e8   :  { %v1242_v26 = vpop.permute.xlu1 %1241 }
0x16e9   :  { %v1244_v28 = vmul.f32 %v1242_v26, %v1237_v0 }
0x16eb   :  { %1246 = vrot.lane.b32.xlu1 %v1244_v28, %s4657_s8 }
0x175d   :  { %v1247_v29 = vpop.permute.xlu1 %1246 }
0x175e   :  { %v1249_v31 = vadd.f32 %v1247_v29, %v1239_v24 }
0x1760   :  { %4521 = vtanh.f32 %v1249_v31 }
0x1761   :  { %v5010_v42 = vpop.f32.mrf.mxu0 }
0x1763   :  { %v5012_v43 = vpop.f32.mrf.mxu0 }
0x176d   :  { %v4522_v32 = vpop.eup %4521 }
0x176e   :  { %1252 = vrot.lane.b32.xlu1 %v4522_v32, %s4657_s8 }
0x17e0   :  { %v1253_v33 = vpop.permute.xlu1 %1252 }
0x17e1   :  { %v1255_v34 = vmul.f32 %v1253_v33, %v1237_v0 }
0x17e3   :  { %1257 = vrot.lane.b32.xlu1 %v1255_v34, %s4658_s9 }
0x1855   :  { %v1258_v30 = vpop.permute.xlu1 %1257 }
0x1856   :  { %4175 = vmatmul.mubr.msk.f32.vlgmr.msra.gmra.mxu0 %vm159_vm2, %v1258_v30 }
0x1857   :  { %4189 = vmatpush3.msra.mxu0 %v4905_v35  ;;  %4196 = vmatprep.mubr.msk.f32.mxu0 %vm4656_vm1, %v4655_v3 }
0x1858   :  { %4190 = vmatprep.subr.mxu0 %v4655_v3 }
0x1859   :  { %4191 = vmatpush3.msra.mxu0 %v4911_v36 }
0x185a   :  { %4192 = vmatprep.subr.mxu0 %v4655_v3 }
0x185b   :  { %4193 = vmatpush3.msra.mxu0 %v4918_v37 }
0x185c   :  { %4194 = vmatprep.subr.mxu0 %v4655_v3 }
0x185d   :  { %4195 = vmatpush3.msra.mxu0 %v4925_v38 }
0x185e   :  { %4210 = vmatprep.subr.mxu0 %v4655_v3 }
0x1916   :  { %v1327_v45 = vpop.f32.mrf.mxu0 }
0x1917   :  { %v1331_v48 = vadd.f32 %v1327_v45, %v1033_v44 }
0x1918   :  { %v4176_v49 = vpop.f32.mrf.mxu0 }
0x1919   :  { %4523 = vtanh.f32 %v1331_v48  ;;  %v1332_v51 = vmul.f32 0.5, %v1331_v48 }
0x191b   :  { %4525 = vtanh.f32 %v1332_v51 }
0x1926   :  { %v4524_v50 = vpop.eup %4523 }
0x1927   :  { %1339 = vrot.lane.b32.xlu0 %v4524_v50, %s4657_s8 }
0x1928   :  { %v4526_v52 = vpop.eup %4525 }
0x1929   :  { %v1334_v53 = vadd.f32 1.0, %v4526_v52 }
0x192b   :  { %v1335_v54 = vmul.f32 0.5, %v1334_v53 }
0x192d   :  { %v1337_v56 = vmul.f32 %v1335_v54, %v1249_v31 }
0x1999   :  { %v1340_v27 = vpop.permute.xlu0 %1339 }
0x199a   :  { %v1342_v55 = vmul.f32 %v1340_v27, %v1335_v54 }
0x199c   :  { %1344 = vrot.lane.b32.xlu1 %v1342_v55, %s4657_s8 }
0x1a0e   :  { %v1345_v57 = vpop.permute.xlu1 %1344 }
0x1a0f   :  { %v1347_v58 = vadd.f32 %v1345_v57, %v1337_v56 }
0x1a11   :  { %4527 = vtanh.f32 %v1347_v58 }
0x1a1e   :  { %v4528_v25 = vpop.eup %4527 }
0x1a1f   :  { %1350 = vrot.lane.b32.xlu0 %v4528_v25, %s4657_s8  ;;  %v1053_v25 = vadd.f32 %v4958_v46, %v5012_v43 }
0x1a91   :  { %v1351_v59 = vpop.permute.xlu0 %1350 }
0x1a92   :  { %v1353_v60 = vmul.f32 %v1351_v59, %v1335_v54 }
0x1a94   :  { %1355 = vrot.lane.b32.xlu1 %v1353_v60, %s4658_s9 }
0x1b06   :  { %v1356_v61 = vpop.permute.xlu1 %1355 }
0x1b07   :  { %4186 = vmatmul.mubr.msk.f32.vlgmr.msra.gmra.mxu1 %vm159_vm2, %v1356_v61 }
0x1b08   :  { %4200 = vmatpush3.msra.mxu1 %v4905_v35  ;;  %4207 = vmatprep.mubr.msk.f32.mxu1 %vm4656_vm1, %v4655_v3 }
0x1b09   :  { %4201 = vmatprep.subr.mxu1 %v4655_v3 }
0x1b0a   :  { %4202 = vmatpush3.msra.mxu1 %v4911_v36 }
0x1b0b   :  { %4203 = vmatprep.subr.mxu1 %v4655_v3 }
0x1b0c   :  { %4204 = vmatpush3.msra.mxu1 %v4918_v37 }
0x1b0d   :  { %4205 = vmatprep.subr.mxu1 %v4655_v3 }
0x1b0e   :  { %4206 = vmatpush3.msra.mxu1 %v4925_v38 }
0x1b0f   :  { %4221 = vmatprep.subr.mxu1 %v4655_v3 }
0x1bc7   :  { %v1425_v62 = vpop.f32.mrf.mxu1 }
0x1bc8   :  { %v1429_v63 = vadd.f32 %v1425_v62, %v1038_v4 }
0x1bc9   :  { %v4187_v1 = vpop.f32.mrf.mxu1 }
0x1bca   :  { %4529 = vtanh.f32 %v1429_v63  ;;  %v1430_v2 = vmul.f32 0.5, %v1429_v63 }
0x1bcc   :  { %4531 = vtanh.f32 %v1430_v2 }
0x1bd7   :  { %v4530_v6 = vpop.eup %4529 }
0x1bd8   :  { %1437 = vrot.lane.b32.xlu0 %v4530_v6, %s4657_s8 }
0x1bd9   :  { %v4532_v5 = vpop.eup %4531 }
0x1bda   :  { %v1432_v9 = vadd.f32 1.0, %v4532_v5 }
0x1bdc   :  { %v1433_v7 = vmul.f32 0.5, %v1432_v9 }
0x1bde   :  { %v1435_v23 = vmul.f32 %v1433_v7, %v1347_v58 }
0x1c4a   :  { %v1438_v10 = vpop.permute.xlu0 %1437 }
0x1c4b   :  { %v1440_v8 = vmul.f32 %v1438_v10, %v1433_v7 }
0x1c4d   :  { %1442 = vrot.lane.b32.xlu1 %v1440_v8, %s4657_s8 }
0x1cbf   :  { %v1443_v12 = vpop.permute.xlu1 %1442 }
0x1cc0   :  { %v1445_v13 = vadd.f32 %v1443_v12, %v1435_v23  ;;  %v5081_v12 = vld [vmem:[%s5541_s1 + $0xb0] sm:$0xff] }
0x1cc2   :  { %4533 = vtanh.f32 %v1445_v13 }
0x1ccf   :  { %v4534_v14 = vpop.eup %4533 }
0x1cd0   :  { %1448 = vrot.lane.b32.xlu0 %v4534_v14, %s4657_s8  ;;  %v5087_v14 = vld [vmem:[%s5541_s1 + $0xa8] sm:$0xff] }
0x1d42   :  { %v1449_v15 = vpop.permute.xlu0 %1448 }
0x1d43   :  { %v1451_v16 = vmul.f32 %v1449_v15, %v1433_v7  ;;  %v5096_v15 = vld [vmem:[%s5541_s1 + $0xa0] sm:$0xff] }
0x1d45   :  { %1453 = vrot.lane.b32.xlu1 %v1451_v16, %s4658_s9  ;;  %v5103_v16 = vld [vmem:[%s5541_s1 + $0x98] sm:$0xff] }
0x1db7   :  { %v1454_v17 = vpop.permute.xlu1 %1453 }
0x1db8   :  { %4197 = vmatmul.mubr.msk.f32.vlgmr.msra.gmra.mxu0 %vm159_vm2, %v1454_v17 }
0x1db9   :  { %4211 = vmatpush3.msra.mxu0 %v4905_v35  ;;  %4218 = vmatprep.mubr.msk.f32.mxu0 %vm4656_vm1, %v4655_v3 }
0x1dba   :  { %4212 = vmatprep.subr.mxu0 %v4655_v3 }
0x1dbb   :  { %4213 = vmatpush3.msra.mxu0 %v4911_v36 }
0x1dbc   :  { %4214 = vmatprep.subr.mxu0 %v4655_v3 }
0x1dbd   :  { %4215 = vmatpush3.msra.mxu0 %v4918_v37 }
0x1dbe   :  { %4216 = vmatprep.subr.mxu0 %v4655_v3 }
0x1dbf   :  { %4217 = vmatpush3.msra.mxu0 %v4925_v38 }
0x1dc0   :  { %4232 = vmatprep.subr.mxu0 %v4655_v3 }
0x1e78   :  { %v1523_v20 = vpop.f32.mrf.mxu0 }
0x1e79   :  { %v1527_v21 = vadd.f32 %v1523_v20, %v1043_v18 }
0x1e7a   :  { %v4198_v22 = vpop.f32.mrf.mxu0 }
0x1e7b   :  { %4535 = vtanh.f32 %v1527_v21  ;;  %v1528_v26 = vmul.f32 0.5, %v1527_v21 }
0x1e7d   :  { %4537 = vtanh.f32 %v1528_v26 }
0x1e88   :  { %v4536_v0 = vpop.eup %4535 }
0x1e89   :  { %1535 = vrot.lane.b32.xlu0 %v4536_v0, %s4657_s8 }
0x1e8a   :  { %v4538_v28 = vpop.eup %4537 }
0x1e8b   :  { %v1530_v24 = vadd.f32 1.0, %v4538_v28 }
0x1e8d   :  { %v1531_v29 = vmul.f32 0.5, %v1530_v24 }
0x1e8f   :  { %v1533_v33 = vmul.f32 %v1531_v29, %v1445_v13 }
0x1efb   :  { %v1536_v31 = vpop.permute.xlu0 %1535 }
0x1efc   :  { %v1538_v32 = vmul.f32 %v1536_v31, %v1531_v29 }
0x1efe   :  { %1540 = vrot.lane.b32.xlu1 %v1538_v32, %s4657_s8 }
0x1f70   :  { %v1541_v34 = vpop.permute.xlu1 %1540 }
0x1f71   :  { %v1543_v30 = vadd.f32 %v1541_v34, %v1533_v33  ;;  %v1847_v34 = vld [vmem:[%s5541_s1 + $0x90] sm:$0xff] }
0x1f73   :  { %4539 = vtanh.f32 %v1543_v30 }
0x1f80   :  { %v4540_v39 = vpop.eup %4539 }
0x1f81   :  { %1546 = vrot.lane.b32.xlu0 %v4540_v39, %s4657_s8  ;;  %v1845_v39 = vld [vmem:[%s5541_s1 + $0x80] sm:$0xff] }
0x1ff3   :  { %v1547_v40 = vpop.permute.xlu0 %1546 }
0x1ff4   :  { %v1549_v19 = vmul.f32 %v1547_v40, %v1531_v29  ;;  %v1844_v40 = vld [vmem:[%s5541_s1 + $0x78] sm:$0xff] }
0x1ff6   :  { %1551 = vrot.lane.b32.xlu1 %v1549_v19, %s4658_s9 }
0x2068   :  { %v1552_v44 = vpop.permute.xlu1 %1551 }
0x2069   :  { %4208 = vmatmul.mubr.msk.f32.vlgmr.msra.gmra.mxu1 %vm159_vm2, %v1552_v44 }
0x206a   :  { %4222 = vmatpush3.msra.mxu1 %v4905_v35  ;;  %4229 = vmatprep.mubr.msk.f32.mxu1 %vm4656_vm1, %v4655_v3  ;;  %v1048_v35 = vadd.f32 %v5006_v41, %v4958_v46 }
0x206b   :  { %4223 = vmatprep.subr.mxu1 %v4655_v3 }
0x206c   :  { %4224 = vmatpush3.msra.mxu1 %v4911_v36 }
0x206d   :  { %4225 = vmatprep.subr.mxu1 %v4655_v3 }
0x206e   :  { %4226 = vmatpush3.msra.mxu1 %v4918_v37 }
0x206f   :  { %4227 = vmatprep.subr.mxu1 %v4655_v3 }
0x2070   :  { %4228 = vmatpush3.msra.mxu1 %v4925_v38 }
0x2071   :  { %4243 = vmatprep.subr.mxu1 %v4655_v3 }
0x2129   :  { %v1621_v45 = vpop.f32.mrf.mxu1 }
0x212a   :  { %v1625_v48 = vadd.f32 %v1621_v45, %v1048_v35 }
0x212b   :  { %v4209_v49 = vpop.f32.mrf.mxu1 }
0x212c   :  { %4541 = vtanh.f32 %v1625_v48  ;;  %v1626_v36 = vmul.f32 0.5, %v1625_v48  ;;  %v3776_v48 = vld [vmem:[%s5541_s1 + $0xb8] ss:$0 sm:$0xff] }
0x212e   :  { %4543 = vtanh.f32 %v1626_v36 }
0x2139   :  { %v4542_v50 = vpop.eup %4541 }
0x213a   :  { %1633 = vrot.lane.b32.xlu0 %v4542_v50, %s4657_s8 }
0x213b   :  { %v4544_v51 = vpop.eup %4543 }
0x213c   :  { %v1628_v37 = vadd.f32 1.0, %v4544_v51 }
0x213e   :  { %v1629_v52 = vmul.f32 0.5, %v1628_v37 }
0x2140   :  { %v1631_v38 = vmul.f32 %v1629_v52, %v1543_v30  ;;  %v1846_v30 = vld [vmem:[%s5541_s1 + $0x88] sm:$0xff] }
0x21ac   :  { %v1634_v53 = vpop.permute.xlu0 %1633 }
0x21ad   :  { %v1636_v54 = vmul.f32 %v1634_v53, %v1629_v52 }
0x21af   :  { %1638 = vrot.lane.b32.xlu1 %v1636_v54, %s4657_s8 }
0x2221   :  { %v1639_v27 = vpop.permute.xlu1 %1638 }
0x2222   :  { %v1641_v55 = vadd.f32 %v1639_v27, %v1631_v38 }
0x2224   :  { %4545 = vtanh.f32 %v1641_v55 }
0x2231   :  { %v4546_v41 = vpop.eup %4545 }
0x2232   :  { %1644 = vrot.lane.b32.xlu0 %v4546_v41, %s4657_s8 }
0x22a4   :  { %v1645_v56 = vpop.permute.xlu0 %1644 }
0x22a5   :  { %v1647_v57 = vmul.f32 %v1645_v56, %v1629_v52 }
0x22a7   :  { %1649 = vrot.lane.b32.xlu1 %v1647_v57, %s4658_s9 }
0x2319   :  { %v1650_v58 = vpop.permute.xlu1 %1649 }
0x231a   :  { %4219 = vmatmul.mubr.msk.f32.vlgmr.msra.gmra.mxu0 %vm159_vm2, %v1650_v58 }
0x231b   :  { %4240 = vmatprep.mubr.msk.f32.mxu0 %vm4656_vm1, %v4655_v3  ;;  %4233 = vmatpush3.msra.mxu0 %v1847_v34 }
0x231c   :  { %4234 = vmatprep.subr.mxu0 %v4655_v3 }
0x231d   :  { %4235 = vmatpush3.msra.mxu0 %v1846_v30 }
0x231e   :  { %4236 = vmatprep.subr.mxu0 %v4655_v3 }
0x231f   :  { %4237 = vmatpush3.msra.mxu0 %v1845_v39 }
0x2320   :  { %4238 = vmatprep.subr.mxu0 %v4655_v3 }
0x2321   :  { %4239 = vmatpush3.msra.mxu0 %v1844_v40 }
0x2322   :  { %4254 = vmatprep.subr.mxu0 %v4655_v3 }
0x23da   :  { %v1719_v59 = vpop.f32.mrf.mxu0 }
0x23db   :  { %v1723_v60 = vadd.f32 %v1719_v59, %v1053_v25 }
0x23dc   :  { %v4220_v61 = vpop.f32.mrf.mxu0 }
0x23dd   :  { %4547 = vtanh.f32 %v1723_v60  ;;  %v1724_v62 = vmul.f32 0.5, %v1723_v60 }
0x23df   :  { %4549 = vtanh.f32 %v1724_v62 }
0x23ea   :  { %v4548_v4 = vpop.eup %4547 }
0x23eb   :  { %1731 = vrot.lane.b32.xlu0 %v4548_v4, %s4657_s8 }
0x23ec   :  { %v4550_v63 = vpop.eup %4549 }
0x23ed   :  { %v1726_v1 = vadd.f32 1.0, %v4550_v63 }
0x23ef   :  { %v1727_v6 = vmul.f32 0.5, %v1726_v1 }
0x23f1   :  { %v1729_v9 = vmul.f32 %v1727_v6, %v1641_v55 }
0x245d   :  { %v1732_v2 = vpop.permute.xlu0 %1731 }
0x245e   :  { %v1734_v5 = vmul.f32 %v1732_v2, %v1727_v6 }
0x2460   :  { %1736 = vrot.lane.b32.xlu1 %v1734_v5, %s4657_s8 }
0x24d2   :  { %v1737_v7 = vpop.permute.xlu1 %1736 }
0x24d3   :  { %v1739_v10 = vadd.f32 %v1737_v7, %v1729_v9 }
0x24d5   :  { %4551 = vtanh.f32 %v1739_v10 }
0x24e2   :  { %v4552_v43 = vpop.eup %4551 }
0x24e3   :  { %1742 = vrot.lane.b32.xlu0 %v4552_v43, %s4657_s8 }
0x2555   :  { %v1743_v8 = vpop.permute.xlu0 %1742 }
0x2556   :  { %v1745_v23 = vmul.f32 %v1743_v8, %v1727_v6 }
0x2558   :  { %1747 = vrot.lane.b32.xlu1 %v1745_v23, %s4658_s9 }
0x25ca   :  { %v1748_v13 = vpop.permute.xlu1 %1747 }
0x25cb   :  { %4230 = vmatmul.mubr.msk.f32.vlgmr.msra.gmra.mxu1 %vm159_vm2, %v1748_v13 }
0x25cc   :  { %4244 = vmatpush3.msra.mxu1 %v5081_v12  ;;  %4251 = vmatprep.mubr.msk.f32.mxu1 %vm4656_vm1, %v4655_v3 }
0x25cd   :  { %4245 = vmatprep.subr.mxu1 %v4655_v3 }
0x25ce   :  { %4246 = vmatpush3.msra.mxu1 %v5087_v14 }
0x25cf   :  { %4247 = vmatprep.subr.mxu1 %v4655_v3 }
0x25d0   :  { %4248 = vmatpush3.msra.mxu1 %v5096_v15 }
0x25d1   :  { %4249 = vmatprep.subr.mxu1 %v4655_v3 }
0x25d2   :  { %4250 = vmatpush3.msra.mxu1 %v5103_v16 }
0x25d3   :  { %4252 = vmatmul.mubr.msk.f32.vlgmr.msra.gmra.mxu1 %vm159_vm2, %v4986_v47  ;;  %4265 = vmatprep.subr.mxu1 %v4655_v3  ;;  %v1058_v47 = vadd.f32 %v5010_v42, %v4958_v46 }
0x25d4   :  { %4266 = vmatpush3.msra.mxu1 %v5081_v12  ;;  %4273 = vmatprep.mubr.msk.f32.mxu1 %vm4656_vm1, %v4655_v3 }
0x25d5   :  { %4267 = vmatprep.subr.mxu1 %v4655_v3 }
0x25d6   :  { %4268 = vmatpush3.msra.mxu1 %v5087_v14 }
0x25d7   :  { %4269 = vmatprep.subr.mxu1 %v4655_v3 }
0x25d8   :  { %4270 = vmatpush3.msra.mxu1 %v5096_v15 }
0x25d9   :  { %4271 = vmatprep.subr.mxu1 %v4655_v3 }
0x25da   :  { %4272 = vmatpush3.msra.mxu1 %v5103_v16 }
0x25db   :  { %4287 = vmatprep.subr.mxu1 %v4655_v3 }
0x268b   :  { %v1817_v17 = vpop.f32.mrf.mxu1 }
0x268c   :  { %v1821_v18 = vadd.f32 %v1817_v17, %v1058_v47 }
0x268d   :  { %v4231_v20 = vpop.f32.mrf.mxu1 }
0x268e   :  { %4553 = vtanh.f32 %v1821_v18  ;;  %v1822_v26 = vmul.f32 0.5, %v1821_v18 }
0x2690   :  { %4555 = vtanh.f32 %v1822_v26 }
0x2693   :  { %v1998_v21 = vpop.f32.mrf.mxu1 }
0x2695   :  { %v4253_v22 = vpop.f32.mrf.mxu1 }
0x269b   :  { %v4554_v0 = vpop.eup %4553 }
0x269c   :  { %1829 = vrot.lane.b32.xlu0 %v4554_v0, %s4657_s8 }
0x269d   :  { %v4556_v28 = vpop.eup %4555 }
0x269e   :  { %v1824_v24 = vadd.f32 1.0, %v4556_v28 }
0x26a0   :  { %v1825_v29 = vmul.f32 0.5, %v1824_v24 }
0x26a2   :  { %v1827_v33 = vmul.f32 %v1825_v29, %v1739_v10 }
0x270e   :  { %v1830_v31 = vpop.permute.xlu0 %1829 }
0x270f   :  { %v1832_v32 = vmul.f32 %v1830_v31, %v1825_v29 }
0x2711   :  { %1834 = vrot.lane.b32.xlu1 %v1832_v32, %s4657_s8 }
0x2783   :  { %v1835_v46 = vpop.permute.xlu1 %1834 }
0x2784   :  { %v5125_v42 = vadd.f32 %v1835_v46, %v1827_v33 }
0x2786   :  { %4557 = vtanh.f32 %v5125_v42 }
0x2793   :  { %v4558_v19 = vpop.eup %4557 }
0x2794   :  { %1840 = vrot.lane.b32.xlu0 %v4558_v19, %s4657_s8 }
0x2806   :  { %v1841_v44 = vpop.permute.xlu0 %1840 }
0x2807   :  { %v1843_v35 = vmul.f32 %v1841_v44, %v1825_v29 }
0x2809   :  { %1854 = vrot.lane.b32.xlu1 %v1843_v35, %s4658_s9 }
0x287b   :  { %v5146_v45 = vpop.permute.xlu1 %1854 }
0x287c   :  { %4241 = vmatmul.mubr.msk.f32.vlgmr.msra.gmra.mxu0 %vm159_vm2, %v5146_v45 }
0x287d   :  { %4255 = vmatpush3.msra.mxu0 %v5081_v12  ;;  %4262 = vmatprep.mubr.msk.f32.mxu0 %vm4656_vm1, %v4655_v3 }
0x287e   :  { %4256 = vmatprep.subr.mxu0 %v4655_v3 }
0x287f   :  { %4257 = vmatpush3.msra.mxu0 %v5087_v14 }
0x2880   :  { %4258 = vmatprep.subr.mxu0 %v4655_v3 }
0x2881   :  { %4259 = vmatpush3.msra.mxu0 %v5096_v15 }
0x2882   :  { %4260 = vmatprep.subr.mxu0 %v4655_v3 }
0x2883   :  { %4261 = vmatpush3.msra.mxu0 %v5103_v16 }
0x2884   :  { %4276 = vmatprep.subr.mxu0 %v4655_v3 }
0x293c   :  { %v1924_v49 = vpop.f32.mrf.mxu0 }
0x293d   :  { %v5163_v50 = vadd.f32 %v3776_v48, %v1924_v49 }
0x293e   :  { %v4242_v36 = vpop.f32.mrf.mxu0 }
0x293f   :  { %v2002_v51 = vadd.f32 %v1998_v21, %v5163_v50 }
0x2941   :  { %4559 = vtanh.f32 %v2002_v51  ;;  %v2003_v52 = vmul.f32 0.5, %v2002_v51 }
0x2943   :  { %4561 = vtanh.f32 %v2003_v52 }
0x294e   :  { %v4560_v37 = vpop.eup %4559 }
0x294f   :  { %2010 = vrot.lane.b32.xlu0 %v4560_v37, %s4657_s8 }
0x2950   :  { %v4562_v53 = vpop.eup %4561 }
0x2951   :  { %v2005_v54 = vadd.f32 1.0, %v4562_v53 }
0x2953   :  { %v2006_v38 = vmul.f32 0.5, %v2005_v54 }
0x2955   :  { %v2008_v41 = vmul.f32 %v2006_v38, %v4974_v11 }
0x29c1   :  { %v2011_v27 = vpop.permute.xlu0 %2010 }
0x29c2   :  { %v2013_v55 = vmul.f32 %v2011_v27, %v2006_v38 }
0x29c4   :  { %2015 = vrot.lane.b32.xlu1 %v2013_v55, %s4657_s8 }
0x2a36   :  { %v2016_v56 = vpop.permute.xlu1 %2015 }
0x2a37   :  { %v2018_v57 = vadd.f32 %v2016_v56, %v2008_v41 }
0x2a39   :  { %4563 = vtanh.f32 %v2018_v57 }
0x2a46   :  { %v4564_v58 = vpop.eup %4563 }
0x2a47   :  { %2021 = vrot.lane.b32.xlu0 %v4564_v58, %s4657_s8 }
0x2ab9   :  { %v2022_v25 = vpop.permute.xlu0 %2021 }
0x2aba   :  { %v2024_v59 = vmul.f32 %v2022_v25, %v2006_v38 }
0x2abc   :  { %2026 = vrot.lane.b32.xlu1 %v2024_v59, %s4658_s9 }
0x2b2e   :  { %v5171_v60 = vpop.permute.xlu1 %2026 }
0x2b2f   :  { %4263 = vmatmul.mubr.msk.f32.vlgmr.msra.gmra.mxu0 %vm159_vm2, %v5171_v60 }
0x2b30   :  { %4277 = vmatpush3.msra.mxu0 %v5081_v12  ;;  %4284 = vmatprep.mubr.msk.f32.mxu0 %vm4656_vm1, %v4655_v3 }
0x2b31   :  { %4278 = vmatprep.subr.mxu0 %v4655_v3 }
0x2b32   :  { %4279 = vmatpush3.msra.mxu0 %v5087_v14 }
0x2b33   :  { %4280 = vmatprep.subr.mxu0 %v4655_v3 }
0x2b34   :  { %4281 = vmatpush3.msra.mxu0 %v5096_v15 }
0x2b35   :  { %4282 = vmatprep.subr.mxu0 %v4655_v3 }
0x2b36   :  { %4283 = vmatpush3.msra.mxu0 %v5103_v16 }
0x2b37   :  { %4298 = vmatprep.subr.mxu0 %v4655_v3 }
0x2bef   :  { %v2096_v11 = vpop.f32.mrf.mxu0 }
0x2bf0   :  { %v2100_v61 = vadd.f32 %v2096_v11, %v5163_v50 }
0x2bf1   :  { %v4264_v4 = vpop.f32.mrf.mxu0 }
0x2bf2   :  { %4565 = vtanh.f32 %v2100_v61  ;;  %v2101_v63 = vmul.f32 0.5, %v2100_v61 }
0x2bf4   :  { %4567 = vtanh.f32 %v2101_v63 }
0x2bff   :  { %v4566_v62 = vpop.eup %4565 }
0x2c00   :  { %2108 = vrot.lane.b32.xlu0 %v4566_v62, %s4657_s8 }
0x2c01   :  { %v4568_v1 = vpop.eup %4567 }
0x2c02   :  { %v2103_v6 = vadd.f32 1.0, %v4568_v1 }
0x2c04   :  { %v2104_v2 = vmul.f32 0.5, %v2103_v6 }
0x2c06   :  { %v2106_v7 = vmul.f32 %v2104_v2, %v2018_v57 }
0x2c72   :  { %v2109_v5 = vpop.permute.xlu0 %2108 }
0x2c73   :  { %v2111_v9 = vmul.f32 %v2109_v5, %v2104_v2 }
0x2c75   :  { %2113 = vrot.lane.b32.xlu1 %v2111_v9, %s4657_s8 }
0x2ce7   :  { %v2114_v10 = vpop.permute.xlu1 %2113 }
0x2ce8   :  { %v2116_v43 = vadd.f32 %v2114_v10, %v2106_v7 }
0x2cea   :  { %4569 = vtanh.f32 %v2116_v43 }
0x2cf7   :  { %v4570_v8 = vpop.eup %4569 }
0x2cf8   :  { %2119 = vrot.lane.b32.xlu0 %v4570_v8, %s4657_s8 }
0x2d6a   :  { %v2120_v23 = vpop.permute.xlu0 %2119 }
0x2d6b   :  { %v2122_v13 = vmul.f32 %v2120_v23, %v2104_v2 }
0x2d6d   :  { %2124 = vrot.lane.b32.xlu1 %v2122_v13, %s4658_s9 }
0x2ddf   :  { %v5190_v47 = vpop.permute.xlu1 %2124 }
0x2de0   :  { %4274 = vmatmul.mubr.msk.f32.vlgmr.msra.gmra.mxu1 %vm159_vm2, %v5190_v47 }
0x2de1   :  { %4288 = vmatpush3.msra.mxu1 %v5081_v12  ;;  %4295 = vmatprep.mubr.msk.f32.mxu1 %vm4656_vm1, %v4655_v3 }
0x2de2   :  { %4289 = vmatprep.subr.mxu1 %v4655_v3 }
0x2de3   :  { %4290 = vmatpush3.msra.mxu1 %v5087_v14 }
0x2de4   :  { %4291 = vmatprep.subr.mxu1 %v4655_v3 }
0x2de5   :  { %4292 = vmatpush3.msra.mxu1 %v5096_v15 }
0x2de6   :  { %4293 = vmatprep.subr.mxu1 %v4655_v3 }
0x2de7   :  { %4294 = vmatpush3.msra.mxu1 %v5103_v16 }
0x2de8   :  { %4309 = vmatprep.subr.mxu1 %v4655_v3 }
0x2ea0   :  { %v2194_v17 = vpop.f32.mrf.mxu1 }
0x2ea1   :  { %v2198_v18 = vadd.f32 %v2194_v17, %v5163_v50 }
0x2ea2   :  { %v4275_v20 = vpop.f32.mrf.mxu1 }
0x2ea3   :  { %4571 = vtanh.f32 %v2198_v18  ;;  %v2199_v22 = vmul.f32 0.5, %v2198_v18 }
0x2ea5   :  { %4573 = vtanh.f32 %v2199_v22 }
0x2eb0   :  { %v4572_v21 = vpop.eup %4571 }
0x2eb1   :  { %2206 = vrot.lane.b32.xlu0 %v4572_v21, %s4657_s8 }
0x2eb2   :  { %v4574_v0 = vpop.eup %4573 }
0x2eb3   :  { %v2201_v26 = vadd.f32 1.0, %v4574_v0 }
0x2eb5   :  { %v2202_v28 = vmul.f32 0.5, %v2201_v26  ;;  %v2714_v26 = vld [vmem:[%s5541_s1 + $0xd8] sm:$0xff] }
0x2eb7   :  { %v2204_v31 = vmul.f32 %v2202_v28, %v2116_v43 }
0x2f23   :  { %v2207_v24 = vpop.permute.xlu0 %2206 }
0x2f24   :  { %v2209_v29 = vmul.f32 %v2207_v24, %v2202_v28 }
0x2f26   :  { %2211 = vrot.lane.b32.xlu1 %v2209_v29, %s4657_s8 }
0x2f98   :  { %v2212_v32 = vpop.permute.xlu1 %2211 }
0x2f99   :  { %v2214_v33 = vadd.f32 %v2212_v32, %v2204_v31  ;;  %v2713_v32 = vld [vmem:[%s5541_s1 + $0xd0] sm:$0xff] }
0x2f9b   :  { %4575 = vtanh.f32 %v2214_v33 }
0x2fa8   :  { %v4576_v46 = vpop.eup %4575 }
0x2fa9   :  { %2217 = vrot.lane.b32.xlu0 %v4576_v46, %s4657_s8  ;;  %v2711_v46 = vld [vmem:[%s5541_s1 + $0xc0] sm:$0xff] }
0x301b   :  { %v2218_v34 = vpop.permute.xlu0 %2217 }
0x301c   :  { %v2220_v30 = vmul.f32 %v2218_v34, %v2202_v28 }
0x301e   :  { %2222 = vrot.lane.b32.xlu1 %v2220_v30, %s4658_s9 }
0x3090   :  { %v5209_v39 = vpop.permute.xlu1 %2222 }
0x3091   :  { %4285 = vmatmul.mubr.msk.f32.vlgmr.msra.gmra.mxu0 %vm159_vm2, %v5209_v39 }
0x3092   :  { %4299 = vmatpush3.msra.mxu0 %v5081_v12  ;;  %4306 = vmatprep.mubr.msk.f32.mxu0 %vm4656_vm1, %v4655_v3 }
0x3093   :  { %4300 = vmatprep.subr.mxu0 %v4655_v3 }
0x3094   :  { %4301 = vmatpush3.msra.mxu0 %v5087_v14 }
0x3095   :  { %4302 = vmatprep.subr.mxu0 %v4655_v3 }
0x3096   :  { %4303 = vmatpush3.msra.mxu0 %v5096_v15 }
0x3097   :  { %4304 = vmatprep.subr.mxu0 %v4655_v3 }
0x3098   :  { %4305 = vmatpush3.msra.mxu0 %v5103_v16 }
0x3099   :  { %4320 = vmatprep.subr.mxu0 %v4655_v3 }
0x3151   :  { %v2292_v40 = vpop.f32.mrf.mxu0 }
0x3152   :  { %v2296_v19 = vadd.f32 %v2292_v40, %v5163_v50 }
0x3153   :  { %v4286_v44 = vpop.f32.mrf.mxu0 }
0x3154   :  { %4577 = vtanh.f32 %v2296_v19  ;;  %v2297_v48 = vmul.f32 0.5, %v2296_v19 }
0x3156   :  { %4579 = vtanh.f32 %v2297_v48 }
0x3161   :  { %v4578_v35 = vpop.eup %4577 }
0x3162   :  { %2304 = vrot.lane.b32.xlu0 %v4578_v35, %s4657_s8 }
0x3163   :  { %v4580_v49 = vpop.eup %4579 }
0x3164   :  { %v2299_v36 = vadd.f32 1.0, %v4580_v49 }
0x3166   :  { %v2300_v51 = vmul.f32 0.5, %v2299_v36 }
0x3168   :  { %v2302_v53 = vmul.f32 %v2300_v51, %v2214_v33  ;;  %v2712_v33 = vld [vmem:[%s5541_s1 + $0xc8] sm:$0xff] }
0x31d4   :  { %v2305_v37 = vpop.permute.xlu0 %2304 }
0x31d5   :  { %v2307_v52 = vmul.f32 %v2305_v37, %v2300_v51 }
0x31d7   :  { %2309 = vrot.lane.b32.xlu1 %v2307_v52, %s4657_s8  ;;  %v5296_v52 = vld [vmem:[%s5541_s1 + $0xf8] sm:$0xff] }
0x3249   :  { %v2310_v54 = vpop.permute.xlu1 %2309 }
0x324a   :  { %v2312_v38 = vadd.f32 %v2310_v54, %v2302_v53  ;;  %v5302_v53 = vld [vmem:[%s5541_s1 + $0xf0] sm:$0xff]  ;;  %v5309_v54 = vld [vmem:[%s5541_s1 + $0xe8] sm:$0xff] }
0x324c   :  { %4581 = vtanh.f32 %v2312_v38 }
0x3259   :  { %v4582_v27 = vpop.eup %4581 }
0x325a   :  { %2315 = vrot.lane.b32.xlu0 %v4582_v27, %s4657_s8 }
0x32cc   :  { %v2316_v55 = vpop.permute.xlu0 %2315 }
0x32cd   :  { %v2318_v41 = vmul.f32 %v2316_v55, %v2300_v51 }
0x32cf   :  { %2320 = vrot.lane.b32.xlu1 %v2318_v41, %s4658_s9 }
0x3341   :  { %v5228_v56 = vpop.permute.xlu1 %2320 }
0x3342   :  { %4296 = vmatmul.mubr.msk.f32.vlgmr.msra.gmra.mxu1 %vm159_vm2, %v5228_v56 }
0x3343   :  { %4310 = vmatpush3.msra.mxu1 %v5081_v12  ;;  %4317 = vmatprep.mubr.msk.f32.mxu1 %vm4656_vm1, %v4655_v3 }
0x3344   :  { %4311 = vmatprep.subr.mxu1 %v4655_v3 }
0x3345   :  { %4312 = vmatpush3.msra.mxu1 %v5087_v14 }
0x3346   :  { %4313 = vmatprep.subr.mxu1 %v4655_v3 }
0x3347   :  { %4314 = vmatpush3.msra.mxu1 %v5096_v15 }
0x3348   :  { %4315 = vmatprep.subr.mxu1 %v4655_v3 }
0x3349   :  { %4316 = vmatpush3.msra.mxu1 %v5103_v16 }
0x334a   :  { %4331 = vmatprep.subr.mxu1 %v2714_v26 }
0x3402   :  { %v2390_v57 = vpop.f32.mrf.mxu1 }
0x3403   :  { %v2394_v58 = vadd.f32 %v2390_v57, %v5163_v50 }
0x3404   :  { %v4297_v25 = vpop.f32.mrf.mxu1 }
0x3405   :  { %4583 = vtanh.f32 %v2394_v58  ;;  %v2395_v11 = vmul.f32 0.5, %v2394_v58  ;;  %v5349_v25 = vld [vmem:[%s5541_s1 + $0x100] ss:$0 sm:$0xff] }
0x3407   :  { %4585 = vtanh.f32 %v2395_v11 }
0x3412   :  { %v4584_v59 = vpop.eup %4583 }
0x3413   :  { %2402 = vrot.lane.b32.xlu0 %v4584_v59, %s4657_s8 }
0x3414   :  { %v4586_v61 = vpop.eup %4585 }
0x3415   :  { %v2397_v4 = vadd.f32 1.0, %v4586_v61 }
0x3417   :  { %v2398_v62 = vmul.f32 0.5, %v2397_v4 }
0x3419   :  { %v2400_v6 = vmul.f32 %v2398_v62, %v2312_v38  ;;  %v5316_v38 = vld [vmem:[%s5541_s1 + $0xe0] sm:$0xff] }
0x3485   :  { %v2403_v63 = vpop.permute.xlu0 %2402 }
0x3486   :  { %v2405_v1 = vmul.f32 %v2403_v63, %v2398_v62 }
0x3488   :  { %2407 = vrot.lane.b32.xlu1 %v2405_v1, %s4657_s8 }
0x34fa   :  { %v2408_v2 = vpop.permute.xlu1 %2407 }
0x34fb   :  { %v2410_v5 = vadd.f32 %v2408_v2, %v2400_v6 }
0x34fd   :  { %4587 = vtanh.f32 %v2410_v5 }
0x350a   :  { %v4588_v9 = vpop.eup %4587 }
0x350b   :  { %2413 = vrot.lane.b32.xlu0 %v4588_v9, %s4657_s8 }
0x357d   :  { %v2414_v7 = vpop.permute.xlu0 %2413 }
0x357e   :  { %v2416_v10 = vmul.f32 %v2414_v7, %v2398_v62 }
0x3580   :  { %2418 = vrot.lane.b32.xlu1 %v2416_v10, %s4658_s9 }
0x35f2   :  { %v2419_v43 = vpop.permute.xlu1 %2418 }
0x35f3   :  { %4307 = vmatmul.mubr.msk.f32.vlgmr.msra.gmra.mxu0 %vm159_vm2, %v2419_v43 }
0x35f4   :  { %4321 = vmatpush3.msra.mxu0 %v5081_v12  ;;  %4328 = vmatprep.mubr.msk.f32.mxu0 %vm4656_vm1, %v4655_v3 }
0x35f5   :  { %4322 = vmatprep.subr.mxu0 %v4655_v3 }
0x35f6   :  { %4323 = vmatpush3.msra.mxu0 %v5087_v14 }
0x35f7   :  { %4324 = vmatprep.subr.mxu0 %v4655_v3 }
0x35f8   :  { %4325 = vmatpush3.msra.mxu0 %v5096_v15 }
0x35f9   :  { %4326 = vmatprep.subr.mxu0 %v4655_v3 }
0x35fa   :  { %4327 = vmatpush3.msra.mxu0 %v5103_v16 }
0x35fb   :  { %4351 = vmatprep.subr.mxu0 %v4655_v3 }
0x36b3   :  { %v2488_v8 = vpop.f32.mrf.mxu0 }
0x36b4   :  { %v2492_v12 = vadd.f32 %v2488_v8, %v5163_v50 }
0x36b5   :  { %v4308_v23 = vpop.f32.mrf.mxu0 }
0x36b6   :  { %4589 = vtanh.f32 %v2492_v12  ;;  %v2493_v17 = vmul.f32 0.5, %v2492_v12 }
0x36b8   :  { %4591 = vtanh.f32 %v2493_v17 }
0x36c3   :  { %v4590_v13 = vpop.eup %4589 }
0x36c4   :  { %2500 = vrot.lane.b32.xlu0 %v4590_v13, %s4657_s8 }
0x36c5   :  { %v4592_v14 = vpop.eup %4591 }
0x36c6   :  { %v2495_v18 = vadd.f32 1.0, %v4592_v14 }
0x36c8   :  { %v2496_v20 = vmul.f32 0.5, %v2495_v18 }
0x36ca   :  { %v2498_v16 = vmul.f32 %v2496_v20, %v2410_v5 }
0x3736   :  { %v2501_v15 = vpop.permute.xlu0 %2500 }
0x3737   :  { %v2503_v21 = vmul.f32 %v2501_v15, %v2496_v20 }
0x3739   :  { %2505 = vrot.lane.b32.xlu1 %v2503_v21, %s4657_s8 }
0x37ab   :  { %v2506_v22 = vpop.permute.xlu1 %2505 }
0x37ac   :  { %v2508_v0 = vadd.f32 %v2506_v22, %v2498_v16 }
0x37ae   :  { %4593 = vtanh.f32 %v2508_v0 }
0x37bb   :  { %v4594_v28 = vpop.eup %4593 }
0x37bc   :  { %2511 = vrot.lane.b32.xlu0 %v4594_v28, %s4657_s8 }
0x382e   :  { %v2512_v24 = vpop.permute.xlu0 %2511 }
0x382f   :  { %v2514_v29 = vmul.f32 %v2512_v24, %v2496_v20 }
0x3831   :  { %2516 = vrot.lane.b32.xlu1 %v2514_v29, %s4658_s9 }
0x38a3   :  { %v2517_v31 = vpop.permute.xlu1 %2516 }
0x38a4   :  { %4318 = vmatmul.mubr.msk.f32.vlgmr.msra.gmra.mxu1 %vm159_vm2, %v2517_v31 }
0x38a5   :  { %4332 = vmatpush3.msra.mxu1 %v2714_v26  ;;  %4339 = vmatprep.mubr.msk.f32.mxu1 %vm159_vm2, %v5171_v60 }
0x38a6   :  { %4333 = vmatprep.subr.mxu1 %v2713_v32 }
0x38a7   :  { %4334 = vmatpush3.msra.mxu1 %v2713_v32 }
0x38a8   :  { %4335 = vmatprep.subr.mxu1 %v2712_v33 }
0x38a9   :  { %4336 = vmatpush3.msra.mxu1 %v2712_v33 }
0x38aa   :  { %4337 = vmatprep.subr.mxu1 %v2711_v46 }
0x38ab   :  { %4338 = vmatpush3.msra.mxu1 %v2711_v46 }
0x38ac   :  { %4340 = vmatmul.mubr.msk.f32.vlgmr.msra.gmra.mxu1 %vm159_vm2, %v5190_v47  ;;  %4373 = vmatprep.subr.mxu1 %v4655_v3 }
0x38ad   :  { %4342 = vmatprep.mubr.msk.f32.mxu1 %vm159_vm2, %v5209_v39  ;;  %4374 = vmatpush3.msra.mxu1 %v5296_v52 }
0x38ae   :  { %4375 = vmatprep.subr.mxu1 %v4655_v3 }
0x38af   :  { %4376 = vmatpush3.msra.mxu1 %v5302_v53 }
0x38b0   :  { %4343 = vmatmul.mubr.msk.f32.gmra.mxu1 %vm159_vm2, %v5228_v56  ;;  %4377 = vmatprep.subr.mxu1 %v4655_v3 }
0x38b1   :  { %4345 = vmatprep.mubr.msk.f32.mxu1 %vm159_vm2, %v2419_v43  ;;  %4378 = vmatpush3.msra.mxu1 %v5309_v54 }
0x38b2   :  { %4379 = vmatprep.subr.mxu1 %v4655_v3 }
0x38b3   :  { %4380 = vmatpush3.msra.mxu1 %v5316_v38 }
0x38b4   :  { %4346 = vmatmul.mubr.msk.f32.gmra.mxu1 %vm159_vm2, %v2517_v31  ;;  %4395 = vmatprep.subr.mxu1 %v4655_v3 }
0x3964   :  { %v2586_v60 = vpop.f32.mrf.mxu1 }
0x3965   :  { %v2590_v34 = vadd.f32 %v2586_v60, %v5163_v50 }
0x3966   :  { %v4319_v30 = vpop.f32.mrf.mxu1 }
0x3967   :  { %4595 = vtanh.f32 %v2590_v34  ;;  %v2591_v47 = vmul.f32 0.5, %v2590_v34 }
0x3969   :  { %4597 = vtanh.f32 %v2591_v47 }
0x3974   :  { %v4596_v40 = vpop.eup %4595 }
0x3975   :  { %2598 = vrot.lane.b32.xlu0 %v4596_v40, %s4657_s8 }
0x3976   :  { %v4598_v19 = vpop.eup %4597 }
0x3977   :  { %v2593_v44 = vadd.f32 1.0, %v4598_v19 }
0x3979   :  { %v2594_v39 = vmul.f32 0.5, %v2593_v44 }
0x397b   :  { %v2596_v49 = vmul.f32 %v2594_v39, %v2508_v0 }
0x39e7   :  { %v2599_v35 = vpop.permute.xlu0 %2598 }
0x39e8   :  { %v2601_v48 = vmul.f32 %v2599_v35, %v2594_v39 }
0x39ea   :  { %2603 = vrot.lane.b32.xlu1 %v2601_v48, %s4657_s8 }
0x3a5c   :  { %v2604_v36 = vpop.permute.xlu1 %2603 }
0x3a5d   :  { %v5289_v51 = vadd.f32 %v2604_v36, %v2596_v49 }
0x3a5f   :  { %4599 = vtanh.f32 %v5289_v51 }
0x3a6c   :  { %v4600_v37 = vpop.eup %4599 }
0x3a6d   :  { %2609 = vrot.lane.b32.xlu0 %v4600_v37, %s4657_s8 }
0x3adf   :  { %v2610_v27 = vpop.permute.xlu0 %2609 }
0x3ae0   :  { %v2612_v55 = vmul.f32 %v2610_v27, %v2594_v39 }
0x3ae2   :  { %2614 = vrot.lane.b32.xlu1 %v2612_v55, %s4658_s9 }
0x3b54   :  { %v2615_v41 = vpop.permute.xlu1 %2614 }
0x3b55   :  { %4329 = vmatmul.mubr.msk.f32.vlgmr.msra.gmra.mxu0 %vm159_vm2, %v2615_v41  ;;  %4348 = vmatprep.mubr.msk.f32.mxu1 %vm159_vm2, %v2615_v41 }
0x3b56   :  { %4352 = vmatpush3.msra.mxu0 %v5296_v52  ;;  %4359 = vmatprep.mubr.msk.f32.mxu0 %vm4656_vm1, %v4655_v3 }
0x3b57   :  { %4353 = vmatprep.subr.mxu0 %v4655_v3 }
0x3b58   :  { %4354 = vmatpush3.msra.mxu0 %v5302_v53 }
0x3b59   :  { %4355 = vmatprep.subr.mxu0 %v4655_v3 }
0x3b5a   :  { %4356 = vmatpush3.msra.mxu0 %v5309_v54 }
0x3b5b   :  { %4357 = vmatprep.subr.mxu0 %v4655_v3 }
0x3b5c   :  { %4358 = vmatpush3.msra.mxu0 %v5316_v38 }
0x3b5d   :  { %4360 = vmatmul.mubr.msk.f32.vlgmr.msra.gmra.mxu0 %vm159_vm2, %v5146_v45  ;;  %4362 = vmatprep.subr.mxu0 %v4655_v3  ;;  %v4341_v45 = vpop.f32.mrf.mxu1 }
0x3b5e   :  { %4363 = vmatpush3.msra.mxu0 %v5296_v52  ;;  %4370 = vmatprep.mubr.msk.f32.mxu0 %vm4656_vm1, %v4655_v3  ;;  %v2797_v29 = vadd.f32 %v4341_v45, %v5349_v25 }
0x3b5f   :  { %4364 = vmatprep.subr.mxu0 %v4655_v3  ;;  %v2791_v58 = vpop.f32.mrf.mxu1 }
0x3b60   :  { %4365 = vmatpush3.msra.mxu0 %v5302_v53  ;;  %v2792_v59 = vadd.f32 %v5349_v25, %v2791_v58 }
0x3b61   :  { %4366 = vmatprep.subr.mxu0 %v4655_v3  ;;  %v4344_v27 = vpop.f32.mrf.mxu1 }
0x3b62   :  { %4367 = vmatpush3.msra.mxu0 %v5309_v54 }
0x3b63   :  { %4368 = vmatprep.subr.mxu0 %v4655_v3  ;;  %v2801_v55 = vpop.f32.mrf.mxu1 }
0x3b64   :  { %4369 = vmatpush3.msra.mxu0 %v5316_v38  ;;  %v2802_v58 = vadd.f32 %v5349_v25, %v2801_v55 }
0x3b65   :  { %4384 = vmatprep.subr.mxu0 %v4655_v3  ;;  %v5399_v41 = vpop.f32.mrf.mxu1 }
0x3b67   :  { %v5401_v45 = vpop.f32.mrf.mxu1 }
0x3c15   :  { %v2684_v56 = vpop.f32.mrf.mxu0 }
0x3c16   :  { %v2688_v8 = vadd.f32 %v2684_v56, %v5163_v50 }
0x3c17   :  { %v4330_v57 = vpop.f32.mrf.mxu0 }
0x3c18   :  { %v2689_v13 = vmul.f32 0.5, %v2688_v8 }
0x3c1d   :  { %v2900_v11 = vpop.f32.mrf.mxu0 }
0x3c1e   :  { %v2904_v61 = vadd.f32 %v2900_v11, %v2792_v59 }
0x3c1f   :  { %v4361_v4 = vpop.f32.mrf.mxu0 }
0x3c20   :  { %4601 = vtanh.f32 %v2904_v61  ;;  %v2905_v63 = vmul.f32 0.5, %v2904_v61 }
0x3c22   :  { %4603 = vtanh.f32 %v2905_v63 }
0x3c2d   :  { %v4602_v62 = vpop.eup %4601 }
0x3c2e   :  { %2912 = vrot.lane.b32.xlu0 %v4602_v62, %s4657_s8 }
0x3c2f   :  { %v4604_v1 = vpop.eup %4603 }
0x3c30   :  { %v2907_v6 = vadd.f32 1.0, %v4604_v1 }
0x3c32   :  { %v2908_v2 = vmul.f32 0.5, %v2907_v6 }
0x3c34   :  { %v2910_v7 = vmul.f32 %v2908_v2, %v5125_v42 }
0x3ca0   :  { %v2913_v5 = vpop.permute.xlu0 %2912 }
0x3ca1   :  { %v2915_v9 = vmul.f32 %v2913_v5, %v2908_v2 }
0x3ca3   :  { %2917 = vrot.lane.b32.xlu1 %v2915_v9, %s4657_s8 }
0x3d15   :  { %v2918_v10 = vpop.permute.xlu1 %2917 }
0x3d16   :  { %v2920_v43 = vadd.f32 %v2918_v10, %v2910_v7 }
0x3d18   :  { %4605 = vtanh.f32 %v2920_v43 }
0x3d19   :  { %4607 = vtanh.f32 %v2688_v8 }
0x3d1a   :  { %4609 = vtanh.f32 %v2689_v13  ;;  %v2807_v13 = vadd.f32 %v4344_v27, %v5349_v25 }
0x3d25   :  { %v4606_v12 = vpop.eup %4605 }
0x3d26   :  { %2923 = vrot.lane.b32.xlu0 %v4606_v12, %s4657_s8  ;;  %v4608_v23 = vpop.eup %4607 }
0x3d27   :  { %v4610_v17 = vpop.eup %4609 }
0x3d28   :  { %v2691_v14 = vadd.f32 1.0, %v4610_v17 }
0x3d2a   :  { %2696 = vrot.lane.b32.xlu0 %v4608_v23, %s4657_s8  ;;  %v2692_v42 = vmul.f32 0.5, %v2691_v14 }
0x3d2c   :  { %v2694_v16 = vmul.f32 %v2692_v42, %v5289_v51 }
0x3d98   :  { %v2924_v18 = vpop.permute.xlu0 %2923 }
0x3d99   :  { %v2926_v20 = vmul.f32 %v2924_v18, %v2908_v2 }
0x3d9b   :  { %2928 = vrot.lane.b32.xlu1 %v2926_v20, %s4658_s9 }
0x3d9c   :  { %v2697_v15 = vpop.permute.xlu0 %2696 }
0x3d9d   :  { %v2699_v21 = vmul.f32 %v2697_v15, %v2692_v42 }
0x3d9f   :  { %2701 = vrot.lane.b32.xlu0 %v2699_v21, %s4657_s8 }
0x3e0d   :  { %v5360_v50 = vpop.permute.xlu1 %2928 }
0x3e0e   :  { %4371 = vmatmul.mubr.msk.f32.vlgmr.msra.gmra.mxu0 %vm159_vm2, %v5360_v50 }
0x3e0f   :  { %4385 = vmatpush3.msra.mxu0 %v5296_v52  ;;  %4392 = vmatprep.mubr.msk.f32.mxu0 %vm4656_vm1, %v4655_v3 }
0x3e10   :  { %4386 = vmatprep.subr.mxu0 %v4655_v3 }
0x3e11   :  { %v2702_v22 = vpop.permute.xlu0 %2701  ;;  %4387 = vmatpush3.msra.mxu0 %v5302_v53 }
0x3e12   :  { %v2704_v0 = vadd.f32 %v2702_v22, %v2694_v16  ;;  %4388 = vmatprep.subr.mxu0 %v4655_v3 }
0x3e13   :  { %4389 = vmatpush3.msra.mxu0 %v5309_v54 }
0x3e14   :  { %4611 = vtanh.f32 %v2704_v0  ;;  %4390 = vmatprep.subr.mxu0 %v4655_v3 }
0x3e15   :  { %4391 = vmatpush3.msra.mxu0 %v5316_v38 }
0x3e16   :  { %4406 = vmatprep.subr.mxu0 %v4655_v3 }
0x3e21   :  { %v4612_v26 = vpop.eup %4611 }
0x3e22   :  { %2707 = vrot.lane.b32.xlu0 %v4612_v26, %s4657_s8 }
0x3e94   :  { %v2708_v28 = vpop.permute.xlu0 %2707 }
0x3e95   :  { %v2710_v24 = vmul.f32 %v2708_v28, %v2692_v42 }
0x3e97   :  { %2721 = vrot.lane.b32.xlu0 %v2710_v24, %s4658_s9 }
0x3ece   :  { %v2998_v31 = vpop.f32.mrf.mxu0 }
0x3ecf   :  { %v3002_v32 = vadd.f32 %v2998_v31, %v2797_v29 }
0x3ed0   :  { %v4372_v33 = vpop.f32.mrf.mxu0 }
0x3ed1   :  { %4613 = vtanh.f32 %v3002_v32  ;;  %v3003_v34 = vmul.f32 0.5, %v3002_v32 }
0x3ed3   :  { %4615 = vtanh.f32 %v3003_v34 }
0x3ede   :  { %v4614_v46 = vpop.eup %4613 }
0x3edf   :  { %3010 = vrot.lane.b32.xlu1 %v4614_v46, %s4657_s8  ;;  %v2812_v46 = vadd.f32 %v5349_v25, %v5401_v45 }
0x3ee0   :  { %v4616_v30 = vpop.eup %4615 }
0x3ee1   :  { %v3005_v40 = vadd.f32 1.0, %v4616_v30 }
0x3ee3   :  { %v3006_v47 = vmul.f32 0.5, %v3005_v40 }
0x3ee5   :  { %v3008_v39 = vmul.f32 %v3006_v47, %v2920_v43 }
0x3f09   :  { %v2722_v60 = vpop.permute.xlu0 %2721 }
0x3f0a   :  { %4349 = vmatmul.mubr.msk.f32.gmra.mxu1 %vm159_vm2, %v2722_v60 }
0x3f0b   :  { %4381 = vmatprep.mubr.msk.f32.mxu1 %vm4656_vm1, %v4655_v3 }
0x3f51   :  { %v3011_v19 = vpop.permute.xlu1 %3010 }
0x3f52   :  { %v3013_v44 = vmul.f32 %v3011_v19, %v3006_v47 }
0x3f54   :  { %3015 = vrot.lane.b32.xlu1 %v3013_v44, %s4657_s8 }
0x3fc6   :  { %v3016_v35 = vpop.permute.xlu1 %3015 }
0x3fc7   :  { %v3018_v48 = vadd.f32 %v3016_v35, %v3008_v39 }
0x3fc9   :  { %4617 = vtanh.f32 %v3018_v48 }
0x3fca   :  { %v5403_v56 = vpop.f32.mrf.mxu1 }
0x3fcc   :  { %v5405_v57 = vpop.f32.mrf.mxu1 }
0x3fd6   :  { %v4618_v49 = vpop.eup %4617 }
0x3fd7   :  { %3021 = vrot.lane.b32.xlu1 %v4618_v49, %s4657_s8 }
0x4049   :  { %v3022_v36 = vpop.permute.xlu1 %3021 }
0x404a   :  { %v3024_v51 = vmul.f32 %v3022_v36, %v3006_v47 }
0x404c   :  { %3026 = vrot.lane.b32.xlu1 %v3024_v51, %s4658_s9 }
0x40be   :  { %v5385_v37 = vpop.permute.xlu1 %3026 }
0x40bf   :  { %4382 = vmatmul.mubr.msk.f32.vlgmr.msra.gmra.mxu1 %vm159_vm2, %v5385_v37 }
0x40c0   :  { %4396 = vmatpush3.msra.mxu1 %v5296_v52  ;;  %4403 = vmatprep.mubr.msk.f32.mxu1 %vm4656_vm1, %v4655_v3 }
0x40c1   :  { %4397 = vmatprep.subr.mxu1 %v4655_v3 }
0x40c2   :  { %4398 = vmatpush3.msra.mxu1 %v5302_v53 }
0x40c3   :  { %4399 = vmatprep.subr.mxu1 %v4655_v3 }
0x40c4   :  { %4400 = vmatpush3.msra.mxu1 %v5309_v54 }
0x40c5   :  { %4401 = vmatprep.subr.mxu1 %v4655_v3 }
0x40c6   :  { %4402 = vmatpush3.msra.mxu1 %v5316_v38 }
0x40c7   :  { %4417 = vmatprep.subr.mxu1 %v4655_v3 }
0x417f   :  { %v3096_v59 = vpop.f32.mrf.mxu1 }
0x4180   :  { %v3100_v11 = vadd.f32 %v3096_v59, %v2802_v58  ;;  %v2817_v59 = vadd.f32 %v5399_v41, %v5349_v25  ;;  %v3616_v41 = vld [vmem:[%s5541_s1 + $0x120] sm:$0xff] }
0x4181   :  { %v4383_v61 = vpop.f32.mrf.mxu1 }
0x4182   :  { %4619 = vtanh.f32 %v3100_v11  ;;  %v3101_v62 = vmul.f32 0.5, %v3100_v11 }
0x4184   :  { %4621 = vtanh.f32 %v3101_v62 }
0x418f   :  { %v4620_v4 = vpop.eup %4619 }
0x4190   :  { %3108 = vrot.lane.b32.xlu0 %v4620_v4, %s4657_s8 }
0x4191   :  { %v4622_v63 = vpop.eup %4621 }
0x4192   :  { %v3103_v1 = vadd.f32 1.0, %v4622_v63 }
0x4194   :  { %v3104_v6 = vmul.f32 0.5, %v3103_v1 }
0x4196   :  { %v3106_v9 = vmul.f32 %v3104_v6, %v3018_v48 }
0x4202   :  { %v3109_v2 = vpop.permute.xlu0 %3108 }
0x4203   :  { %v3111_v5 = vmul.f32 %v3109_v2, %v3104_v6 }
0x4205   :  { %3113 = vrot.lane.b32.xlu1 %v3111_v5, %s4657_s8 }
0x4277   :  { %v3114_v7 = vpop.permute.xlu1 %3113 }
0x4278   :  { %v3116_v10 = vadd.f32 %v3114_v7, %v3106_v9 }
0x427a   :  { %4623 = vtanh.f32 %v3116_v10 }
0x4287   :  { %v4624_v43 = vpop.eup %4623 }
0x4288   :  { %3119 = vrot.lane.b32.xlu0 %v4624_v43, %s4657_s8  ;;  %v3615_v43 = vld [vmem:[%s5541_s1 + $0x118] sm:$0xff] }
0x42fa   :  { %v3120_v8 = vpop.permute.xlu0 %3119 }
0x42fb   :  { %v3122_v12 = vmul.f32 %v3120_v8, %v3104_v6  ;;  %v3614_v8 = vld [vmem:[%s5541_s1 + $0x110] sm:$0xff] }
0x42fd   :  { %3124 = vrot.lane.b32.xlu1 %v3122_v12, %s4658_s9  ;;  %v3613_v12 = vld [vmem:[%s5541_s1 + $0x108] sm:$0xff] }
0x436f   :  { %v5412_v23 = vpop.permute.xlu1 %3124 }
0x4370   :  { %4393 = vmatmul.mubr.msk.f32.vlgmr.msra.gmra.mxu0 %vm159_vm2, %v5412_v23 }
0x4371   :  { %4407 = vmatpush3.msra.mxu0 %v5296_v52  ;;  %4414 = vmatprep.mubr.msk.f32.mxu0 %vm4656_vm1, %v4655_v3 }
0x4372   :  { %4408 = vmatprep.subr.mxu0 %v4655_v3 }
0x4373   :  { %4409 = vmatpush3.msra.mxu0 %v5302_v53 }
0x4374   :  { %4410 = vmatprep.subr.mxu0 %v4655_v3 }
0x4375   :  { %4411 = vmatpush3.msra.mxu0 %v5309_v54 }
0x4376   :  { %4412 = vmatprep.subr.mxu0 %v4655_v3 }
0x4377   :  { %4413 = vmatpush3.msra.mxu0 %v5316_v38 }
0x4378   :  { %4428 = vmatprep.subr.mxu0 %v4655_v3 }
0x4430   :  { %v3194_v17 = vpop.f32.mrf.mxu0 }
0x4431   :  { %v3198_v14 = vadd.f32 %v3194_v17, %v2807_v13 }
0x4432   :  { %v4394_v18 = vpop.f32.mrf.mxu0 }
0x4433   :  { %4625 = vtanh.f32 %v3198_v14  ;;  %v3199_v42 = vmul.f32 0.5, %v3198_v14 }
0x4435   :  { %4627 = vtanh.f32 %v3199_v42 }
0x4440   :  { %v4626_v20 = vpop.eup %4625 }
0x4441   :  { %3206 = vrot.lane.b32.xlu0 %v4626_v20, %s4657_s8 }
0x4442   :  { %v4628_v15 = vpop.eup %4627 }
0x4443   :  { %v3201_v21 = vadd.f32 1.0, %v4628_v15 }
0x4445   :  { %v3202_v16 = vmul.f32 0.5, %v3201_v21 }
0x4447   :  { %v3204_v26 = vmul.f32 %v3202_v16, %v3116_v10 }
0x44b3   :  { %v3207_v22 = vpop.permute.xlu0 %3206 }
0x44b4   :  { %v3209_v0 = vmul.f32 %v3207_v22, %v3202_v16 }
0x44b6   :  { %3211 = vrot.lane.b32.xlu1 %v3209_v0, %s4657_s8 }
0x4528   :  { %v3212_v28 = vpop.permute.xlu1 %3211 }
0x4529   :  { %v3214_v24 = vadd.f32 %v3212_v28, %v3204_v26 }
0x452b   :  { %4629 = vtanh.f32 %v3214_v24 }
0x4538   :  { %v4630_v29 = vpop.eup %4629 }
0x4539   :  { %3217 = vrot.lane.b32.xlu0 %v4630_v29, %s4657_s8 }
0x45ab   :  { %v3218_v31 = vpop.permute.xlu0 %3217 }
0x45ac   :  { %v3220_v32 = vmul.f32 %v3218_v31, %v3202_v16 }
0x45ae   :  { %3222 = vrot.lane.b32.xlu1 %v3220_v32, %s4658_s9 }
0x4620   :  { %v5431_v33 = vpop.permute.xlu1 %3222 }
0x4621   :  { %4404 = vmatmul.mubr.msk.f32.vlgmr.msra.gmra.mxu1 %vm159_vm2, %v5431_v33 }
0x4622   :  { %4418 = vmatpush3.msra.mxu1 %v5296_v52  ;;  %4425 = vmatprep.mubr.msk.f32.mxu1 %vm4656_vm1, %v4655_v3 }
0x4623   :  { %4419 = vmatprep.subr.mxu1 %v4655_v3 }
0x4624   :  { %4420 = vmatpush3.msra.mxu1 %v5302_v53 }
0x4625   :  { %4421 = vmatprep.subr.mxu1 %v4655_v3 }
0x4626   :  { %4422 = vmatpush3.msra.mxu1 %v5309_v54 }
0x4627   :  { %4423 = vmatprep.subr.mxu1 %v4655_v3 }
0x4628   :  { %4424 = vmatpush3.msra.mxu1 %v5316_v38 }
0x4629   :  { %4439 = vmatprep.subr.mxu1 %v3616_v41 }
0x46e1   :  { %v3292_v60 = vpop.f32.mrf.mxu1 }
0x46e2   :  { %v3296_v34 = vadd.f32 %v3292_v60, %v2812_v46 }
0x46e3   :  { %v4405_v30 = vpop.f32.mrf.mxu1 }
0x46e4   :  { %4631 = vtanh.f32 %v3296_v34  ;;  %v3297_v47 = vmul.f32 0.5, %v3296_v34 }
0x46e6   :  { %4633 = vtanh.f32 %v3297_v47 }
0x46f1   :  { %v4632_v40 = vpop.eup %4631 }
0x46f2   :  { %3304 = vrot.lane.b32.xlu0 %v4632_v40, %s4657_s8 }
0x46f3   :  { %v4634_v19 = vpop.eup %4633 }
0x46f4   :  { %v3299_v44 = vadd.f32 1.0, %v4634_v19 }
0x46f6   :  { %v3300_v39 = vmul.f32 0.5, %v3299_v44 }
0x46f8   :  { %v3302_v49 = vmul.f32 %v3300_v39, %v3214_v24 }
0x4764   :  { %v3305_v35 = vpop.permute.xlu0 %3304 }
0x4765   :  { %v3307_v48 = vmul.f32 %v3305_v35, %v3300_v39  ;;  %v2827_v35 = vadd.f32 %v5403_v56, %v5349_v25 }
0x4767   :  { %3309 = vrot.lane.b32.xlu1 %v3307_v48, %s4657_s8 }
0x47d9   :  { %v3310_v36 = vpop.permute.xlu1 %3309 }
0x47da   :  { %v3312_v51 = vadd.f32 %v3310_v36, %v3302_v49 }
0x47dc   :  { %4635 = vtanh.f32 %v3312_v51 }
0x47e9   :  { %v4636_v27 = vpop.eup %4635 }
0x47ea   :  { %3315 = vrot.lane.b32.xlu0 %v4636_v27, %s4657_s8 }
0x485c   :  { %v3316_v55 = vpop.permute.xlu0 %3315 }
0x485d   :  { %v3318_v45 = vmul.f32 %v3316_v55, %v3300_v39 }
0x485f   :  { %3320 = vrot.lane.b32.xlu1 %v3318_v45, %s4658_s9 }
0x48d1   :  { %v3321_v58 = vpop.permute.xlu1 %3320 }
0x48d2   :  { %4415 = vmatmul.mubr.msk.f32.vlgmr.msra.gmra.mxu0 %vm159_vm2, %v3321_v58 }
0x48d3   :  { %4429 = vmatpush3.msra.mxu0 %v5296_v52  ;;  %4436 = vmatprep.mubr.msk.f32.mxu0 %vm4656_vm1, %v4655_v3 }
0x48d4   :  { %4430 = vmatprep.subr.mxu0 %v4655_v3 }
0x48d5   :  { %4431 = vmatpush3.msra.mxu0 %v5302_v53 }
0x48d6   :  { %4432 = vmatprep.subr.mxu0 %v4655_v3 }
0x48d7   :  { %4433 = vmatpush3.msra.mxu0 %v5309_v54 }
0x48d8   :  { %4434 = vmatprep.subr.mxu0 %v4655_v3 }
0x48d9   :  { %4435 = vmatpush3.msra.mxu0 %v5316_v38 }
0x4992   :  { %v3390_v11 = vpop.f32.mrf.mxu0 }
0x4993   :  { %v3394_v52 = vadd.f32 %v3390_v11, %v2817_v59 }
0x4994   :  { %v4416_v61 = vpop.f32.mrf.mxu0 }
0x4995   :  { %4637 = vtanh.f32 %v3394_v52  ;;  %v3395_v62 = vmul.f32 0.5, %v3394_v52 }
0x4997   :  { %4639 = vtanh.f32 %v3395_v62 }
0x49a2   :  { %v4638_v4 = vpop.eup %4637 }
0x49a3   :  { %3402 = vrot.lane.b32.xlu0 %v4638_v4, %s4657_s8 }
0x49a4   :  { %v4640_v53 = vpop.eup %4639 }
0x49a5   :  { %v3397_v63 = vadd.f32 1.0, %v4640_v53 }
0x49a7   :  { %v3398_v1 = vmul.f32 0.5, %v3397_v63 }
0x49a9   :  { %v3400_v3 = vmul.f32 %v3398_v1, %v3312_v51 }
0x4a15   :  { %v3403_v54 = vpop.permute.xlu0 %3402 }
0x4a16   :  { %v3405_v6 = vmul.f32 %v3403_v54, %v3398_v1 }
0x4a18   :  { %3407 = vrot.lane.b32.xlu1 %v3405_v6, %s4657_s8 }
0x4a8a   :  { %v3408_v38 = vpop.permute.xlu1 %3407 }
0x4a8b   :  { %v3410_v2 = vadd.f32 %v3408_v38, %v3400_v3 }
0x4a8d   :  { %4641 = vtanh.f32 %v3410_v2 }
0x4a9a   :  { %v4642_v5 = vpop.eup %4641 }
0x4a9b   :  { %3413 = vrot.lane.b32.xlu0 %v4642_v5, %s4657_s8 }
0x4b0d   :  { %v3414_v9 = vpop.permute.xlu0 %3413 }
0x4b0e   :  { %v3416_v7 = vmul.f32 %v3414_v9, %v3398_v1 }
0x4b10   :  { %3418 = vrot.lane.b32.xlu1 %v3416_v7, %s4658_s9 }
0x4b82   :  { %v3419_v10 = vpop.permute.xlu1 %3418 }
0x4b83   :  { %4426 = vmatmul.mubr.msk.f32.vlgmr.msra.gmra.mxu1 %vm159_vm2, %v3419_v10 }
0x4b84   :  { %4440 = vmatpush3.msra.mxu1 %v3616_v41  ;;  %4447 = vmatprep.mubr.msk.f32.mxu1 %vm159_vm2, %v5360_v50  ;;  %v2822_v50 = vadd.f32 %v5349_v25, %v5405_v57 }
0x4b85   :  { %4441 = vmatprep.subr.mxu1 %v3615_v43 }
0x4b86   :  { %4442 = vmatpush3.msra.mxu1 %v3615_v43 }
0x4b87   :  { %4443 = vmatprep.subr.mxu1 %v3614_v8 }
0x4b88   :  { %4444 = vmatpush3.msra.mxu1 %v3614_v8 }
0x4b89   :  { %4445 = vmatprep.subr.mxu1 %v3613_v12 }
0x4b8a   :  { %4446 = vmatpush3.msra.mxu1 %v3613_v12 }
0x4b8b   :  { %4448 = vmatmul.mubr.msk.f32.vlgmr.msra.gmra.mxu1 %vm159_vm2, %v5385_v37  ;;  %v5494_v37 = vld [vmem:[%s5541_s1 + $0x128] ss:$0 sm:$0xff] }
0x4b8c   :  { %4450 = vmatprep.mubr.msk.f32.mxu1 %vm159_vm2, %v5412_v23 }
0x4b8f   :  { %4451 = vmatmul.mubr.msk.f32.gmra.mxu1 %vm159_vm2, %v5431_v33 }
0x4b90   :  { %4453 = vmatprep.mubr.msk.f32.mxu1 %vm159_vm2, %v3321_v58 }
0x4b93   :  { %4454 = vmatmul.mubr.msk.f32.gmra.mxu1 %vm159_vm2, %v3419_v10 }
0x4c43   :  { %v3488_v13 = vpop.f32.mrf.mxu1 }
0x4c44   :  { %v3492_v17 = vadd.f32 %v3488_v13, %v2822_v50 }
0x4c45   :  { %v4427_v14 = vpop.f32.mrf.mxu1 }
0x4c46   :  { %4643 = vtanh.f32 %v3492_v17  ;;  %v3493_v29 = vmul.f32 0.5, %v3492_v17 }
0x4c48   :  { %4645 = vtanh.f32 %v3493_v29 }
0x4c4b   :  { %v4449_v23 = vpop.f32.mrf.mxu1 }
0x4c4c   :  { %v3699_v18 = vadd.f32 %v4449_v23, %v5494_v37 }
0x4c4d   :  { %v3693_v20 = vpop.f32.mrf.mxu1 }
0x4c4e   :  { %3733 = vst [vmem:[%s5543_s2 + $0x8] sm:$0xff] %v3699_v18  ;;  %v3694_v42 = vadd.f32 %v5494_v37, %v3693_v20 }
0x4c4f   :  { %v4452_v57 = vpop.f32.mrf.mxu1 }
0x4c50   :  { %3732 = vst [vmem:[%s5543_s2] sm:$0xff] %v3694_v42  ;;  %v3709_v15 = vadd.f32 %v4452_v57, %v5494_v37 }
0x4c51   :  { %v3703_v21 = vpop.f32.mrf.mxu1 }
0x4c52   :  { %3735 = vst [vmem:[%s5543_s2 + $0x18] sm:$0xff] %v3709_v15  ;;  %v3704_v16 = vadd.f32 %v5494_v37, %v3703_v21 }
0x4c53   :  { %v4644_v22 = vpop.eup %4643  ;;  %v4455_v0 = vpop.f32.mrf.mxu1 }
0x4c54   :  { %3734 = vst [vmem:[%s5543_s2 + $0x10] sm:$0xff] %v3704_v16  ;;  %v3719_v26 = vadd.f32 %v4455_v0, %v5494_v37  ;;  %3500 = vrot.lane.b32.xlu0 %v4644_v22, %s4657_s8 }
0x4c55   :  { %v3713_v28 = vpop.f32.mrf.mxu1  ;;  %v4646_v31 = vpop.eup %4645 }
0x4c56   :  { %3737 = vst [vmem:[%s5543_s2 + $0x28] sm:$0xff] %v3719_v26  ;;  %v3714_v24 = vadd.f32 %v5494_v37, %v3713_v28  ;;  %v3495_v32 = vadd.f32 1.0, %v4646_v31 }
0x4c58   :  { %3736 = vst [vmem:[%s5543_s2 + $0x20] sm:$0xff] %v3714_v24  ;;  %v3496_v33 = vmul.f32 0.5, %v3495_v32 }
0x4c5a   :  { %v3498_v34 = vmul.f32 %v3496_v33, %v3410_v2 }
0x4cc6   :  { %v3501_v46 = vpop.permute.xlu0 %3500 }
0x4cc7   :  { %v3503_v60 = vmul.f32 %v3501_v46, %v3496_v33 }
0x4cc9   :  { %3505 = vrot.lane.b32.xlu1 %v3503_v60, %s4657_s8 }
0x4d3b   :  { %v3506_v30 = vpop.permute.xlu1 %3505 }
0x4d3c   :  { %v3508_v40 = vadd.f32 %v3506_v30, %v3498_v34 }
0x4d3e   :  { %4647 = vtanh.f32 %v3508_v40 }
0x4d4b   :  { %v4648_v47 = vpop.eup %4647 }
0x4d4c   :  { %3511 = vrot.lane.b32.xlu0 %v4648_v47, %s4657_s8 }
0x4dbe   :  { %v3512_v19 = vpop.permute.xlu0 %3511 }
0x4dbf   :  { %v3514_v44 = vmul.f32 %v3512_v19, %v3496_v33 }
0x4dc1   :  { %3516 = vrot.lane.b32.xlu1 %v3514_v44, %s4658_s9 }
0x4e33   :  { %v3517_v39 = vpop.permute.xlu1 %3516 }
0x4e34   :  { %4437 = vmatmul.mubr.msk.f32.vlgmr.msra.gmra.mxu0 %vm159_vm2, %v3517_v39  ;;  %4456 = vmatprep.mubr.msk.f32.mxu1 %vm159_vm2, %v3517_v39 }
0x4ef4   :  { %v3586_v48 = vpop.f32.mrf.mxu0 }
0x4ef5   :  { %v3590_v49 = vadd.f32 %v3586_v48, %v2827_v35 }
0x4ef6   :  { %v4438_v36 = vpop.f32.mrf.mxu0 }
0x4ef7   :  { %4649 = vtanh.f32 %v3590_v49  ;;  %v3591_v27 = vmul.f32 0.5, %v3590_v49 }
0x4ef9   :  { %4651 = vtanh.f32 %v3591_v27 }
0x4f04   :  { %v4650_v51 = vpop.eup %4649 }
0x4f05   :  { %3598 = vrot.lane.b32.xlu0 %v4650_v51, %s4657_s8 }
0x4f06   :  { %v4652_v55 = vpop.eup %4651 }
0x4f07   :  { %v3593_v45 = vadd.f32 1.0, %v4652_v55 }
0x4f09   :  { %v3594_v58 = vmul.f32 0.5, %v3593_v45 }
0x4f0b   :  { %v3596_v52 = vmul.f32 %v3594_v58, %v3508_v40 }
0x4f77   :  { %v3599_v59 = vpop.permute.xlu0 %3598 }
0x4f78   :  { %v3601_v11 = vmul.f32 %v3599_v59, %v3594_v58 }
0x4f7a   :  { %3603 = vrot.lane.b32.xlu1 %v3601_v11, %s4657_s8 }
0x4fec   :  { %v3604_v61 = vpop.permute.xlu1 %3603 }
0x4fed   :  { %v3606_v4 = vadd.f32 %v3604_v61, %v3596_v52 }
0x4fef   :  { %4653 = vtanh.f32 %v3606_v4 }
0x4ffc   :  { %v4654_v25 = vpop.eup %4653 }
0x4ffd   :  { %3609 = vrot.lane.b32.xlu0 %v4654_v25, %s4657_s8 }
0x506f   :  { %v3610_v56 = vpop.permute.xlu0 %3609 }
0x5070   :  { %v3612_v62 = vmul.f32 %v3610_v56, %v3594_v58 }
0x5072   :  { %3623 = vrot.lane.b32.xlu1 %v3612_v62, %s4658_s9 }
0x50e4   :  { %v3624_v53 = vpop.permute.xlu1 %3623 }
0x50e5   :  { %4457 = vmatmul.mubr.msk.f32.gmra.mxu1 %vm159_vm2, %v3624_v53 }
0x51a5   :  { %v4458_v63 = vpop.f32.mrf.mxu1 }
0x51a6   :  { %v3729_v1 = vadd.f32 %v4458_v63, %v5494_v37 }
0x51a7   :  { %v3723_v54 = vpop.f32.mrf.mxu1 }
0x51a8   :  { %3739 = vst [vmem:[%s5543_s2 + $0x38] sm:$0xff] %v3729_v1  ;;  %v3724_v6 = vadd.f32 %v5494_v37, %v3723_v54 }
0x51aa   :  { %3738 = vst [vmem:[%s5543_s2 + $0x30] sm:$0xff] %v3724_v6 }

</bundles_post_ra>
